<compile_context>
chip_gen: v7x
topology: tpu7x:2x2x1
jax: 0.10.0
libtpu: 0.0.40
codegen_flags: <defaults>
</compile_context>

<pallas_src>
import jax
import jax.numpy as jnp
import numpy as np
from jax.experimental import pallas as pl
from jax.experimental.pallas import tpu as pltpu

EPS = 1e-5     # PyTorch BatchNorm2d default eps
KS = 3         # kernel_size=3, stride=1
CPAD = 128     # lane-dense channel padding (real channels = 20)


# ---------------- fused Pallas kernel ----------------

def lstm_policy_kernel(x_ref, hx_ref, cx_ref,
                       s0_ref, w0c_ref, b0_ref, g0_ref, be0_ref,
                       s1_ref, w1c_ref, b1_ref, g1_ref, be1_ref,
                       wih_ref, whh_ref, blstm_ref, wfc_ref, bfc_ref,
                       probs_ref, hxo_ref, cxo_ref,
                       acc0_ref, p1_ref, h1_ref, xpack_ref):
    f32, bf16 = jnp.float32, jnp.bfloat16
    n_off = s0_ref.shape[0]                 # 9 conv offsets
    m0, cpad = acc0_ref.shape               # rows after conv0, lane-padded channels
    m1 = p1_ref.shape[0]                    # rows after conv1
    B, pk = xpack_ref.shape
    P = pk // cpad                          # spatial positions after conv1
    hid = hx_ref.shape[1]

    def bn_relu(y, gamma, beta, count):
        # Training-mode BatchNorm (biased batch stats), two-pass for stability.
        inv = 1.0 / float(count)
        mean = jnp.sum(y, axis=0, keepdims=True) * inv
        d = y - mean
        var = jnp.sum(d * d, axis=0, keepdims=True) * inv
        yhat = d * jax.lax.rsqrt(var + EPS)
        return jnp.maximum(yhat * gamma + beta, 0.0)

    # ---- conv0: one x @ [W0_k]-concat matmul, then 9 lane-dense shifted-row matmuls ----
    x_bf = x_ref[...].astype(bf16)                                       # (B*H*W, Cin)
    xw = jnp.dot(x_bf, w0c_ref[...], preferred_element_type=f32)         # (B*H*W, 9*128)
    xw_bf = xw.astype(bf16)
    acc0_ref[...] = jnp.zeros_like(acc0_ref)
    for k in range(n_off):                                               # adjacent accumulating dots
        acc0_ref[...] += jnp.dot(s0_ref[k], xw_bf[:, k * cpad:(k + 1) * cpad],
                                 preferred_element_type=f32)
    h0 = bn_relu(acc0_ref[...] + b0_ref[...], g0_ref[...], be0_ref[...], m0)
    h0_bf = h0.astype(bf16)

    # ---- conv1: 9 selection matmuls K-concatenated in VMEM, one big weight matmul ----
    for k in range(n_off):
        p1_ref[:, k * cpad:(k + 1) * cpad] = jnp.dot(
            s1_ref[k], h0_bf, preferred_element_type=f32)                # (m1, 128) per offset
    acc1 = jnp.dot(p1_ref[...].astype(bf16), w1c_ref[...],
                   preferred_element_type=f32)                           # (m1, 128)
    h1_ref[...] = bn_relu(acc1 + b1_ref[...], g1_ref[...], be1_ref[...], m1)

    # ---- pack conv1 rows (position-major ordering) into (B, P*128) lanes ----
    for p in range(P):
        xpack_ref[:, p * cpad:(p + 1) * cpad] = h1_ref[p * B:(p + 1) * B, :]

    # ---- LSTMCell: single input matmul (NCHW flatten folded into wih_big) ----
    hx = hx_ref[...]
    cx = cx_ref[...]
    gates = (jnp.dot(xpack_ref[...].astype(bf16), wih_ref[...],
                     preferred_element_type=f32)
             + jnp.dot(hx.astype(bf16), whh_ref[...], preferred_element_type=f32)
             + blstm_ref[...])                                           # (B, 4H)
    sig = jax.nn.sigmoid(gates)     # full-width, 1 EUP pass
    th = jnp.tanh(gates)            # full-width, 1 EUP pass
    i_g = sig[:, 0:hid]
    f_g = sig[:, hid:2 * hid]
    g_g = th[:, 2 * hid:3 * hid]
    o_g = sig[:, 3 * hid:4 * hid]
    c_new = f_g * cx + i_g * g_g
    h_new = o_g * jnp.tanh(c_new)

    # ---- fc0 + softmax (tiny, kept in f32) ----
    logits = jnp.dot(h_new, wfc_ref[...], preferred_element_type=f32) + bfc_ref[...]
    z = logits - jnp.max(logits, axis=-1, keepdims=True)
    e = jnp.exp(z)
    probs_ref[...] = e / jnp.sum(e, axis=-1, keepdims=True)
    hxo_ref[...] = h_new
    cxo_ref[...] = c_new


# ---------------- wrapper ----------------

def lstm_policy_forward(prep, x, hx, cx):
    if x.ndim != 4:
        raise Exception("Input tensor dimension not equal to 4!")
    B, C, H, W = x.shape
    hid = hx.shape[1]
    act = prep["bfc"].shape[1]
    H1, W1 = H - KS + 1, W - KS + 1
    H2, W2 = H1 - KS + 1, W1 - KS + 1
    m0, m1, P = B * H1 * W1, B * H2 * W2, H2 * W2

    # Only runtime glue: NCHW -> NHWC-flat rows (2 KB; cannot be hoisted).
    x2d = jnp.transpose(x, (0, 2, 3, 1)).reshape(B * H * W, C)

    args = (x2d, hx, cx,
            prep["s0"], prep["w0cat"], prep["b0"], prep["g0"], prep["be0"],
            prep["s1"], prep["w1cat"], prep["b1"], prep["g1"], prep["be1"],
            prep["wih_big"], prep["whht"], prep["blstm"],
            prep["wfct"], prep["bfc"])

    probs, hx_new, cx_new = pl.pallas_call(
        lstm_policy_kernel,
        out_shape=(jax.ShapeDtypeStruct((B, act), jnp.float32),
                   jax.ShapeDtypeStruct((B, hid), jnp.float32),
                   jax.ShapeDtypeStruct((B, hid), jnp.float32)),
        in_specs=[pl.BlockSpec(memory_space=pltpu.MemorySpace.VMEM)] * len(args),
        out_specs=(pl.BlockSpec(memory_space=pltpu.MemorySpace.VMEM),) * 3,
        scratch_shapes=[
            pltpu.VMEM((m0, CPAD), jnp.float32),           # acc0 (conv0 accumulator)
            pltpu.VMEM((m1, KS * KS * CPAD), jnp.float32),  # conv1 K-concatenated patches
            pltpu.VMEM((m1, CPAD), jnp.float32),            # h1 (conv1 activations)
            pltpu.VMEM((B, P * CPAD), jnp.float32),         # packed LSTM input rows
        ],
    )(*args)
    return probs, hx_new, cx_new


# ---------------- one-time parameter / constant preparation ----------------

def prepare_kernel_params(params, num_channels, grid_size, hidden_dim, action_dim, batch):
    Cin, Cout, B = num_channels, 20, batch
    H = W = grid_size
    H1 = W1 = H - KS + 1
    H2 = W2 = H1 - KS + 1
    P = H2 * W2
    fourH = 4 * hidden_dim
    m0 = B * H1 * W1
    m1 = B * H2 * W2
    assert Cout <= CPAD  # padded lanes must stay zero (weights/bias/gamma/beta pads are zero)

    w0 = np.asarray(params["conv0_w"], np.float32)      # (Cout, Cin, 3, 3)
    w1 = np.asarray(params["conv1_w"], np.float32)      # (Cout, Cout, 3, 3)
    wih = np.asarray(params["lstm_w_ih"], np.float32)   # (4H, Cout*P)
    whh = np.asarray(params["lstm_w_hh"], np.float32)   # (4H, hid)
    wfc = np.asarray(params["fc_w"], np.float32)        # (A, hid)

    # conv0: shifted-row selection matrices + lane-concatenated weight (Cin, 9*CPAD)
    s0 = np.zeros((KS * KS, m0, B * H * W), np.float32)
    w0cat = np.zeros((Cin, KS * KS * CPAD), np.float32)
    for dy in range(KS):
        for dx in range(KS):
            k = dy * KS + dx
            w0cat[:, k * CPAD:k * CPAD + Cout] = w0[:, :, dy, dx].T
            for b in range(B):
                for y in range(H1):
                    for xx in range(W1):
                        s0[k, b * H1 * W1 + y * W1 + xx,
                           b * H * W + (y + dy) * W + (xx + dx)] = 1.0

    # conv1: selection matrices with position-major output rows + K-concatenated weight
    s1 = np.zeros((KS * KS, m1, m0), np.float32)
    w1cat = np.zeros((KS * KS * CPAD, CPAD), np.float32)
    for dy in range(KS):
        for dx in range(KS):
            k = dy * KS + dx
            w1cat[k * CPAD:k * CPAD + Cout, :Cout] = w1[:, :, dy, dx].T
            for b in range(B):
                for y in range(H2):
                    for xx in range(W2):
                        p = y * W2 + xx
                        s1[k, p * B + b,
                           b * H1 * W1 + (y + dy) * W1 + (xx + dx)] = 1.0

    # LSTM input weight: NCHW-flatten permutation folded in, laid out for packed (B, P*CPAD) rows
    wih_big = np.zeros((P * CPAD, fourH), np.float32)
    for p in range(P):
        for c in range(Cout):
            wih_big[p * CPAD + c, :] = wih[:, c * P + p]

    def pad_row(v, n):
        o = np.zeros((1, n), np.float32)
        vv = np.asarray(v, np.float32)
        o[0, :vv.shape[0]] = vv
        return o

    prep_np = dict(
        s0=s0, w0cat=w0cat,
        b0=pad_row(params["conv0_b"], CPAD), g0=pad_row(params["bn0_g"], CPAD),
        be0=pad_row(params["bn0_b"], CPAD),
        s1=s1, w1cat=w1cat,
        b1=pad_row(params["conv1_b"], CPAD), g1=pad_row(params["bn1_g"], CPAD),
        be1=pad_row(params["bn1_b"], CPAD),
        wih_big=wih_big,
        whht=np.asarray(whh.T, np.float32),
        blstm=(np.asarray(params["lstm_b_ih"], np.float32)
               + np.asarray(params["lstm_b_hh"], np.float32))[None, :],
        wfct=np.asarray(wfc.T, np.float32),
        bfc=np.asarray(params["fc_b"], np.float32)[None, :],
    )
    # Large matmul constants go to bf16 (halves per-step constant DMA, native MXU path).
    bf16_keys = ("s0", "w0cat", "s1", "w1cat", "wih_big", "whht")
    prep = {}
    for k, v in prep_np.items():
        a = jnp.asarray(v)
        prep[k] = a.astype(jnp.bfloat16) if k in bf16_keys else a
    return prep


# ---------------- parameters (PyTorch layouts) & pure-JAX reference ----------------

def init_params(key, num_channels, grid_size, hidden_dim, action_dim):
    out = 20
    n = grid_size - 2 * (KS - 1)
    feat = out * n * n
    ks = jax.random.split(key, 8)
    rnd = lambda k, shape, s: s * jax.random.normal(k, shape, jnp.float32)
    return {
        "conv0_w": rnd(ks[0], (out, num_channels, KS, KS), 0.1),
        "conv0_b": rnd(ks[1], (out,), 0.1),
        "bn0_g": jnp.ones((out,), jnp.float32), "bn0_b": jnp.zeros((out,), jnp.float32),
        "conv1_w": rnd(ks[2], (out, out, KS, KS), 0.1),
        "conv1_b": rnd(ks[3], (out,), 0.1),
        "bn1_g": jnp.ones((out,), jnp.float32), "bn1_b": jnp.zeros((out,), jnp.float32),
        "lstm_w_ih": rnd(ks[4], (4 * hidden_dim, feat), 0.05),
        "lstm_w_hh": rnd(ks[5], (4 * hidden_dim, hidden_dim), 0.05),
        "lstm_b_ih": rnd(ks[6], (4 * hidden_dim,), 0.05),
        "lstm_b_hh": jnp.zeros((4 * hidden_dim,), jnp.float32),
        "fc_w": rnd(ks[7], (action_dim, hidden_dim), 0.1),
        "fc_b": jnp.zeros((action_dim,), jnp.float32),
    }


def reference_forward(params, x, hx, cx):
    hp = jax.lax.Precision.HIGHEST

    def conv(inp, w, b):
        y = jax.lax.conv_general_dilated(inp, w, (1, 1), "VALID",
                                         dimension_numbers=("NCHW", "OIHW", "NCHW"),
                                         precision=hp)
        return y + b[None, :, None, None]

    def bn(y, g, b):
        mean = jnp.mean(y, axis=(0, 2, 3), keepdims=True)
        var = jnp.mean((y - mean) ** 2, axis=(0, 2, 3), keepdims=True)
        return (y - mean) * jax.lax.rsqrt(var + EPS) * g[None, :, None, None] + b[None, :, None, None]

    h = jax.nn.relu(bn(conv(x, params["conv0_w"], params["conv0_b"]), params["bn0_g"], params["bn0_b"]))
    h = jax.nn.relu(bn(conv(h, params["conv1_w"], params["conv1_b"]), params["bn1_g"], params["bn1_b"]))
    flat = h.reshape(x.shape[0], -1)
    gates = (jnp.dot(flat, params["lstm_w_ih"].T, precision=hp) + params["lstm_b_ih"]
             + jnp.dot(hx, params["lstm_w_hh"].T, precision=hp) + params["lstm_b_hh"])
    H = hx.shape[1]
    i = jax.nn.sigmoid(gates[:, 0:H]); f = jax.nn.sigmoid(gates[:, H:2 * H])
    g = jnp.tanh(gates[:, 2 * H:3 * H]); o = jax.nn.sigmoid(gates[:, 3 * H:4 * H])
    c_new = f * cx + i * g
    h_new = o * jnp.tanh(c_new)
    logits = jnp.dot(h_new, params["fc_w"].T, precision=hp) + params["fc_b"]
    return jax.nn.softmax(logits, axis=-1), h_new, c_new


if __name__ == "__main__":
    num_channels, grid_size, hidden_dim, action_dim, batch = 4, 8, 32, 4, 2
    key = jax.random.PRNGKey(0)
    kx, kh, kc, kp = jax.random.split(key, 4)
    x = jax.random.normal(kx, (batch, num_channels, grid_size, grid_size), jnp.float32)
    hx = 0.1 * jax.random.normal(kh, (batch, hidden_dim), jnp.float32)
    cx = 0.1 * jax.random.normal(kc, (batch, hidden_dim), jnp.float32)

    params = init_params(kp, num_channels, grid_size, hidden_dim, action_dim)
    prep = prepare_kernel_params(params, num_channels, grid_size, hidden_dim, action_dim, batch)

    fwd = jax.jit(lstm_policy_forward)
    probs, hx_new, cx_new = fwd(prep, x, hx, cx)
    probs, hx_new, cx_new = jax.block_until_ready((probs, hx_new, cx_new))

    assert probs.shape == (batch, action_dim) and probs.dtype == jnp.float32
    assert hx_new.shape == (batch, hidden_dim) and cx_new.shape == (batch, hidden_dim)

    r_probs, r_hx, r_cx = reference_forward(params, x, hx, cx)
    max_err = max(float(jnp.max(jnp.abs(probs - r_probs))),
                  float(jnp.max(jnp.abs(hx_new - r_hx))),
                  float(jnp.max(jnp.abs(cx_new - r_cx))))
    # Tolerance accounts for bf16 matmul operands (f32 accumulation) vs the f32 reference.
    assert max_err < 2e-2, f"mismatch vs reference: {max_err}"
    print("KERNEL_OK")
</pallas_src>

<mosaic_0001>
module attributes {stable_mosaic.version = 11 : i64} {
  func.func @lstm_policy_kernel(%arg0: memref<128x4xf32, #tpu.memory_space<vmem>>, %arg1: memref<2x32xf32, #tpu.memory_space<vmem>>, %arg2: memref<2x32xf32, #tpu.memory_space<vmem>>, %arg3: memref<9x72x128xbf16, #tpu.memory_space<vmem>>, %arg4: memref<4x1152xbf16, #tpu.memory_space<vmem>>, %arg5: memref<1x128xf32, #tpu.memory_space<vmem>>, %arg6: memref<1x128xf32, #tpu.memory_space<vmem>>, %arg7: memref<1x128xf32, #tpu.memory_space<vmem>>, %arg8: memref<9x32x72xbf16, #tpu.memory_space<vmem>>, %arg9: memref<1152x128xbf16, #tpu.memory_space<vmem>>, %arg10: memref<1x128xf32, #tpu.memory_space<vmem>>, %arg11: memref<1x128xf32, #tpu.memory_space<vmem>>, %arg12: memref<1x128xf32, #tpu.memory_space<vmem>>, %arg13: memref<2048x128xbf16, #tpu.memory_space<vmem>>, %arg14: memref<32x128xbf16, #tpu.memory_space<vmem>>, %arg15: memref<1x128xf32, #tpu.memory_space<vmem>>, %arg16: memref<32x4xf32, #tpu.memory_space<vmem>>, %arg17: memref<1x4xf32, #tpu.memory_space<vmem>>, %arg18: memref<2x4xf32, #tpu.memory_space<vmem>>, %arg19: memref<2x32xf32, #tpu.memory_space<vmem>>, %arg20: memref<2x32xf32, #tpu.memory_space<vmem>>, %arg21: memref<72x128xf32, #tpu.memory_space<vmem>>, %arg22: memref<32x1152xf32, #tpu.memory_space<vmem>>, %arg23: memref<32x128xf32, #tpu.memory_space<vmem>>, %arg24: memref<2x2048xf32, #tpu.memory_space<vmem>>) attributes {dimension_semantics = [], scalar_prefetch = 0 : i64, scratch_operands = 4 : i64, tpu.core_type = #tpu.core_type<tc>} {
    %c0 = arith.constant 0 : index
    %c0_0 = arith.constant 0 : index
    %0 = vector.load %arg0[%c0, %c0_0] : memref<128x4xf32, #tpu.memory_space<vmem>>, vector<128x4xf32>
    %1 = arith.truncf %0 : vector<128x4xf32> to vector<128x4xbf16>
    %c0_1 = arith.constant 0 : index
    %c0_2 = arith.constant 0 : index
    %2 = vector.load %arg4[%c0_1, %c0_2] : memref<4x1152xbf16, #tpu.memory_space<vmem>>, vector<4x1152xbf16>
    %cst = arith.constant dense<0.000000e+00> : vector<128x1152xf32>
    %3 = tpu.matmul %1, %2, %cst {dimension_numbers = #tpu.dot_dimension_numbers<[1], [0], [0], [1], [0, 0, 1, 1], [], []>} : vector<128x4xbf16>, vector<4x1152xbf16>, vector<128x1152xf32> -> vector<128x1152xf32>
    %4 = arith.truncf %3 : vector<128x1152xf32> to vector<128x1152xbf16>
    %cst_3 = arith.constant 0.000000e+00 : f32
    %5 = vector.broadcast %cst_3 : f32 to vector<72x128xf32>
    %c0_4 = arith.constant 0 : index
    %c0_5 = arith.constant 0 : index
    %6 = vector.load %arg21[%c0_4, %c0_5] : memref<72x128xf32, #tpu.memory_space<vmem>>, vector<72x128xf32>
    tpu.vector_store %arg21[%c0_4, %c0_5], %5 {strides = array<i32>} : memref<72x128xf32, #tpu.memory_space<vmem>>, vector<72x128xf32>,
    %c0_6 = arith.constant 0 : index
    %c0_7 = arith.constant 0 : index
    %7 = vector.load %arg21[%c0_6, %c0_7] : memref<72x128xf32, #tpu.memory_space<vmem>>, vector<72x128xf32>
    %c0_8 = arith.constant 0 : index
    %c0_9 = arith.constant 0 : index
    %c0_10 = arith.constant 0 : index
    %8 = vector.load %arg3[%c0_8, %c0_9, %c0_10] : memref<9x72x128xbf16, #tpu.memory_space<vmem>>, vector<1x72x128xbf16>
    %9 = vector.shape_cast %8 : vector<1x72x128xbf16> to vector<72x128xbf16>
    %10 = vector.extract_strided_slice %4 {offsets = [0, 0], sizes = [128, 128], strides = [1, 1]} : vector<128x1152xbf16> to vector<128x128xbf16>
    %cst_11 = arith.constant dense<0.000000e+00> : vector<72x128xf32>
    %11 = tpu.matmul %9, %10, %cst_11 {dimension_numbers = #tpu.dot_dimension_numbers<[1], [0], [0], [1], [0, 0, 1, 1], [], []>} : vector<72x128xbf16>, vector<128x128xbf16>, vector<72x128xf32> -> vector<72x128xf32>
    %12 = arith.addf %7, %11 : vector<72x128xf32>
    %c0_12 = arith.constant 0 : index
    %c0_13 = arith.constant 0 : index
    %13 = vector.load %arg21[%c0_12, %c0_13] : memref<72x128xf32, #tpu.memory_space<vmem>>, vector<72x128xf32>
    tpu.vector_store %arg21[%c0_12, %c0_13], %12 {strides = array<i32>} : memref<72x128xf32, #tpu.memory_space<vmem>>, vector<72x128xf32>,
    %c0_14 = arith.constant 0 : index
    %c0_15 = arith.constant 0 : index
    %14 = vector.load %arg21[%c0_14, %c0_15] : memref<72x128xf32, #tpu.memory_space<vmem>>, vector<72x128xf32>
    %c1 = arith.constant 1 : index
    %c0_16 = arith.constant 0 : index
    %c0_17 = arith.constant 0 : index
    %15 = vector.load %arg3[%c1, %c0_16, %c0_17] : memref<9x72x128xbf16, #tpu.memory_space<vmem>>, vector<1x72x128xbf16>
    %16 = vector.shape_cast %15 : vector<1x72x128xbf16> to vector<72x128xbf16>
    %17 = vector.extract_strided_slice %4 {offsets = [0, 128], sizes = [128, 128], strides = [1, 1]} : vector<128x1152xbf16> to vector<128x128xbf16>
    %cst_18 = arith.constant dense<0.000000e+00> : vector<72x128xf32>
    %18 = tpu.matmul %16, %17, %cst_18 {dimension_numbers = #tpu.dot_dimension_numbers<[1], [0], [0], [1], [0, 0, 1, 1], [], []>} : vector<72x128xbf16>, vector<128x128xbf16>, vector<72x128xf32> -> vector<72x128xf32>
    %19 = arith.addf %14, %18 : vector<72x128xf32>
    %c0_19 = arith.constant 0 : index
    %c0_20 = arith.constant 0 : index
    %20 = vector.load %arg21[%c0_19, %c0_20] : memref<72x128xf32, #tpu.memory_space<vmem>>, vector<72x128xf32>
    tpu.vector_store %arg21[%c0_19, %c0_20], %19 {strides = array<i32>} : memref<72x128xf32, #tpu.memory_space<vmem>>, vector<72x128xf32>,
    %c0_21 = arith.constant 0 : index
    %c0_22 = arith.constant 0 : index
    %21 = vector.load %arg21[%c0_21, %c0_22] : memref<72x128xf32, #tpu.memory_space<vmem>>, vector<72x128xf32>
    %c2 = arith.constant 2 : index
    %c0_23 = arith.constant 0 : index
    %c0_24 = arith.constant 0 : index
    %22 = vector.load %arg3[%c2, %c0_23, %c0_24] : memref<9x72x128xbf16, #tpu.memory_space<vmem>>, vector<1x72x128xbf16>
    %23 = vector.shape_cast %22 : vector<1x72x128xbf16> to vector<72x128xbf16>
    %24 = vector.extract_strided_slice %4 {offsets = [0, 256], sizes = [128, 128], strides = [1, 1]} : vector<128x1152xbf16> to vector<128x128xbf16>
    %cst_25 = arith.constant dense<0.000000e+00> : vector<72x128xf32>
    %25 = tpu.matmul %23, %24, %cst_25 {dimension_numbers = #tpu.dot_dimension_numbers<[1], [0], [0], [1], [0, 0, 1, 1], [], []>} : vector<72x128xbf16>, vector<128x128xbf16>, vector<72x128xf32> -> vector<72x128xf32>
    %26 = arith.addf %21, %25 : vector<72x128xf32>
    %c0_26 = arith.constant 0 : index
    %c0_27 = arith.constant 0 : index
    %27 = vector.load %arg21[%c0_26, %c0_27] : memref<72x128xf32, #tpu.memory_space<vmem>>, vector<72x128xf32>
    tpu.vector_store %arg21[%c0_26, %c0_27], %26 {strides = array<i32>} : memref<72x128xf32, #tpu.memory_space<vmem>>, vector<72x128xf32>,
    %c0_28 = arith.constant 0 : index
    %c0_29 = arith.constant 0 : index
    %28 = vector.load %arg21[%c0_28, %c0_29] : memref<72x128xf32, #tpu.memory_space<vmem>>, vector<72x128xf32>
    %c3 = arith.constant 3 : index
    %c0_30 = arith.constant 0 : index
    %c0_31 = arith.constant 0 : index
    %29 = vector.load %arg3[%c3, %c0_30, %c0_31] : memref<9x72x128xbf16, #tpu.memory_space<vmem>>, vector<1x72x128xbf16>
    %30 = vector.shape_cast %29 : vector<1x72x128xbf16> to vector<72x128xbf16>
    %31 = vector.extract_strided_slice %4 {offsets = [0, 384], sizes = [128, 128], strides = [1, 1]} : vector<128x1152xbf16> to vector<128x128xbf16>
    %cst_32 = arith.constant dense<0.000000e+00> : vector<72x128xf32>
    %32 = tpu.matmul %30, %31, %cst_32 {dimension_numbers = #tpu.dot_dimension_numbers<[1], [0], [0], [1], [0, 0, 1, 1], [], []>} : vector<72x128xbf16>, vector<128x128xbf16>, vector<72x128xf32> -> vector<72x128xf32>
    %33 = arith.addf %28, %32 : vector<72x128xf32>
    %c0_33 = arith.constant 0 : index
    %c0_34 = arith.constant 0 : index
    %34 = vector.load %arg21[%c0_33, %c0_34] : memref<72x128xf32, #tpu.memory_space<vmem>>, vector<72x128xf32>
    tpu.vector_store %arg21[%c0_33, %c0_34], %33 {strides = array<i32>} : memref<72x128xf32, #tpu.memory_space<vmem>>, vector<72x128xf32>,
    %c0_35 = arith.constant 0 : index
    %c0_36 = arith.constant 0 : index
    %35 = vector.load %arg21[%c0_35, %c0_36] : memref<72x128xf32, #tpu.memory_space<vmem>>, vector<72x128xf32>
    %c4 = arith.constant 4 : index
    %c0_37 = arith.constant 0 : index
    %c0_38 = arith.constant 0 : index
    %36 = vector.load %arg3[%c4, %c0_37, %c0_38] : memref<9x72x128xbf16, #tpu.memory_space<vmem>>, vector<1x72x128xbf16>
    %37 = vector.shape_cast %36 : vector<1x72x128xbf16> to vector<72x128xbf16>
    %38 = vector.extract_strided_slice %4 {offsets = [0, 512], sizes = [128, 128], strides = [1, 1]} : vector<128x1152xbf16> to vector<128x128xbf16>
    %cst_39 = arith.constant dense<0.000000e+00> : vector<72x128xf32>
    %39 = tpu.matmul %37, %38, %cst_39 {dimension_numbers = #tpu.dot_dimension_numbers<[1], [0], [0], [1], [0, 0, 1, 1], [], []>} : vector<72x128xbf16>, vector<128x128xbf16>, vector<72x128xf32> -> vector<72x128xf32>
    %40 = arith.addf %35, %39 : vector<72x128xf32>
    %c0_40 = arith.constant 0 : index
    %c0_41 = arith.constant 0 : index
    %41 = vector.load %arg21[%c0_40, %c0_41] : memref<72x128xf32, #tpu.memory_space<vmem>>, vector<72x128xf32>
    tpu.vector_store %arg21[%c0_40, %c0_41], %40 {strides = array<i32>} : memref<72x128xf32, #tpu.memory_space<vmem>>, vector<72x128xf32>,
    %c0_42 = arith.constant 0 : index
    %c0_43 = arith.constant 0 : index
    %42 = vector.load %arg21[%c0_42, %c0_43] : memref<72x128xf32, #tpu.memory_space<vmem>>, vector<72x128xf32>
    %c5 = arith.constant 5 : index
    %c0_44 = arith.constant 0 : index
    %c0_45 = arith.constant 0 : index
    %43 = vector.load %arg3[%c5, %c0_44, %c0_45] : memref<9x72x128xbf16, #tpu.memory_space<vmem>>, vector<1x72x128xbf16>
    %44 = vector.shape_cast %43 : vector<1x72x128xbf16> to vector<72x128xbf16>
    %45 = vector.extract_strided_slice %4 {offsets = [0, 640], sizes = [128, 128], strides = [1, 1]} : vector<128x1152xbf16> to vector<128x128xbf16>
    %cst_46 = arith.constant dense<0.000000e+00> : vector<72x128xf32>
    %46 = tpu.matmul %44, %45, %cst_46 {dimension_numbers = #tpu.dot_dimension_numbers<[1], [0], [0], [1], [0, 0, 1, 1], [], []>} : vector<72x128xbf16>, vector<128x128xbf16>, vector<72x128xf32> -> vector<72x128xf32>
    %47 = arith.addf %42, %46 : vector<72x128xf32>
    %c0_47 = arith.constant 0 : index
    %c0_48 = arith.constant 0 : index
    %48 = vector.load %arg21[%c0_47, %c0_48] : memref<72x128xf32, #tpu.memory_space<vmem>>, vector<72x128xf32>
    tpu.vector_store %arg21[%c0_47, %c0_48], %47 {strides = array<i32>} : memref<72x128xf32, #tpu.memory_space<vmem>>, vector<72x128xf32>,
    %c0_49 = arith.constant 0 : index
    %c0_50 = arith.constant 0 : index
    %49 = vector.load %arg21[%c0_49, %c0_50] : memref<72x128xf32, #tpu.memory_space<vmem>>, vector<72x128xf32>
    %c6 = arith.constant 6 : index
    %c0_51 = arith.constant 0 : index
    %c0_52 = arith.constant 0 : index
    %50 = vector.load %arg3[%c6, %c0_51, %c0_52] : memref<9x72x128xbf16, #tpu.memory_space<vmem>>, vector<1x72x128xbf16>
    %51 = vector.shape_cast %50 : vector<1x72x128xbf16> to vector<72x128xbf16>
    %52 = vector.extract_strided_slice %4 {offsets = [0, 768], sizes = [128, 128], strides = [1, 1]} : vector<128x1152xbf16> to vector<128x128xbf16>
    %cst_53 = arith.constant dense<0.000000e+00> : vector<72x128xf32>
    %53 = tpu.matmul %51, %52, %cst_53 {dimension_numbers = #tpu.dot_dimension_numbers<[1], [0], [0], [1], [0, 0, 1, 1], [], []>} : vector<72x128xbf16>, vector<128x128xbf16>, vector<72x128xf32> -> vector<72x128xf32>
    %54 = arith.addf %49, %53 : vector<72x128xf32>
    %c0_54 = arith.constant 0 : index
    %c0_55 = arith.constant 0 : index
    %55 = vector.load %arg21[%c0_54, %c0_55] : memref<72x128xf32, #tpu.memory_space<vmem>>, vector<72x128xf32>
    tpu.vector_store %arg21[%c0_54, %c0_55], %54 {strides = array<i32>} : memref<72x128xf32, #tpu.memory_space<vmem>>, vector<72x128xf32>,
    %c0_56 = arith.constant 0 : index
    %c0_57 = arith.constant 0 : index
    %56 = vector.load %arg21[%c0_56, %c0_57] : memref<72x128xf32, #tpu.memory_space<vmem>>, vector<72x128xf32>
    %c7 = arith.constant 7 : index
    %c0_58 = arith.constant 0 : index
    %c0_59 = arith.constant 0 : index
    %57 = vector.load %arg3[%c7, %c0_58, %c0_59] : memref<9x72x128xbf16, #tpu.memory_space<vmem>>, vector<1x72x128xbf16>
    %58 = vector.shape_cast %57 : vector<1x72x128xbf16> to vector<72x128xbf16>
    %59 = vector.extract_strided_slice %4 {offsets = [0, 896], sizes = [128, 128], strides = [1, 1]} : vector<128x1152xbf16> to vector<128x128xbf16>
    %cst_60 = arith.constant dense<0.000000e+00> : vector<72x128xf32>
    %60 = tpu.matmul %58, %59, %cst_60 {dimension_numbers = #tpu.dot_dimension_numbers<[1], [0], [0], [1], [0, 0, 1, 1], [], []>} : vector<72x128xbf16>, vector<128x128xbf16>, vector<72x128xf32> -> vector<72x128xf32>
    %61 = arith.addf %56, %60 : vector<72x128xf32>
    %c0_61 = arith.constant 0 : index
    %c0_62 = arith.constant 0 : index
    %62 = vector.load %arg21[%c0_61, %c0_62] : memref<72x128xf32, #tpu.memory_space<vmem>>, vector<72x128xf32>
    tpu.vector_store %arg21[%c0_61, %c0_62], %61 {strides = array<i32>} : memref<72x128xf32, #tpu.memory_space<vmem>>, vector<72x128xf32>,
    %c0_63 = arith.constant 0 : index
    %c0_64 = arith.constant 0 : index
    %63 = vector.load %arg21[%c0_63, %c0_64] : memref<72x128xf32, #tpu.memory_space<vmem>>, vector<72x128xf32>
    %c8 = arith.constant 8 : index
    %c0_65 = arith.constant 0 : index
    %c0_66 = arith.constant 0 : index
    %64 = vector.load %arg3[%c8, %c0_65, %c0_66] : memref<9x72x128xbf16, #tpu.memory_space<vmem>>, vector<1x72x128xbf16>
    %65 = vector.shape_cast %64 : vector<1x72x128xbf16> to vector<72x128xbf16>
    %66 = vector.extract_strided_slice %4 {offsets = [0, 1024], sizes = [128, 128], strides = [1, 1]} : vector<128x1152xbf16> to vector<128x128xbf16>
    %cst_67 = arith.constant dense<0.000000e+00> : vector<72x128xf32>
    %67 = tpu.matmul %65, %66, %cst_67 {dimension_numbers = #tpu.dot_dimension_numbers<[1], [0], [0], [1], [0, 0, 1, 1], [], []>} : vector<72x128xbf16>, vector<128x128xbf16>, vector<72x128xf32> -> vector<72x128xf32>
    %68 = arith.addf %63, %67 : vector<72x128xf32>
    %c0_68 = arith.constant 0 : index
    %c0_69 = arith.constant 0 : index
    %69 = vector.load %arg21[%c0_68, %c0_69] : memref<72x128xf32, #tpu.memory_space<vmem>>, vector<72x128xf32>
    tpu.vector_store %arg21[%c0_68, %c0_69], %68 {strides = array<i32>} : memref<72x128xf32, #tpu.memory_space<vmem>>, vector<72x128xf32>,
    %c0_70 = arith.constant 0 : index
    %c0_71 = arith.constant 0 : index
    %70 = vector.load %arg21[%c0_70, %c0_71] : memref<72x128xf32, #tpu.memory_space<vmem>>, vector<72x128xf32>
    %c0_72 = arith.constant 0 : index
    %c0_73 = arith.constant 0 : index
    %71 = vector.load %arg5[%c0_72, %c0_73] : memref<1x128xf32, #tpu.memory_space<vmem>>, vector<1x128xf32>
    %72 = vector.broadcast %71 : vector<1x128xf32> to vector<72x128xf32>
    %73 = arith.addf %70, %72 : vector<72x128xf32>
    %c0_74 = arith.constant 0 : index
    %c0_75 = arith.constant 0 : index
    %74 = vector.load %arg6[%c0_74, %c0_75] : memref<1x128xf32, #tpu.memory_space<vmem>>, vector<1x128xf32>
    %c0_76 = arith.constant 0 : index
    %c0_77 = arith.constant 0 : index
    %75 = vector.load %arg7[%c0_76, %c0_77] : memref<1x128xf32, #tpu.memory_space<vmem>>, vector<1x128xf32>
    %cst_78 = arith.constant dense<0.000000e+00> : vector<128xf32>
    %76 = vector.multi_reduction <add>, %73, %cst_78 [0] : vector<72x128xf32> to vector<128xf32>
    %77 = vector.shape_cast %76 : vector<128xf32> to vector<1x128xf32>
    %cst_79 = arith.constant 0.013888889 : f32
    %78 = vector.broadcast %cst_79 : f32 to vector<1x128xf32>
    %79 = arith.mulf %77, %78 : vector<1x128xf32>
    %80 = vector.broadcast %79 : vector<1x128xf32> to vector<72x128xf32>
    %81 = arith.subf %73, %80 : vector<72x128xf32>
    %82 = arith.mulf %81, %81 : vector<72x128xf32>
    %cst_80 = arith.constant dense<0.000000e+00> : vector<128xf32>
    %83 = vector.multi_reduction <add>, %82, %cst_80 [0] : vector<72x128xf32> to vector<128xf32>
    %84 = vector.shape_cast %83 : vector<128xf32> to vector<1x128xf32>
    %cst_81 = arith.constant 0.013888889 : f32
    %85 = vector.broadcast %cst_81 : f32 to vector<1x128xf32>
    %86 = arith.mulf %84, %85 : vector<1x128xf32>
    %cst_82 = arith.constant 9.99999974E-6 : f32
    %87 = vector.broadcast %cst_82 : f32 to vector<1x128xf32>
    %88 = arith.addf %86, %87 : vector<1x128xf32>
    %89 = math.rsqrt %88 : vector<1x128xf32>
    %90 = vector.broadcast %89 : vector<1x128xf32> to vector<72x128xf32>
    %91 = arith.mulf %81, %90 : vector<72x128xf32>
    %92 = vector.broadcast %74 : vector<1x128xf32> to vector<72x128xf32>
    %93 = arith.mulf %91, %92 : vector<72x128xf32>
    %94 = vector.broadcast %75 : vector<1x128xf32> to vector<72x128xf32>
    %95 = arith.addf %93, %94 : vector<72x128xf32>
    %cst_83 = arith.constant 0.000000e+00 : f32
    %96 = vector.broadcast %cst_83 : f32 to vector<72x128xf32>
    %97 = arith.maximumf %95, %96 : vector<72x128xf32>
    %98 = arith.truncf %97 : vector<72x128xf32> to vector<72x128xbf16>
    %c0_84 = arith.constant 0 : index
    %c0_85 = arith.constant 0 : index
    %c0_86 = arith.constant 0 : index
    %99 = vector.load %arg8[%c0_84, %c0_85, %c0_86] : memref<9x32x72xbf16, #tpu.memory_space<vmem>>, vector<1x32x72xbf16>
    %100 = vector.shape_cast %99 : vector<1x32x72xbf16> to vector<32x72xbf16>
    %cst_87 = arith.constant dense<0.000000e+00> : vector<32x128xf32>
    %101 = tpu.matmul %100, %98, %cst_87 {dimension_numbers = #tpu.dot_dimension_numbers<[1], [0], [0], [1], [0, 0, 1, 1], [], []>} : vector<32x72xbf16>, vector<72x128xbf16>, vector<32x128xf32> -> vector<32x128xf32>
    %c0_88 = arith.constant 0 : index
    %c0_89 = arith.constant 0 : index
    %102 = vector.load %arg22[%c0_88, %c0_89] : memref<32x1152xf32, #tpu.memory_space<vmem>>, vector<32x128xf32>
    tpu.vector_store %arg22[%c0_88, %c0_89], %101 {strides = array<i32>} : memref<32x1152xf32, #tpu.memory_space<vmem>>, vector<32x128xf32>,
    %c1_90 = arith.constant 1 : index
    %c0_91 = arith.constant 0 : index
    %c0_92 = arith.constant 0 : index
    %103 = vector.load %arg8[%c1_90, %c0_91, %c0_92] : memref<9x32x72xbf16, #tpu.memory_space<vmem>>, vector<1x32x72xbf16>
    %104 = vector.shape_cast %103 : vector<1x32x72xbf16> to vector<32x72xbf16>
    %cst_93 = arith.constant dense<0.000000e+00> : vector<32x128xf32>
    %105 = tpu.matmul %104, %98, %cst_93 {dimension_numbers = #tpu.dot_dimension_numbers<[1], [0], [0], [1], [0, 0, 1, 1], [], []>} : vector<32x72xbf16>, vector<72x128xbf16>, vector<32x128xf32> -> vector<32x128xf32>
    %c0_94 = arith.constant 0 : index
    %c128 = arith.constant 128 : index
    %106 = vector.load %arg22[%c0_94, %c128] : memref<32x1152xf32, #tpu.memory_space<vmem>>, vector<32x128xf32>
    tpu.vector_store %arg22[%c0_94, %c128], %105 {strides = array<i32>} : memref<32x1152xf32, #tpu.memory_space<vmem>>, vector<32x128xf32>,
    %c2_95 = arith.constant 2 : index
    %c0_96 = arith.constant 0 : index
    %c0_97 = arith.constant 0 : index
    %107 = vector.load %arg8[%c2_95, %c0_96, %c0_97] : memref<9x32x72xbf16, #tpu.memory_space<vmem>>, vector<1x32x72xbf16>
    %108 = vector.shape_cast %107 : vector<1x32x72xbf16> to vector<32x72xbf16>
    %cst_98 = arith.constant dense<0.000000e+00> : vector<32x128xf32>
    %109 = tpu.matmul %108, %98, %cst_98 {dimension_numbers = #tpu.dot_dimension_numbers<[1], [0], [0], [1], [0, 0, 1, 1], [], []>} : vector<32x72xbf16>, vector<72x128xbf16>, vector<32x128xf32> -> vector<32x128xf32>
    %c0_99 = arith.constant 0 : index
    %c256 = arith.constant 256 : index
    %110 = vector.load %arg22[%c0_99, %c256] : memref<32x1152xf32, #tpu.memory_space<vmem>>, vector<32x128xf32>
    tpu.vector_store %arg22[%c0_99, %c256], %109 {strides = array<i32>} : memref<32x1152xf32, #tpu.memory_space<vmem>>, vector<32x128xf32>,
    %c3_100 = arith.constant 3 : index
    %c0_101 = arith.constant 0 : index
    %c0_102 = arith.constant 0 : index
    %111 = vector.load %arg8[%c3_100, %c0_101, %c0_102] : memref<9x32x72xbf16, #tpu.memory_space<vmem>>, vector<1x32x72xbf16>
    %112 = vector.shape_cast %111 : vector<1x32x72xbf16> to vector<32x72xbf16>
    %cst_103 = arith.constant dense<0.000000e+00> : vector<32x128xf32>
    %113 = tpu.matmul %112, %98, %cst_103 {dimension_numbers = #tpu.dot_dimension_numbers<[1], [0], [0], [1], [0, 0, 1, 1], [], []>} : vector<32x72xbf16>, vector<72x128xbf16>, vector<32x128xf32> -> vector<32x128xf32>
    %c0_104 = arith.constant 0 : index
    %c384 = arith.constant 384 : index
    %114 = vector.load %arg22[%c0_104, %c384] : memref<32x1152xf32, #tpu.memory_space<vmem>>, vector<32x128xf32>
    tpu.vector_store %arg22[%c0_104, %c384], %113 {strides = array<i32>} : memref<32x1152xf32, #tpu.memory_space<vmem>>, vector<32x128xf32>,
    %c4_105 = arith.constant 4 : index
    %c0_106 = arith.constant 0 : index
    %c0_107 = arith.constant 0 : index
    %115 = vector.load %arg8[%c4_105, %c0_106, %c0_107] : memref<9x32x72xbf16, #tpu.memory_space<vmem>>, vector<1x32x72xbf16>
    %116 = vector.shape_cast %115 : vector<1x32x72xbf16> to vector<32x72xbf16>
    %cst_108 = arith.constant dense<0.000000e+00> : vector<32x128xf32>
    %117 = tpu.matmul %116, %98, %cst_108 {dimension_numbers = #tpu.dot_dimension_numbers<[1], [0], [0], [1], [0, 0, 1, 1], [], []>} : vector<32x72xbf16>, vector<72x128xbf16>, vector<32x128xf32> -> vector<32x128xf32>
    %c0_109 = arith.constant 0 : index
    %c512 = arith.constant 512 : index
    %118 = vector.load %arg22[%c0_109, %c512] : memref<32x1152xf32, #tpu.memory_space<vmem>>, vector<32x128xf32>
    tpu.vector_store %arg22[%c0_109, %c512], %117 {strides = array<i32>} : memref<32x1152xf32, #tpu.memory_space<vmem>>, vector<32x128xf32>,
    %c5_110 = arith.constant 5 : index
    %c0_111 = arith.constant 0 : index
    %c0_112 = arith.constant 0 : index
    %119 = vector.load %arg8[%c5_110, %c0_111, %c0_112] : memref<9x32x72xbf16, #tpu.memory_space<vmem>>, vector<1x32x72xbf16>
    %120 = vector.shape_cast %119 : vector<1x32x72xbf16> to vector<32x72xbf16>
    %cst_113 = arith.constant dense<0.000000e+00> : vector<32x128xf32>
    %121 = tpu.matmul %120, %98, %cst_113 {dimension_numbers = #tpu.dot_dimension_numbers<[1], [0], [0], [1], [0, 0, 1, 1], [], []>} : vector<32x72xbf16>, vector<72x128xbf16>, vector<32x128xf32> -> vector<32x128xf32>
    %c0_114 = arith.constant 0 : index
    %c640 = arith.constant 640 : index
    %122 = vector.load %arg22[%c0_114, %c640] : memref<32x1152xf32, #tpu.memory_space<vmem>>, vector<32x128xf32>
    tpu.vector_store %arg22[%c0_114, %c640], %121 {strides = array<i32>} : memref<32x1152xf32, #tpu.memory_space<vmem>>, vector<32x128xf32>,
    %c6_115 = arith.constant 6 : index
    %c0_116 = arith.constant 0 : index
    %c0_117 = arith.constant 0 : index
    %123 = vector.load %arg8[%c6_115, %c0_116, %c0_117] : memref<9x32x72xbf16, #tpu.memory_space<vmem>>, vector<1x32x72xbf16>
    %124 = vector.shape_cast %123 : vector<1x32x72xbf16> to vector<32x72xbf16>
    %cst_118 = arith.constant dense<0.000000e+00> : vector<32x128xf32>
    %125 = tpu.matmul %124, %98, %cst_118 {dimension_numbers = #tpu.dot_dimension_numbers<[1], [0], [0], [1], [0, 0, 1, 1], [], []>} : vector<32x72xbf16>, vector<72x128xbf16>, vector<32x128xf32> -> vector<32x128xf32>
    %c0_119 = arith.constant 0 : index
    %c768 = arith.constant 768 : index
    %126 = vector.load %arg22[%c0_119, %c768] : memref<32x1152xf32, #tpu.memory_space<vmem>>, vector<32x128xf32>
    tpu.vector_store %arg22[%c0_119, %c768], %125 {strides = array<i32>} : memref<32x1152xf32, #tpu.memory_space<vmem>>, vector<32x128xf32>,
    %c7_120 = arith.constant 7 : index
    %c0_121 = arith.constant 0 : index
    %c0_122 = arith.constant 0 : index
    %127 = vector.load %arg8[%c7_120, %c0_121, %c0_122] : memref<9x32x72xbf16, #tpu.memory_space<vmem>>, vector<1x32x72xbf16>
    %128 = vector.shape_cast %127 : vector<1x32x72xbf16> to vector<32x72xbf16>
    %cst_123 = arith.constant dense<0.000000e+00> : vector<32x128xf32>
    %129 = tpu.matmul %128, %98, %cst_123 {dimension_numbers = #tpu.dot_dimension_numbers<[1], [0], [0], [1], [0, 0, 1, 1], [], []>} : vector<32x72xbf16>, vector<72x128xbf16>, vector<32x128xf32> -> vector<32x128xf32>
    %c0_124 = arith.constant 0 : index
    %c896 = arith.constant 896 : index
    %130 = vector.load %arg22[%c0_124, %c896] : memref<32x1152xf32, #tpu.memory_space<vmem>>, vector<32x128xf32>
    tpu.vector_store %arg22[%c0_124, %c896], %129 {strides = array<i32>} : memref<32x1152xf32, #tpu.memory_space<vmem>>, vector<32x128xf32>,
    %c8_125 = arith.constant 8 : index
    %c0_126 = arith.constant 0 : index
    %c0_127 = arith.constant 0 : index
    %131 = vector.load %arg8[%c8_125, %c0_126, %c0_127] : memref<9x32x72xbf16, #tpu.memory_space<vmem>>, vector<1x32x72xbf16>
    %132 = vector.shape_cast %131 : vector<1x32x72xbf16> to vector<32x72xbf16>
    %cst_128 = arith.constant dense<0.000000e+00> : vector<32x128xf32>
    %133 = tpu.matmul %132, %98, %cst_128 {dimension_numbers = #tpu.dot_dimension_numbers<[1], [0], [0], [1], [0, 0, 1, 1], [], []>} : vector<32x72xbf16>, vector<72x128xbf16>, vector<32x128xf32> -> vector<32x128xf32>
    %c0_129 = arith.constant 0 : index
    %c1024 = arith.constant 1024 : index
    %134 = vector.load %arg22[%c0_129, %c1024] : memref<32x1152xf32, #tpu.memory_space<vmem>>, vector<32x128xf32>
    tpu.vector_store %arg22[%c0_129, %c1024], %133 {strides = array<i32>} : memref<32x1152xf32, #tpu.memory_space<vmem>>, vector<32x128xf32>,
    %c0_130 = arith.constant 0 : index
    %c0_131 = arith.constant 0 : index
    %135 = vector.load %arg22[%c0_130, %c0_131] : memref<32x1152xf32, #tpu.memory_space<vmem>>, vector<32x1152xf32>
    %136 = arith.truncf %135 : vector<32x1152xf32> to vector<32x1152xbf16>
    %c0_132 = arith.constant 0 : index
    %c0_133 = arith.constant 0 : index
    %137 = vector.load %arg9[%c0_132, %c0_133] : memref<1152x128xbf16, #tpu.memory_space<vmem>>, vector<1152x128xbf16>
    %cst_134 = arith.constant dense<0.000000e+00> : vector<32x128xf32>
    %138 = tpu.matmul %136, %137, %cst_134 {dimension_numbers = #tpu.dot_dimension_numbers<[1], [0], [0], [1], [0, 0, 1, 1], [], []>} : vector<32x1152xbf16>, vector<1152x128xbf16>, vector<32x128xf32> -> vector<32x128xf32>
    %c0_135 = arith.constant 0 : index
    %c0_136 = arith.constant 0 : index
    %139 = vector.load %arg10[%c0_135, %c0_136] : memref<1x128xf32, #tpu.memory_space<vmem>>, vector<1x128xf32>
    %140 = vector.broadcast %139 : vector<1x128xf32> to vector<32x128xf32>
    %141 = arith.addf %138, %140 : vector<32x128xf32>
    %c0_137 = arith.constant 0 : index
    %c0_138 = arith.constant 0 : index
    %142 = vector.load %arg11[%c0_137, %c0_138] : memref<1x128xf32, #tpu.memory_space<vmem>>, vector<1x128xf32>
    %c0_139 = arith.constant 0 : index
    %c0_140 = arith.constant 0 : index
    %143 = vector.load %arg12[%c0_139, %c0_140] : memref<1x128xf32, #tpu.memory_space<vmem>>, vector<1x128xf32>
    %cst_141 = arith.constant dense<0.000000e+00> : vector<128xf32>
    %144 = vector.multi_reduction <add>, %141, %cst_141 [0] : vector<32x128xf32> to vector<128xf32>
    %145 = vector.shape_cast %144 : vector<128xf32> to vector<1x128xf32>
    %cst_142 = arith.constant 3.125000e-02 : f32
    %146 = vector.broadcast %cst_142 : f32 to vector<1x128xf32>
    %147 = arith.mulf %145, %146 : vector<1x128xf32>
    %148 = vector.broadcast %147 : vector<1x128xf32> to vector<32x128xf32>
    %149 = arith.subf %141, %148 : vector<32x128xf32>
    %150 = arith.mulf %149, %149 : vector<32x128xf32>
    %cst_143 = arith.constant dense<0.000000e+00> : vector<128xf32>
    %151 = vector.multi_reduction <add>, %150, %cst_143 [0] : vector<32x128xf32> to vector<128xf32>
    %152 = vector.shape_cast %151 : vector<128xf32> to vector<1x128xf32>
    %cst_144 = arith.constant 3.125000e-02 : f32
    %153 = vector.broadcast %cst_144 : f32 to vector<1x128xf32>
    %154 = arith.mulf %152, %153 : vector<1x128xf32>
    %cst_145 = arith.constant 9.99999974E-6 : f32
    %155 = vector.broadcast %cst_145 : f32 to vector<1x128xf32>
    %156 = arith.addf %154, %155 : vector<1x128xf32>
    %157 = math.rsqrt %156 : vector<1x128xf32>
    %158 = vector.broadcast %157 : vector<1x128xf32> to vector<32x128xf32>
    %159 = arith.mulf %149, %158 : vector<32x128xf32>
    %160 = vector.broadcast %142 : vector<1x128xf32> to vector<32x128xf32>
    %161 = arith.mulf %159, %160 : vector<32x128xf32>
    %162 = vector.broadcast %143 : vector<1x128xf32> to vector<32x128xf32>
    %163 = arith.addf %161, %162 : vector<32x128xf32>
    %cst_146 = arith.constant 0.000000e+00 : f32
    %164 = vector.broadcast %cst_146 : f32 to vector<32x128xf32>
    %165 = arith.maximumf %163, %164 : vector<32x128xf32>
    %c0_147 = arith.constant 0 : index
    %c0_148 = arith.constant 0 : index
    %166 = vector.load %arg23[%c0_147, %c0_148] : memref<32x128xf32, #tpu.memory_space<vmem>>, vector<32x128xf32>
    tpu.vector_store %arg23[%c0_147, %c0_148], %165 {strides = array<i32>} : memref<32x128xf32, #tpu.memory_space<vmem>>, vector<32x128xf32>,
    %c0_149 = arith.constant 0 : index
    %c0_150 = arith.constant 0 : index
    %167 = vector.load %arg23[%c0_149, %c0_150] : memref<32x128xf32, #tpu.memory_space<vmem>>, vector<2x128xf32>
    %c0_151 = arith.constant 0 : index
    %c0_152 = arith.constant 0 : index
    %168 = vector.load %arg24[%c0_151, %c0_152] : memref<2x2048xf32, #tpu.memory_space<vmem>>, vector<2x128xf32>
    tpu.vector_store %arg24[%c0_151, %c0_152], %167 {strides = array<i32>} : memref<2x2048xf32, #tpu.memory_space<vmem>>, vector<2x128xf32>,
    %c2_153 = arith.constant 2 : index
    %c0_154 = arith.constant 0 : index
    %169 = vector.load %arg23[%c2_153, %c0_154] : memref<32x128xf32, #tpu.memory_space<vmem>>, vector<2x128xf32>
    %c0_155 = arith.constant 0 : index
    %c128_156 = arith.constant 128 : index
    %170 = vector.load %arg24[%c0_155, %c128_156] : memref<2x2048xf32, #tpu.memory_space<vmem>>, vector<2x128xf32>
    tpu.vector_store %arg24[%c0_155, %c128_156], %169 {strides = array<i32>} : memref<2x2048xf32, #tpu.memory_space<vmem>>, vector<2x128xf32>,
    %c4_157 = arith.constant 4 : index
    %c0_158 = arith.constant 0 : index
    %171 = vector.load %arg23[%c4_157, %c0_158] : memref<32x128xf32, #tpu.memory_space<vmem>>, vector<2x128xf32>
    %c0_159 = arith.constant 0 : index
    %c256_160 = arith.constant 256 : index
    %172 = vector.load %arg24[%c0_159, %c256_160] : memref<2x2048xf32, #tpu.memory_space<vmem>>, vector<2x128xf32>
    tpu.vector_store %arg24[%c0_159, %c256_160], %171 {strides = array<i32>} : memref<2x2048xf32, #tpu.memory_space<vmem>>, vector<2x128xf32>,
    %c6_161 = arith.constant 6 : index
    %c0_162 = arith.constant 0 : index
    %173 = vector.load %arg23[%c6_161, %c0_162] : memref<32x128xf32, #tpu.memory_space<vmem>>, vector<2x128xf32>
    %c0_163 = arith.constant 0 : index
    %c384_164 = arith.constant 384 : index
    %174 = vector.load %arg24[%c0_163, %c384_164] : memref<2x2048xf32, #tpu.memory_space<vmem>>, vector<2x128xf32>
    tpu.vector_store %arg24[%c0_163, %c384_164], %173 {strides = array<i32>} : memref<2x2048xf32, #tpu.memory_space<vmem>>, vector<2x128xf32>,
    %c8_165 = arith.constant 8 : index
    %c0_166 = arith.constant 0 : index
    %175 = vector.load %arg23[%c8_165, %c0_166] : memref<32x128xf32, #tpu.memory_space<vmem>>, vector<2x128xf32>
    %c0_167 = arith.constant 0 : index
    %c512_168 = arith.constant 512 : index
    %176 = vector.load %arg24[%c0_167, %c512_168] : memref<2x2048xf32, #tpu.memory_space<vmem>>, vector<2x128xf32>
    tpu.vector_store %arg24[%c0_167, %c512_168], %175 {strides = array<i32>} : memref<2x2048xf32, #tpu.memory_space<vmem>>, vector<2x128xf32>,
    %c10 = arith.constant 10 : index
    %c0_169 = arith.constant 0 : index
    %177 = vector.load %arg23[%c10, %c0_169] : memref<32x128xf32, #tpu.memory_space<vmem>>, vector<2x128xf32>
    %c0_170 = arith.constant 0 : index
    %c640_171 = arith.constant 640 : index
    %178 = vector.load %arg24[%c0_170, %c640_171] : memref<2x2048xf32, #tpu.memory_space<vmem>>, vector<2x128xf32>
    tpu.vector_store %arg24[%c0_170, %c640_171], %177 {strides = array<i32>} : memref<2x2048xf32, #tpu.memory_space<vmem>>, vector<2x128xf32>,
    %c12 = arith.constant 12 : index
    %c0_172 = arith.constant 0 : index
    %179 = vector.load %arg23[%c12, %c0_172] : memref<32x128xf32, #tpu.memory_space<vmem>>, vector<2x128xf32>
    %c0_173 = arith.constant 0 : index
    %c768_174 = arith.constant 768 : index
    %180 = vector.load %arg24[%c0_173, %c768_174] : memref<2x2048xf32, #tpu.memory_space<vmem>>, vector<2x128xf32>
    tpu.vector_store %arg24[%c0_173, %c768_174], %179 {strides = array<i32>} : memref<2x2048xf32, #tpu.memory_space<vmem>>, vector<2x128xf32>,
    %c14 = arith.constant 14 : index
    %c0_175 = arith.constant 0 : index
    %181 = vector.load %arg23[%c14, %c0_175] : memref<32x128xf32, #tpu.memory_space<vmem>>, vector<2x128xf32>
    %c0_176 = arith.constant 0 : index
    %c896_177 = arith.constant 896 : index
    %182 = vector.load %arg24[%c0_176, %c896_177] : memref<2x2048xf32, #tpu.memory_space<vmem>>, vector<2x128xf32>
    tpu.vector_store %arg24[%c0_176, %c896_177], %181 {strides = array<i32>} : memref<2x2048xf32, #tpu.memory_space<vmem>>, vector<2x128xf32>,
    %c16 = arith.constant 16 : index
    %c0_178 = arith.constant 0 : index
    %183 = vector.load %arg23[%c16, %c0_178] : memref<32x128xf32, #tpu.memory_space<vmem>>, vector<2x128xf32>
    %c0_179 = arith.constant 0 : index
    %c1024_180 = arith.constant 1024 : index
    %184 = vector.load %arg24[%c0_179, %c1024_180] : memref<2x2048xf32, #tpu.memory_space<vmem>>, vector<2x128xf32>
    tpu.vector_store %arg24[%c0_179, %c1024_180], %183 {strides = array<i32>} : memref<2x2048xf32, #tpu.memory_space<vmem>>, vector<2x128xf32>,
    %c18 = arith.constant 18 : index
    %c0_181 = arith.constant 0 : index
    %185 = vector.load %arg23[%c18, %c0_181] : memref<32x128xf32, #tpu.memory_space<vmem>>, vector<2x128xf32>
    %c0_182 = arith.constant 0 : index
    %c1152 = arith.constant 1152 : index
    %186 = vector.load %arg24[%c0_182, %c1152] : memref<2x2048xf32, #tpu.memory_space<vmem>>, vector<2x128xf32>
    tpu.vector_store %arg24[%c0_182, %c1152], %185 {strides = array<i32>} : memref<2x2048xf32, #tpu.memory_space<vmem>>, vector<2x128xf32>,
    %c20 = arith.constant 20 : index
    %c0_183 = arith.constant 0 : index
    %187 = vector.load %arg23[%c20, %c0_183] : memref<32x128xf32, #tpu.memory_space<vmem>>, vector<2x128xf32>
    %c0_184 = arith.constant 0 : index
    %c1280 = arith.constant 1280 : index
    %188 = vector.load %arg24[%c0_184, %c1280] : memref<2x2048xf32, #tpu.memory_space<vmem>>, vector<2x128xf32>
    tpu.vector_store %arg24[%c0_184, %c1280], %187 {strides = array<i32>} : memref<2x2048xf32, #tpu.memory_space<vmem>>, vector<2x128xf32>,
    %c22 = arith.constant 22 : index
    %c0_185 = arith.constant 0 : index
    %189 = vector.load %arg23[%c22, %c0_185] : memref<32x128xf32, #tpu.memory_space<vmem>>, vector<2x128xf32>
    %c0_186 = arith.constant 0 : index
    %c1408 = arith.constant 1408 : index
    %190 = vector.load %arg24[%c0_186, %c1408] : memref<2x2048xf32, #tpu.memory_space<vmem>>, vector<2x128xf32>
    tpu.vector_store %arg24[%c0_186, %c1408], %189 {strides = array<i32>} : memref<2x2048xf32, #tpu.memory_space<vmem>>, vector<2x128xf32>,
    %c24 = arith.constant 24 : index
    %c0_187 = arith.constant 0 : index
    %191 = vector.load %arg23[%c24, %c0_187] : memref<32x128xf32, #tpu.memory_space<vmem>>, vector<2x128xf32>
    %c0_188 = arith.constant 0 : index
    %c1536 = arith.constant 1536 : index
    %192 = vector.load %arg24[%c0_188, %c1536] : memref<2x2048xf32, #tpu.memory_space<vmem>>, vector<2x128xf32>
    tpu.vector_store %arg24[%c0_188, %c1536], %191 {strides = array<i32>} : memref<2x2048xf32, #tpu.memory_space<vmem>>, vector<2x128xf32>,
    %c26 = arith.constant 26 : index
    %c0_189 = arith.constant 0 : index
    %193 = vector.load %arg23[%c26, %c0_189] : memref<32x128xf32, #tpu.memory_space<vmem>>, vector<2x128xf32>
    %c0_190 = arith.constant 0 : index
    %c1664 = arith.constant 1664 : index
    %194 = vector.load %arg24[%c0_190, %c1664] : memref<2x2048xf32, #tpu.memory_space<vmem>>, vector<2x128xf32>
    tpu.vector_store %arg24[%c0_190, %c1664], %193 {strides = array<i32>} : memref<2x2048xf32, #tpu.memory_space<vmem>>, vector<2x128xf32>,
    %c28 = arith.constant 28 : index
    %c0_191 = arith.constant 0 : index
    %195 = vector.load %arg23[%c28, %c0_191] : memref<32x128xf32, #tpu.memory_space<vmem>>, vector<2x128xf32>
    %c0_192 = arith.constant 0 : index
    %c1792 = arith.constant 1792 : index
    %196 = vector.load %arg24[%c0_192, %c1792] : memref<2x2048xf32, #tpu.memory_space<vmem>>, vector<2x128xf32>
    tpu.vector_store %arg24[%c0_192, %c1792], %195 {strides = array<i32>} : memref<2x2048xf32, #tpu.memory_space<vmem>>, vector<2x128xf32>,
    %c30 = arith.constant 30 : index
    %c0_193 = arith.constant 0 : index
    %197 = vector.load %arg23[%c30, %c0_193] : memref<32x128xf32, #tpu.memory_space<vmem>>, vector<2x128xf32>
    %c0_194 = arith.constant 0 : index
    %c1920 = arith.constant 1920 : index
    %198 = vector.load %arg24[%c0_194, %c1920] : memref<2x2048xf32, #tpu.memory_space<vmem>>, vector<2x128xf32>
    tpu.vector_store %arg24[%c0_194, %c1920], %197 {strides = array<i32>} : memref<2x2048xf32, #tpu.memory_space<vmem>>, vector<2x128xf32>,
    %c0_195 = arith.constant 0 : index
    %c0_196 = arith.constant 0 : index
    %199 = vector.load %arg1[%c0_195, %c0_196] : memref<2x32xf32, #tpu.memory_space<vmem>>, vector<2x32xf32>
    %c0_197 = arith.constant 0 : index
    %c0_198 = arith.constant 0 : index
    %200 = vector.load %arg2[%c0_197, %c0_198] : memref<2x32xf32, #tpu.memory_space<vmem>>, vector<2x32xf32>
    %c0_199 = arith.constant 0 : index
    %c0_200 = arith.constant 0 : index
    %201 = vector.load %arg24[%c0_199, %c0_200] : memref<2x2048xf32, #tpu.memory_space<vmem>>, vector<2x2048xf32>
    %202 = arith.truncf %201 : vector<2x2048xf32> to vector<2x2048xbf16>
    %c0_201 = arith.constant 0 : index
    %c0_202 = arith.constant 0 : index
    %203 = vector.load %arg13[%c0_201, %c0_202] : memref<2048x128xbf16, #tpu.memory_space<vmem>>, vector<2048x128xbf16>
    %cst_203 = arith.constant dense<0.000000e+00> : vector<2x128xf32>
    %204 = tpu.matmul %202, %203, %cst_203 {dimension_numbers = #tpu.dot_dimension_numbers<[1], [0], [0], [1], [0, 0, 1, 1], [], []>} : vector<2x2048xbf16>, vector<2048x128xbf16>, vector<2x128xf32> -> vector<2x128xf32>
    %205 = arith.truncf %199 : vector<2x32xf32> to vector<2x32xbf16>
    %c0_204 = arith.constant 0 : index
    %c0_205 = arith.constant 0 : index
    %206 = vector.load %arg14[%c0_204, %c0_205] : memref<32x128xbf16, #tpu.memory_space<vmem>>, vector<32x128xbf16>
    %cst_206 = arith.constant dense<0.000000e+00> : vector<2x128xf32>
    %207 = tpu.matmul %205, %206, %cst_206 {dimension_numbers = #tpu.dot_dimension_numbers<[1], [0], [0], [1], [0, 0, 1, 1], [], []>} : vector<2x32xbf16>, vector<32x128xbf16>, vector<2x128xf32> -> vector<2x128xf32>
    %208 = arith.addf %204, %207 : vector<2x128xf32>
    %c0_207 = arith.constant 0 : index
    %c0_208 = arith.constant 0 : index
    %209 = vector.load %arg15[%c0_207, %c0_208] : memref<1x128xf32, #tpu.memory_space<vmem>>, vector<1x128xf32>
    %210 = vector.broadcast %209 : vector<1x128xf32> to vector<2x128xf32>
    %211 = arith.addf %208, %210 : vector<2x128xf32>
    %212 = arith.negf %211 : vector<2x128xf32>
    %213 = math.exp %212 : vector<2x128xf32>
    %cst_209 = arith.constant 1.000000e+00 : f32
    %214 = vector.broadcast %cst_209 : f32 to vector<2x128xf32>
    %215 = arith.addf %214, %213 : vector<2x128xf32>
    %216 = arith.divf %214, %215 : vector<2x128xf32>
    %217 = math.tanh %211 : vector<2x128xf32>
    %218 = vector.extract_strided_slice %216 {offsets = [0, 0], sizes = [2, 32], strides = [1, 1]} : vector<2x128xf32> to vector<2x32xf32>
    %219 = vector.extract_strided_slice %216 {offsets = [0, 32], sizes = [2, 32], strides = [1, 1]} : vector<2x128xf32> to vector<2x32xf32>
    %220 = vector.extract_strided_slice %217 {offsets = [0, 64], sizes = [2, 32], strides = [1, 1]} : vector<2x128xf32> to vector<2x32xf32>
    %221 = vector.extract_strided_slice %216 {offsets = [0, 96], sizes = [2, 32], strides = [1, 1]} : vector<2x128xf32> to vector<2x32xf32>
    %222 = arith.mulf %219, %200 : vector<2x32xf32>
    %223 = arith.mulf %218, %220 : vector<2x32xf32>
    %224 = arith.addf %222, %223 : vector<2x32xf32>
    %225 = math.tanh %224 : vector<2x32xf32>
    %226 = arith.mulf %221, %225 : vector<2x32xf32>
    %c0_210 = arith.constant 0 : index
    %c0_211 = arith.constant 0 : index
    %227 = vector.load %arg16[%c0_210, %c0_211] : memref<32x4xf32, #tpu.memory_space<vmem>>, vector<32x4xf32>
    %cst_212 = arith.constant dense<0.000000e+00> : vector<2x4xf32>
    %228 = tpu.matmul %226, %227, %cst_212 {dimension_numbers = #tpu.dot_dimension_numbers<[1], [0], [0], [1], [0, 0, 1, 1], [], []>} : vector<2x32xf32>, vector<32x4xf32>, vector<2x4xf32> -> vector<2x4xf32>
    %c0_213 = arith.constant 0 : index
    %c0_214 = arith.constant 0 : index
    %229 = vector.load %arg17[%c0_213, %c0_214] : memref<1x4xf32, #tpu.memory_space<vmem>>, vector<1x4xf32>
    %230 = vector.broadcast %229 : vector<1x4xf32> to vector<2x4xf32>
    %231 = arith.addf %228, %230 : vector<2x4xf32>
    %cst_215 = arith.constant dense<0xFF800000> : vector<2xf32>
    %232 = vector.multi_reduction <maximumf>, %231, %cst_215 [1] : vector<2x4xf32> to vector<2xf32>
    %233 = vector.shape_cast %232 : vector<2xf32> to vector<2x1xf32>
    %234 = vector.broadcast %233 : vector<2x1xf32> to vector<2x4xf32>
    %235 = arith.subf %231, %234 : vector<2x4xf32>
    %236 = math.exp %235 : vector<2x4xf32>
    %cst_216 = arith.constant dense<0.000000e+00> : vector<2xf32>
    %237 = vector.multi_reduction <add>, %236, %cst_216 [1] : vector<2x4xf32> to vector<2xf32>
    %238 = vector.shape_cast %237 : vector<2xf32> to vector<2x1xf32>
    %239 = vector.broadcast %238 : vector<2x1xf32> to vector<2x4xf32>
    %240 = arith.divf %236, %239 : vector<2x4xf32>
    %c0_217 = arith.constant 0 : index
    %c0_218 = arith.constant 0 : index
    %241 = vector.load %arg18[%c0_217, %c0_218] : memref<2x4xf32, #tpu.memory_space<vmem>>, vector<2x4xf32>
    tpu.vector_store %arg18[%c0_217, %c0_218], %240 {strides = array<i32>} : memref<2x4xf32, #tpu.memory_space<vmem>>, vector<2x4xf32>,
    %c0_219 = arith.constant 0 : index
    %c0_220 = arith.constant 0 : index
    %242 = vector.load %arg19[%c0_219, %c0_220] : memref<2x32xf32, #tpu.memory_space<vmem>>, vector<2x32xf32>
    tpu.vector_store %arg19[%c0_219, %c0_220], %226 {strides = array<i32>} : memref<2x32xf32, #tpu.memory_space<vmem>>, vector<2x32xf32>,
    %c0_221 = arith.constant 0 : index
    %c0_222 = arith.constant 0 : index
    %243 = vector.load %arg20[%c0_221, %c0_222] : memref<2x32xf32, #tpu.memory_space<vmem>>, vector<2x32xf32>
    tpu.vector_store %arg20[%c0_221, %c0_222], %224 {strides = array<i32>} : memref<2x32xf32, #tpu.memory_space<vmem>>, vector<2x32xf32>,
    return
  }
}

</mosaic_0001>

<bundles_post_ra>
// kernel: lstm_policy_forward.1
= control target key start
LH: loop header
LB: loop body
LE: loop exit
PB: predicated region body
PF: predicated region fallthrough
CT: control target
= control target key end

     0   :  { %s8706_s0 = inlined_call_operand.vmem [shape: f32[128,4], index: 0, kind: input, shape index: {}]   ;;  %s8707_s1 = inlined_call_operand.vmem [shape: f32[2,32], index: 1, kind: input, shape index: {}]   ;;  %s8708_s2 = inlined_call_operand.vmem [shape: f32[2,32], index: 2, kind: input, shape index: {}]   ;;  %s8709_s3 = inlined_call_operand.hbm [shape: bf16[9,72,128], index: 3, kind: input, shape index: {}]   ;;  %s8710_s4 = inlined_call_operand.vmem [shape: bf16[4,1152], index: 4, kind: input, shape index: {}]   ;;  %s8711_s5 = inlined_call_operand.vmem [shape: f32[1,128], index: 5, kind: input, shape index: {}]   ;;  %s8712_s6 = inlined_call_operand.vmem [shape: f32[1,128], index: 6, kind: input, shape index: {}]   ;;  %s8713_s7 = inlined_call_operand.vmem [shape: f32[1,128], index: 7, kind: input, shape index: {}]   ;;  %s8714_s8 = inlined_call_operand.vmem [shape: bf16[9,32,72], index: 8, kind: input, shape index: {}]   ;;  %s8715_s9 = inlined_call_operand.hbm [shape: bf16[1152,128], index: 9, kind: input, shape index: {}]   ;;  %s8716_s10 = inlined_call_operand.vmem [shape: f32[1,128], index: 10, kind: input, shape index: {}]   ;;  %s8717_s11 = inlined_call_operand.vmem [shape: f32[1,128], index: 11, kind: input, shape index: {}]   ;;  %s8718_s12 = inlined_call_operand.vmem [shape: f32[1,128], index: 12, kind: input, shape index: {}]   ;;  %s8719_s13 = inlined_call_operand.hbm [shape: bf16[2048,128], index: 13, kind: input, shape index: {}]   ;;  %s8720_s14 = inlined_call_operand.vmem [shape: bf16[32,128], index: 14, kind: input, shape index: {}]   ;;  %s8721_s15 = inlined_call_operand.vmem [shape: f32[1,128], index: 15, kind: input, shape index: {}]   ;;  %s8722_s16 = inlined_call_operand.vmem [shape: f32[32,4], index: 16, kind: input, shape index: {}]   ;;  %s8723_s17 = inlined_call_operand.vmem [shape: f32[1,4], index: 17, kind: input, shape index: {}]   ;;  %s8724_s18 = inlined_call_operand.hbm [shape: f32[2,4], index: 18, kind: output, shape index: {0}]   ;;  %s8725_s19 = inlined_call_operand.hbm [shape: f32[2,32], index: 19, kind: output, shape index: {1}]   ;;  %s8726_s20 = inlined_call_operand.hbm [shape: f32[2,32], index: 20, kind: output, shape index: {2}]  }
   0x1   :  { %8730 = sst [smem:[#allocation20_spill]] %s8706_s0 }
   0x2   :  { %8731 = sst [smem:[#allocation21_spill]] %s8707_s1 }
   0x3   :  { %8732 = sst [smem:[#allocation22_spill]] %s8708_s2 }
   0x4   :  { %8733 = sst [smem:[#allocation23_spill]] %s8709_s3 }
   0x5   :  { %8734 = sst [smem:[#allocation24_spill]] %s8710_s4 }
   0x6   :  { %26 = vsyncpa [#allocation7], 0 }
   0x7   :  { %27 = vsyncpa [#allocation10], 0 }
   0x8   :  { %28 = vsyncpa [#allocation8], 0 }
   0x9   :  { %29 = vsyncpa [#allocation14], 0  ;;  %s7402_s1 = smov [#allocation9]   ;;  %s7403_s23 = smov [#allocation6]  }
   0xa   :  { %s63_s22 = sshll.u32 %s7402_s1, 4  ;;  %s41_s24 = sshll.u32 %s7403_s23, 4  ;;  %s64_s22 = int_to_ptr.vmem [resolvable:$true] %s63_s22  ;;  %s7522_s24 = int_to_ptr.vmem [resolvable:$true] %s41_s24 }
   0xb   :  { %s7262_s3 = scalar_lea.hbm %s8715_s9, 9216 }
   0xc   :  { %p7263_p0 = scmp.ne.s32.totalorder %s8715_s9, %s7262_s3  ;;  %p7266_p1 = scmp.lt.u32.totalorder %s7262_s3, %s8715_s9 }
   0xe   :  { %p7268_p2 = pnand %p7266_p1, %p7263_p0 }
  0x10   :  { %7271 = shalt.err (!%p7268_p2)
}
  0x11   :  { %s7272_s29 = scalar_lea.vmem %s64_s22, 9216  ;;  %p7277_p4 = scmp.lt.s32.totalorder %s64_s22, %s64_s22 }
  0x12   :  { %p7273_p3 = scmp.ne.s32.totalorder %s64_s22, %s7272_s29  ;;  %p7278_p5 = scmp.lt.s32.totalorder %s7272_s29, %s7272_s29 }
  0x14   :  { %p7279_p6 = por %p7278_p5, %p7277_p4 }
  0x16   :  { %p7280_p7 = pnand %p7279_p6, %p7273_p3 }
  0x18   :  { %7283 = shalt.err (!%p7280_p7)
}
  0x19   :  { %s7404_s30 = smov 64   ;;  %s7405_s0 = smov 4  }
  0x1a   :  { %69 = dma.hbm_to_vmem [thread:$0]  %s8715_s9, 9216, %s64_s22, [#allocation10], %s7404_s30, %s7404_s30, %s7405_s0  }
  0x1b   :  { %s8735_s25 = sld [smem:[#allocation23_spill]] }
  0x21   :  { %s7284_s3 = scalar_lea.hbm %s8735_s25, 5184 }
  0x22   :  { %p7285_p8 = scmp.ne.s32.totalorder %s8735_s25, %s7284_s3  ;;  %p7288_p9 = scmp.lt.u32.totalorder %s7284_s3, %s8735_s25 }
  0x24   :  { %p7290_p10 = pnand %p7288_p9, %p7285_p8 }
  0x26   :  { %7293 = shalt.err (!%p7290_p10)
}
  0x27   :  { %s7294_s29 = scalar_lea.vmem %s7522_s24, 5184  ;;  %p7299_p12 = scmp.lt.s32.totalorder %s7522_s24, %s7522_s24 }
  0x28   :  { %p7295_p11 = scmp.ne.s32.totalorder %s7522_s24, %s7294_s29  ;;  %p7300_p13 = scmp.lt.s32.totalorder %s7294_s29, %s7294_s29 }
  0x2a   :  { %p7301_p0 = por %p7300_p13, %p7299_p12 }
  0x2c   :  { %p7302_p1 = pnand %p7301_p0, %p7295_p11 }
  0x2e   :  { %7305 = shalt.err (!%p7302_p1)
}
  0x2f   :  { %47 = dma.hbm_to_vmem [thread:$0]  %s8735_s25, 5184, %s7522_s24, [#allocation7], %s7404_s30, %s7404_s30, %s7405_s0  }
  0x30   :  { %s7406_s21 = smov [#allocation11]   ;;  %s7306_s3 = scalar_lea.hbm %s8719_s13, 16384 }
  0x31   :  { %s81_s1 = sshll.u32 %s7406_s21, 4  ;;  %p7307_p2 = scmp.ne.s32.totalorder %s8719_s13, %s7306_s3  ;;  %s82_s1 = int_to_ptr.vmem [resolvable:$true] %s81_s1 }
  0x32   :  { %p7310_p3 = scmp.lt.u32.totalorder %s7306_s3, %s8719_s13 }
  0x34   :  { %p7312_p4 = pnand %p7310_p3, %p7307_p2 }
  0x36   :  { %7315 = shalt.err (!%p7312_p4)
}
  0x37   :  { %s7316_s29 = scalar_lea.vmem %s82_s1, 16384  ;;  %p7321_p6 = scmp.lt.s32.totalorder %s82_s1, %s82_s1 }
  0x38   :  { %p7317_p5 = scmp.ne.s32.totalorder %s82_s1, %s7316_s29  ;;  %p7322_p7 = scmp.lt.s32.totalorder %s7316_s29, %s7316_s29 }
  0x3a   :  { %p7323_p8 = por %p7322_p7, %p7321_p6 }
  0x3c   :  { %p7324_p9 = pnand %p7323_p8, %p7317_p5 }
  0x3e   :  { %7327 = shalt.err (!%p7324_p9)
}
  0x3f   :  { %87 = dma.hbm_to_vmem [thread:$0]  %s8719_s13, 16384, %s82_s1, [#allocation10], %s7404_s30, %s7404_s30, %s7405_s0  }
  0x40   :  { %7394 = dma.done.wait [#allocation7], 5184  }
  0x41   :  { %7395 = vsyncadd [#allocation7], 4294962112 }
  0x42   :  { %7396 = dma.done.wait [#allocation10], 25600  }
  0x43   :  { %7397 = vsyncadd [#allocation10], 4294941696  ;;  %v140_v0 = vlaneseq  ;;  %v7407_v1 = vmov 1983009808   ;;  %v7408_v3 = vmov 0   ;;  %s8736_s21 = sld [smem:[#allocation24_spill]] }
  0x44   :  { %v138_v2 = vunpack.c.l.s4 %v7407_v1  ;;  %262 = vmatprep.mubr.bf16.mxu0 %v7408_v3  ;;  %375 = vmatprep.mubr.bf16.mxu1 %v7408_v3  ;;  %vm202_vm0 = vcmask 1041408   ;;  %s8737_s1 = sld [smem:[#allocation20_spill]]  ;;  %vm177_vm1 = vcmask 31744   ;;  %v7409_v49 = vmov 0.0   ;;  %s8742_s22 = sld [smem:[#allocation21_spill]] }
  0x45   :  { %v141_v4 = vshrl.u32 %v140_v0, 7  ;;  %vm7410_vm2 = vmmov 0   ;;  %vm2236_vm3 = vcmask 588800   ;;  %vm2243_vm4 = vcmask 1043456   ;;  %s8743_s2 = sld [smem:[#allocation22_spill]]  ;;  %s7411_s3 = smov 32  }
  0x46   :  { %v139_v5 = vunpack.c.0.s8 %v138_v2  ;;  %vm4253_vm5 = vcmask 261120   ;;  %vm5521_vm6 = vcmask 254976   ;;  %vm5507_vm7 = vcmask 25600  }
  0x48   :  { %v7576_v6 = vsub.s32 %v139_v5, %v141_v4 }
  0x49   :  { %v130_v7 = vld [vmem:[%s8736_s21] sm:$0xff]  ;;  %v131_v14 = vld [vmem:[%s8736_s21 + $0x8] sm:$0xff]  ;;  %v5571_v22 = vld.sshfl [vmem:[%s8736_s21 + $0x10] sm:$0x3 pattern:$0x76325410] }
  0x4a   :  { %v143_v8 = vrot.slane %v130_v7, %v7576_v6  ;;  %v136_v9 = vcombine.high %v130_v7, %v130_v7  ;;  %v106_v10 = vld [vmem:[%s8737_s1] sm:$0xff]  ;;  %v107_v11 = vld [vmem:[%s8737_s1 + $0x8] sm:$0xff]  ;;  %v160_v16 = vrot.slane %v131_v14, %v7576_v6  ;;  %v153_v17 = vcombine.high %v131_v14, %v131_v14  ;;  %v108_v25 = vld [vmem:[%s8737_s1 + $0x10] sm:$0xff] }
  0x4b   :  { %v7595_v18 = vpack.c.bf16 %v107_v11, %v106_v10  ;;  %v109_v26 = vld [vmem:[%s8737_s1 + $0x18] sm:$0xff]  ;;  %v228_v29 = vsel %vm202_vm0, %v5571_v22, 0  ;;  %v110_v31 = vld [vmem:[%s8737_s1 + $0x20] sm:$0xff]  ;;  %v111_v32 = vld [vmem:[%s8737_s1 + $0x28] sm:$0xff] }
  0x4c   :  { %v151_v12 = vcombine.high %v143_v8, %v143_v8  ;;  %v204_v13 = vsel %vm202_vm0, %v143_v8, 0  ;;  %v150_v15 = vrot.slane %v136_v9, %v7576_v6  ;;  %v168_v21 = vcombine.high %v160_v16, %v160_v16  ;;  %v112_v34 = vld [vmem:[%s8737_s1 + $0x30] sm:$0xff]  ;;  %v113_v35 = vld [vmem:[%s8737_s1 + $0x38] sm:$0xff]  ;;  %v114_v37 = vld [vmem:[%s8737_s1 + $0x40] sm:$0xff] }
  0x4d   :  { %v216_v23 = vsel %vm202_vm0, %v160_v16, 0  ;;  %v167_v24 = vrot.slane %v153_v17, %v7576_v6  ;;  %v7620_v30 = vpack.c.bf16 %v109_v26, %v108_v25  ;;  %v7634_v33 = vpack.c.bf16 %v111_v32, %v110_v31  ;;  %v115_v38 = vld [vmem:[%s8737_s1 + $0x48] sm:$0xff]  ;;  %v116_v40 = vld [vmem:[%s8737_s1 + $0x50] sm:$0xff]  ;;  %v117_v41 = vld [vmem:[%s8737_s1 + $0x58] sm:$0xff] }
  0x4e   :  { %5572 = vmatprep.subr.msk.bf16.mxu0 %vm202_vm0, %v151_v12  ;;  %v152_v19 = vcombine.high %v150_v15, %v150_v15  ;;  %v210_v20 = vsel %vm202_vm0, %v150_v15, 0  ;;  %v7648_v36 = vpack.c.bf16 %v113_v35, %v112_v34  ;;  %v7662_v39 = vpack.c.bf16 %v115_v38, %v114_v37  ;;  %v118_v43 = vld [vmem:[%s8737_s1 + $0x60] sm:$0xff]  ;;  %v119_v44 = vld [vmem:[%s8737_s1 + $0x68] sm:$0xff]  ;;  %v120_v46 = vld [vmem:[%s8737_s1 + $0x70] sm:$0xff] }
  0x4f   :  { %231 = vmatpush1.bf16.msra.mxu0 %v204_v13  ;;  %v169_v27 = vcombine.high %v167_v24, %v167_v24  ;;  %v222_v28 = vsel %vm202_vm0, %v167_v24, 0  ;;  %v127_v42 = vpack.c.bf16 %v117_v41, %v116_v40  ;;  %v128_v45 = vpack.c.bf16 %v119_v44, %v118_v43  ;;  %v121_v47 = vld [vmem:[%s8737_s1 + $0x78] sm:$0xff] }
  0x50   :  { %5581 = vmatprep.subr.msk.bf16.mxu1 %vm202_vm0, %v152_v19  ;;  %5590 = vmatprep.subr.msk.bf16.mxu0 %vm202_vm0, %v168_v21  ;;  %v129_v48 = vpack.c.bf16 %v121_v47, %v120_v46 }
  0x51   :  { %344 = vmatpush1.bf16.msra.mxu1 %v210_v20 }
  0x52   :  { %5573 = vmatmul.mubr.msk.bf16.vlgmr.msra.gmra.mrb[0].mxu0 %vm177_vm1, %v7595_v18  ;;  %5599 = vmatprep.subr.msk.bf16.mxu1 %vm202_vm0, %v169_v27 }
  0x53   :  { %272 = vmatprep.mubr.bf16.mxu0 %v7408_v3  ;;  %457 = vmatpush1.bf16.msra.mxu0 %v216_v23 }
  0x54   :  { %6950 = vmatprep.subr.msk.bf16.mxu0 %vm202_vm0, %v5571_v22  ;;  %5582 = vmatmul.mubr.msk.bf16.vlgmr.msra.gmra.mrb[0].mxu1 %vm177_vm1, %v7595_v18 }
  0x55   :  { %385 = vmatprep.mubr.bf16.mxu1 %v7408_v3  ;;  %570 = vmatpush1.bf16.msra.mxu1 %v222_v28 }
  0x56   :  { %6455 = vmatprep.subr.bf16.mxu1 %v7409_v49 }
  0x5a   :  { %5574 = vmatmul.mubr.msk.bf16.gmra.mrb[4].mxu0 %vm177_vm1, %v7620_v30 }
  0x5b   :  { %282 = vmatprep.mubr.bf16.mxu0 %v7408_v3 }
  0x5c   :  { %5583 = vmatmul.mubr.msk.bf16.gmra.mrb[4].mxu1 %vm177_vm1, %v7620_v30 }
  0x5d   :  { %395 = vmatprep.mubr.bf16.mxu1 %v7408_v3 }
  0x62   :  { %5575 = vmatmul.mubr.msk.bf16.gmra.mrb[8].mxu0 %vm177_vm1, %v7634_v33 }
  0x63   :  { %292 = vmatprep.mubr.bf16.mxu0 %v7408_v3 }
  0x64   :  { %5584 = vmatmul.mubr.msk.bf16.gmra.mrb[8].mxu1 %vm177_vm1, %v7634_v33 }
  0x65   :  { %405 = vmatprep.mubr.bf16.mxu1 %v7408_v3 }
  0x6a   :  { %5576 = vmatmul.mubr.msk.bf16.gmra.mrb[12].mxu0 %vm177_vm1, %v7648_v36 }
  0x6b   :  { %302 = vmatprep.mubr.bf16.mxu0 %v7408_v3 }
  0x6c   :  { %5585 = vmatmul.mubr.msk.bf16.gmra.mrb[12].mxu1 %vm177_vm1, %v7648_v36 }
  0x6d   :  { %415 = vmatprep.mubr.bf16.mxu1 %v7408_v3 }
  0x72   :  { %5577 = vmatmul.mubr.msk.bf16.gmra.mrb[16].mxu0 %vm177_vm1, %v7662_v39 }
  0x73   :  { %312 = vmatprep.mubr.bf16.mxu0 %v7408_v3 }
  0x74   :  { %5586 = vmatmul.mubr.msk.bf16.gmra.mrb[16].mxu1 %vm177_vm1, %v7662_v39 }
  0x75   :  { %425 = vmatprep.mubr.bf16.mxu1 %v7408_v3 }
  0x7a   :  { %5578 = vmatmul.mubr.msk.bf16.gmra.mrb[20].mxu0 %vm177_vm1, %v127_v42 }
  0x7b   :  { %322 = vmatprep.mubr.bf16.mxu0 %v7408_v3 }
  0x7c   :  { %5587 = vmatmul.mubr.msk.bf16.gmra.mrb[20].mxu1 %vm177_vm1, %v127_v42 }
  0x7d   :  { %435 = vmatprep.mubr.bf16.mxu1 %v7408_v3 }
  0x82   :  { %5579 = vmatmul.mubr.msk.bf16.gmra.mrb[24].mxu0 %vm177_vm1, %v128_v45 }
  0x83   :  { %332 = vmatprep.mubr.bf16.mxu0 %v7408_v3 }
  0x84   :  { %5588 = vmatmul.mubr.msk.bf16.gmra.mrb[24].mxu1 %vm177_vm1, %v128_v45 }
  0x85   :  { %445 = vmatprep.mubr.bf16.mxu1 %v7408_v3 }
  0x8a   :  { %5580 = vmatmul.mubr.msk.bf16.gmra.mrb[28].mxu0 %vm177_vm1, %v129_v48 }
  0x8b   :  { %488 = vmatprep.mubr.bf16.mxu0 %v7408_v3 }
  0x8c   :  { %5589 = vmatmul.mubr.msk.bf16.gmra.mrb[28].mxu1 %vm177_vm1, %v129_v48 }
  0x8d   :  { %601 = vmatprep.mubr.bf16.mxu1 %v7408_v3 }
  0x92   :  { %5591 = vmatmul.mubr.msk.bf16.vlgmr.msra.gmra.mrb[32].mxu0 %vm177_vm1, %v7595_v18 }
  0x93   :  { %498 = vmatprep.mubr.bf16.mxu0 %v7408_v3  ;;  %6438 = vmatpush3.bf16.msra.mxu0 %v228_v29 }
  0x94   :  { %5600 = vmatmul.mubr.msk.bf16.vlgmr.msra.gmra.mrb[32].mxu1 %vm177_vm1, %v7595_v18  ;;  %6491 = vmatprep.subr.bf16.mxu0 %v7409_v49 }
  0x95   :  { %611 = vmatprep.mubr.bf16.mxu1 %v7408_v3 }
  0x9a   :  { %5592 = vmatmul.mubr.msk.bf16.gmra.mrb[36].mxu0 %vm177_vm1, %v7620_v30 }
  0x9b   :  { %508 = vmatprep.mubr.bf16.mxu0 %v7408_v3 }
  0x9c   :  { %5601 = vmatmul.mubr.msk.bf16.gmra.mrb[36].mxu1 %vm177_vm1, %v7620_v30 }
  0x9d   :  { %621 = vmatprep.mubr.bf16.mxu1 %v7408_v3 }
  0xa2   :  { %5593 = vmatmul.mubr.msk.bf16.gmra.mrb[40].mxu0 %vm177_vm1, %v7634_v33 }
  0xa3   :  { %518 = vmatprep.mubr.bf16.mxu0 %v7408_v3 }
  0xa4   :  { %5602 = vmatmul.mubr.msk.bf16.gmra.mrb[40].mxu1 %vm177_vm1, %v7634_v33 }
  0xa5   :  { %631 = vmatprep.mubr.bf16.mxu1 %v7408_v3 }
  0xaa   :  { %5594 = vmatmul.mubr.msk.bf16.gmra.mrb[44].mxu0 %vm177_vm1, %v7648_v36 }
  0xab   :  { %528 = vmatprep.mubr.bf16.mxu0 %v7408_v3 }
  0xac   :  { %5603 = vmatmul.mubr.msk.bf16.gmra.mrb[44].mxu1 %vm177_vm1, %v7648_v36 }
  0xad   :  { %641 = vmatprep.mubr.bf16.mxu1 %v7408_v3 }
  0xb2   :  { %5595 = vmatmul.mubr.msk.bf16.gmra.mrb[48].mxu0 %vm177_vm1, %v7662_v39 }
  0xb3   :  { %538 = vmatprep.mubr.bf16.mxu0 %v7408_v3 }
  0xb4   :  { %5604 = vmatmul.mubr.msk.bf16.gmra.mrb[48].mxu1 %vm177_vm1, %v7662_v39 }
  0xb5   :  { %651 = vmatprep.mubr.bf16.mxu1 %v7408_v3 }
  0xba   :  { %5596 = vmatmul.mubr.msk.bf16.gmra.mrb[52].mxu0 %vm177_vm1, %v127_v42 }
  0xbb   :  { %548 = vmatprep.mubr.bf16.mxu0 %v7408_v3 }
  0xbc   :  { %5605 = vmatmul.mubr.msk.bf16.gmra.mrb[52].mxu1 %vm177_vm1, %v127_v42 }
  0xbd   :  { %661 = vmatprep.mubr.bf16.mxu1 %v7408_v3 }
  0xc2   :  { %5597 = vmatmul.mubr.msk.bf16.gmra.mrb[56].mxu0 %vm177_vm1, %v128_v45 }
  0xc3   :  { %558 = vmatprep.mubr.bf16.mxu0 %v7408_v3 }
  0xc4   :  { %5606 = vmatmul.mubr.msk.bf16.gmra.mrb[56].mxu1 %vm177_vm1, %v128_v45 }
  0xc5   :  { %671 = vmatprep.mubr.bf16.mxu1 %v7408_v3 }
  0xca   :  { %5598 = vmatmul.mubr.msk.bf16.gmra.mrb[60].mxu0 %vm177_vm1, %v129_v48 }
  0xcb   :  { %6439 = vmatprep.mubr.msk.bf16.mxu0 %vm177_vm1, %v7595_v18 }
  0xcc   :  { %5607 = vmatmul.mubr.msk.bf16.gmra.mrb[60].mxu1 %vm177_vm1, %v129_v48 }
  0xcd   :  { %6471 = vmatprep.mubr.msk.bf16.mxu1 %vm7410_vm2, %v7409_v49 }
  0xd2   :  { %6440 = vmatmul.mubr.msk.bf16.vlgmr.msra.gmra.mrb[64].mxu0 %vm177_vm1, %v7620_v30 }
  0xd3   :  { %6443 = vmatprep.mubr.msk.bf16.mxu0 %vm177_vm1, %v7634_v33 }
  0xda   :  { %6444 = vmatmul.mubr.msk.bf16.gmra.mrb[68].mxu0 %vm177_vm1, %v7648_v36 }
  0xdb   :  { %6447 = vmatprep.mubr.msk.bf16.mxu0 %vm177_vm1, %v7662_v39 }
  0xe2   :  { %6448 = vmatmul.mubr.msk.bf16.gmra.mrb[72].mxu0 %vm177_vm1, %v127_v42 }
  0xe3   :  { %6451 = vmatprep.mubr.msk.bf16.mxu0 %vm177_vm1, %v128_v45 }
  0xea   :  { %6452 = vmatmul.mubr.msk.bf16.gmra.mrb[76].mxu0 %vm177_vm1, %v129_v48 }
  0xeb   :  { %6507 = vmatprep.mubr.msk.bf16.mxu0 %vm7410_vm2, %v7409_v49 }
 0x125   :  { %v264_v50 = vpop.f32.mrb[0].mxu0 }
 0x126   :  { %v266_v51 = vpop.f32.mrb[1].mxu0 }
 0x127   :  { %v268_v52 = vpop.f32.mrb[2].mxu0  ;;  %v7760_v55 = vpop.f32.mrb[0].mxu1 }
 0x128   :  { %v779_v53 = vpack.c.bf16 %v268_v52, %v264_v50  ;;  %v270_v54 = vpop.f32.mrb[3].mxu0  ;;  %v7762_v57 = vpop.f32.mrb[1].mxu1 }
 0x129   :  { %v780_v56 = vpack.c.bf16 %v270_v54, %v266_v51  ;;  %v7764_v58 = vpop.f32.mrb[2].mxu1 }
 0x12a   :  { %6456 = vmatpush3.bf16.msra.mxu1 %v779_v53  ;;  %v781_v59 = vpack.c.bf16 %v7764_v58, %v7760_v55  ;;  %v7769_v60 = vpop.f32.mrb[3].mxu1 }
 0x12b   :  { %6492 = vmatpush3.bf16.msra.mxu0 %v780_v56  ;;  %6457 = vmatprep.subr.bf16.mxu1 %v7409_v49  ;;  %v782_v61 = vpack.c.bf16 %v7769_v60, %v7762_v57 }
 0x12c   :  { %6493 = vmatprep.subr.bf16.mxu0 %v7409_v49 }
 0x12d   :  { %v274_v62 = vpop.f32.mrb[4].mxu0 }
 0x12e   :  { %v276_v63 = vpop.f32.mrb[5].mxu0 }
 0x12f   :  { %v278_v0 = vpop.f32.mrb[6].mxu0  ;;  %v7774_v3 = vpop.f32.mrb[4].mxu1 }
 0x130   :  { %v788_v1 = vpack.c.bf16 %v278_v0, %v274_v62  ;;  %v280_v2 = vpop.f32.mrb[7].mxu0  ;;  %v7776_v5 = vpop.f32.mrb[5].mxu1 }
 0x131   :  { %v789_v4 = vpack.c.bf16 %v280_v2, %v276_v63  ;;  %v7778_v7 = vpop.f32.mrb[6].mxu1 }
 0x132   :  { %6458 = vmatpush3.bf16.msra.mxu1 %v788_v1  ;;  %v790_v8 = vpack.c.bf16 %v7778_v7, %v7774_v3  ;;  %v7783_v9 = vpop.f32.mrb[7].mxu1 }
 0x133   :  { %6494 = vmatpush3.bf16.msra.mxu0 %v789_v4  ;;  %6459 = vmatprep.subr.bf16.mxu1 %v7409_v49  ;;  %v791_v10 = vpack.c.bf16 %v7783_v9, %v7776_v5 }
 0x134   :  { %6495 = vmatprep.subr.bf16.mxu0 %v7409_v49 }
 0x135   :  { %v284_v11 = vpop.f32.mrb[8].mxu0 }
 0x136   :  { %v286_v12 = vpop.f32.mrb[9].mxu0 }
 0x137   :  { %v288_v13 = vpop.f32.mrb[10].mxu0  ;;  %v7788_v16 = vpop.f32.mrb[8].mxu1 }
 0x138   :  { %v797_v14 = vpack.c.bf16 %v288_v13, %v284_v11  ;;  %v290_v15 = vpop.f32.mrb[11].mxu0  ;;  %v7790_v18 = vpop.f32.mrb[9].mxu1 }
 0x139   :  { %v798_v17 = vpack.c.bf16 %v290_v15, %v286_v12  ;;  %v7792_v19 = vpop.f32.mrb[10].mxu1 }
 0x13a   :  { %6460 = vmatpush3.bf16.msra.mxu1 %v797_v14  ;;  %v799_v20 = vpack.c.bf16 %v7792_v19, %v7788_v16  ;;  %v7797_v21 = vpop.f32.mrb[11].mxu1  ;;  %v6981_v19 = vld [vmem:[#allocation6 + $0x10] sm:$0xff]  }
 0x13b   :  { %6496 = vmatpush3.bf16.msra.mxu0 %v798_v17  ;;  %6461 = vmatprep.subr.bf16.mxu1 %v7409_v49  ;;  %v800_v22 = vpack.c.bf16 %v7797_v21, %v7790_v18  ;;  %v6982_v21 = vld [vmem:[#allocation6 + $0x34] sm:$0xff]  }
 0x13c   :  { %6497 = vmatprep.subr.bf16.mxu0 %v7409_v49 }
 0x13d   :  { %v294_v23 = vpop.f32.mrb[12].mxu0 }
 0x13e   :  { %v296_v24 = vpop.f32.mrb[13].mxu0 }
 0x13f   :  { %v298_v25 = vpop.f32.mrb[14].mxu0  ;;  %v7802_v28 = vpop.f32.mrb[12].mxu1 }
 0x140   :  { %v806_v26 = vpack.c.bf16 %v298_v25, %v294_v23  ;;  %v300_v27 = vpop.f32.mrb[15].mxu0  ;;  %v7804_v30 = vpop.f32.mrb[13].mxu1 }
 0x141   :  { %v807_v29 = vpack.c.bf16 %v300_v27, %v296_v24  ;;  %v7806_v31 = vpop.f32.mrb[14].mxu1 }
 0x142   :  { %6462 = vmatpush3.bf16.msra.mxu1 %v806_v26  ;;  %v808_v32 = vpack.c.bf16 %v7806_v31, %v7802_v28  ;;  %v7811_v33 = vpop.f32.mrb[15].mxu1 }
 0x143   :  { %6498 = vmatpush3.bf16.msra.mxu0 %v807_v29  ;;  %6463 = vmatprep.subr.bf16.mxu1 %v7409_v49  ;;  %v809_v34 = vpack.c.bf16 %v7811_v33, %v7804_v30 }
 0x144   :  { %6499 = vmatprep.subr.bf16.mxu0 %v7409_v49 }
 0x145   :  { %v304_v35 = vpop.f32.mrb[16].mxu0 }
 0x146   :  { %v306_v36 = vpop.f32.mrb[17].mxu0 }
 0x147   :  { %v308_v37 = vpop.f32.mrb[18].mxu0  ;;  %v7816_v40 = vpop.f32.mrb[16].mxu1 }
 0x148   :  { %v815_v38 = vpack.c.bf16 %v308_v37, %v304_v35  ;;  %v310_v39 = vpop.f32.mrb[19].mxu0  ;;  %v7818_v42 = vpop.f32.mrb[17].mxu1 }
 0x149   :  { %v816_v41 = vpack.c.bf16 %v310_v39, %v306_v36  ;;  %v7820_v43 = vpop.f32.mrb[18].mxu1 }
 0x14a   :  { %6464 = vmatpush3.bf16.msra.mxu1 %v815_v38  ;;  %v817_v44 = vpack.c.bf16 %v7820_v43, %v7816_v40  ;;  %v7825_v45 = vpop.f32.mrb[19].mxu1  ;;  %v6983_v43 = vld [vmem:[#allocation6 + $0x18] sm:$0xff]  }
 0x14b   :  { %6500 = vmatpush3.bf16.msra.mxu0 %v816_v41  ;;  %6465 = vmatprep.subr.bf16.mxu1 %v7409_v49  ;;  %v818_v46 = vpack.c.bf16 %v7825_v45, %v7818_v42  ;;  %v6977_v41 = vld [vmem:[#allocation6] sm:$0xff]  }
 0x14c   :  { %6501 = vmatprep.subr.bf16.mxu0 %v7409_v49  ;;  %v6984_v45 = vld [vmem:[#allocation6 + $0x3c] sm:$0xff]  }
 0x14d   :  { %v314_v47 = vpop.f32.mrb[20].mxu0 }
 0x14e   :  { %v316_v48 = vpop.f32.mrb[21].mxu0 }
 0x14f   :  { %v318_v50 = vpop.f32.mrb[22].mxu0  ;;  %v7830_v53 = vpop.f32.mrb[20].mxu1 }
 0x150   :  { %v824_v51 = vpack.c.bf16 %v318_v50, %v314_v47  ;;  %v320_v52 = vpop.f32.mrb[23].mxu0  ;;  %v7832_v56 = vpop.f32.mrb[21].mxu1 }
 0x151   :  { %v825_v54 = vpack.c.bf16 %v320_v52, %v316_v48  ;;  %v7834_v62 = vpop.f32.mrb[22].mxu1  ;;  %v6978_v48 = vld [vmem:[#allocation6 + $0x24] sm:$0xff]  }
 0x152   :  { %6466 = vmatpush3.bf16.msra.mxu1 %v824_v51  ;;  %v826_v63 = vpack.c.bf16 %v7834_v62, %v7830_v53  ;;  %v7839_v0 = vpop.f32.mrb[23].mxu1 }
 0x153   :  { %6502 = vmatpush3.bf16.msra.mxu0 %v825_v54  ;;  %6467 = vmatprep.subr.bf16.mxu1 %v7409_v49  ;;  %v827_v1 = vpack.c.bf16 %v7839_v0, %v7832_v56 }
 0x154   :  { %6503 = vmatprep.subr.bf16.mxu0 %v7409_v49 }
 0x155   :  { %v324_v2 = vpop.f32.mrb[24].mxu0 }
 0x156   :  { %v326_v4 = vpop.f32.mrb[25].mxu0 }
 0x157   :  { %v328_v11 = vpop.f32.mrb[26].mxu0  ;;  %v7844_v14 = vpop.f32.mrb[24].mxu1 }
 0x158   :  { %v833_v12 = vpack.c.bf16 %v328_v11, %v324_v2  ;;  %v330_v13 = vpop.f32.mrb[27].mxu0  ;;  %v7846_v17 = vpop.f32.mrb[25].mxu1 }
 0x159   :  { %v834_v15 = vpack.c.bf16 %v330_v13, %v326_v4  ;;  %v7848_v23 = vpop.f32.mrb[26].mxu1 }
 0x15a   :  { %6468 = vmatpush3.bf16.msra.mxu1 %v833_v12  ;;  %v835_v24 = vpack.c.bf16 %v7848_v23, %v7844_v14  ;;  %v7853_v25 = vpop.f32.mrb[27].mxu1  ;;  %v6985_v23 = vld [vmem:[#allocation6 + $0x20] ss:$0 sps:$4 sm:$0xff]  }
 0x15b   :  { %6504 = vmatpush3.bf16.msra.mxu0 %v834_v15  ;;  %6469 = vmatprep.subr.bf16.mxu1 %v7409_v49  ;;  %v836_v26 = vpack.c.bf16 %v7853_v25, %v7846_v17  ;;  %v6986_v25 = vld [vmem:[#allocation6 + $0x44] ss:$0 sps:$4 sm:$0xff]  }
 0x15c   :  { %6505 = vmatprep.subr.bf16.mxu0 %v7409_v49 }
 0x15d   :  { %v334_v27 = vpop.f32.mrb[28].mxu0 }
 0x15e   :  { %v336_v29 = vpop.f32.mrb[29].mxu0 }
 0x15f   :  { %v338_v35 = vpop.f32.mrb[30].mxu0  ;;  %v7858_v38 = vpop.f32.mrb[28].mxu1 }
 0x160   :  { %v842_v36 = vpack.c.bf16 %v338_v35, %v334_v27  ;;  %v340_v37 = vpop.f32.mrb[31].mxu0  ;;  %v7860_v47 = vpop.f32.mrb[29].mxu1 }
 0x161   :  { %v843_v39 = vpack.c.bf16 %v340_v37, %v336_v29  ;;  %v7862_v50 = vpop.f32.mrb[30].mxu1 }
 0x162   :  { %6470 = vmatpush3.bf16.msra.mxu1 %v842_v36  ;;  %v844_v51 = vpack.c.bf16 %v7862_v50, %v7858_v38  ;;  %v7867_v52 = vpop.f32.mrb[31].mxu1 }
 0x163   :  { %6506 = vmatpush3.bf16.msra.mxu0 %v843_v39  ;;  %6527 = vmatprep.subr.bf16.mxu1 %v7409_v49  ;;  %v845_v54 = vpack.c.bf16 %v7867_v52, %v7860_v47 }
 0x164   :  { %6563 = vmatprep.subr.bf16.mxu0 %v7409_v49 }
 0x165   :  { %6472 = vmatmul.mubr.bf16.vlgmr.msra.gmra.mrb[64].mxu1 %v6977_v41  ;;  %v7872_v2 = vpop.f32.mrb[32].mxu0 }
 0x166   :  { %6508 = vmatmul.mubr.bf16.vlgmr.msra.gmra.mrb[80].mxu0 %v6978_v48  ;;  %6528 = vmatpush3.bf16.msra.mxu1 %v781_v59  ;;  %v7877_v4 = vpop.f32.mrb[33].mxu0  ;;  %v6979_v59 = vld [vmem:[#allocation6 + $0x8] sm:$0xff]  }
 0x167   :  { %6564 = vmatpush3.bf16.msra.mxu0 %v782_v61  ;;  %6529 = vmatprep.subr.bf16.mxu1 %v7409_v49  ;;  %v7883_v11 = vpop.f32.mrb[34].mxu0  ;;  %v7892_v58 = vpop.f32.mrb[32].mxu1  ;;  %v6980_v61 = vld [vmem:[#allocation6 + $0x2c] sm:$0xff]  }
 0x168   :  { %6565 = vmatprep.subr.bf16.mxu0 %v7409_v49  ;;  %6475 = vmatprep.mubr.msk.bf16.mxu1 %vm7410_vm2, %v7409_v49  ;;  %v783_v12 = vpack.c.bf16 %v7883_v11, %v7872_v2  ;;  %v7890_v55 = vpop.f32.mrb[35].mxu0  ;;  %v7898_v60 = vpop.f32.mrb[33].mxu1  ;;  %v6989_v11 = vld [vmem:[#allocation6 + $0x50] sm:$0xff]  }
 0x169   :  { %6511 = vmatprep.mubr.msk.bf16.mxu0 %vm7410_vm2, %v7409_v49  ;;  %v784_v57 = vpack.c.bf16 %v7890_v55, %v7877_v4  ;;  %v7903_v13 = vpop.f32.mrb[34].mxu1  ;;  %v6990_v55 = vld [vmem:[#allocation6 + $0x74] sm:$0xff]  }
 0x16a   :  { %6530 = vmatpush3.bf16.msra.mxu1 %v790_v8  ;;  %v785_v15 = vpack.c.bf16 %v7903_v13, %v7892_v58  ;;  %v7911_v27 = vpop.f32.mrb[35].mxu1 }
 0x16b   :  { %6566 = vmatpush3.bf16.msra.mxu0 %v791_v10  ;;  %6531 = vmatprep.subr.bf16.mxu1 %v7409_v49  ;;  %v786_v3 = vpack.c.bf16 %v7911_v27, %v7898_v60  ;;  %v7000_v27 = vld [vmem:[#allocation6 + $0xbc] sm:$0xff]  }
 0x16c   :  { %6567 = vmatprep.subr.bf16.mxu0 %v7409_v49 }
 0x16d   :  { %6476 = vmatmul.mubr.bf16.gmra.mrb[68].mxu1 %v6979_v59  ;;  %v7916_v7 = vpop.f32.mrb[36].mxu0  ;;  %v6987_v59 = vld [vmem:[#allocation6 + $0x48] sm:$0xff]  }
 0x16e   :  { %6512 = vmatmul.mubr.bf16.gmra.mrb[84].mxu0 %v6980_v61  ;;  %6532 = vmatpush3.bf16.msra.mxu1 %v799_v20  ;;  %v7921_v5 = vpop.f32.mrb[37].mxu0 }
 0x16f   :  { %6568 = vmatpush3.bf16.msra.mxu0 %v800_v22  ;;  %6533 = vmatprep.subr.bf16.mxu1 %v7409_v49  ;;  %v7927_v8 = vpop.f32.mrb[38].mxu0  ;;  %v7936_v16 = vpop.f32.mrb[36].mxu1 }
 0x170   :  { %6569 = vmatprep.subr.bf16.mxu0 %v7409_v49  ;;  %6479 = vmatprep.mubr.msk.bf16.mxu1 %vm7410_vm2, %v7409_v49  ;;  %v792_v9 = vpack.c.bf16 %v7927_v8, %v7916_v7  ;;  %v7934_v10 = vpop.f32.mrb[39].mxu0  ;;  %v7942_v20 = vpop.f32.mrb[37].mxu1 }
 0x171   :  { %6515 = vmatprep.mubr.msk.bf16.mxu0 %vm7410_vm2, %v7409_v49  ;;  %v793_v18 = vpack.c.bf16 %v7934_v10, %v7921_v5  ;;  %v7947_v22 = vpop.f32.mrb[38].mxu1 }
 0x172   :  { %6534 = vmatpush3.bf16.msra.mxu1 %v808_v32  ;;  %v794_v29 = vpack.c.bf16 %v7947_v22, %v7936_v16  ;;  %v7955_v35 = vpop.f32.mrb[39].mxu1 }
 0x173   :  { %6570 = vmatpush3.bf16.msra.mxu0 %v809_v34  ;;  %6535 = vmatprep.subr.bf16.mxu1 %v7409_v49  ;;  %v795_v28 = vpack.c.bf16 %v7955_v35, %v7942_v20 }
 0x174   :  { %6571 = vmatprep.subr.bf16.mxu0 %v7409_v49 }
 0x175   :  { %6480 = vmatmul.mubr.bf16.gmra.mrb[72].mxu1 %v6981_v19  ;;  %v7960_v31 = vpop.f32.mrb[40].mxu0 }
 0x176   :  { %6516 = vmatmul.mubr.bf16.gmra.mrb[88].mxu0 %v6982_v21  ;;  %6536 = vmatpush3.bf16.msra.mxu1 %v817_v44  ;;  %v7965_v30 = vpop.f32.mrb[41].mxu0  ;;  %v6988_v21 = vld [vmem:[#allocation6 + $0x6c] sm:$0xff]  }
 0x177   :  { %6572 = vmatpush3.bf16.msra.mxu0 %v818_v46  ;;  %6537 = vmatprep.subr.bf16.mxu1 %v7409_v49  ;;  %v7971_v32 = vpop.f32.mrb[42].mxu0  ;;  %v7980_v40 = vpop.f32.mrb[40].mxu1 }
 0x178   :  { %6573 = vmatprep.subr.bf16.mxu0 %v7409_v49  ;;  %6483 = vmatprep.mubr.msk.bf16.mxu1 %vm7410_vm2, %v7409_v49  ;;  %v801_v33 = vpack.c.bf16 %v7971_v32, %v7960_v31  ;;  %v7978_v34 = vpop.f32.mrb[43].mxu0  ;;  %v7986_v44 = vpop.f32.mrb[41].mxu1  ;;  %v6991_v31 = vld [vmem:[#allocation6 + $0x58] sm:$0xff]  }
 0x179   :  { %6519 = vmatprep.mubr.msk.bf16.mxu0 %vm7410_vm2, %v7409_v49  ;;  %v802_v42 = vpack.c.bf16 %v7978_v34, %v7965_v30  ;;  %v7991_v46 = vpop.f32.mrb[42].mxu1  ;;  %v6992_v30 = vld [vmem:[#allocation6 + $0x7c] sm:$0xff]  }
 0x17a   :  { %6538 = vmatpush3.bf16.msra.mxu1 %v826_v63  ;;  %v803_v36 = vpack.c.bf16 %v7991_v46, %v7980_v40  ;;  %v7999_v37 = vpop.f32.mrb[43].mxu1  ;;  %v7002_v40 = vld [vmem:[#allocation6 + $0xc4] sm:$0xff]  }
 0x17b   :  { %6574 = vmatpush3.bf16.msra.mxu0 %v827_v1  ;;  %6539 = vmatprep.subr.bf16.mxu1 %v7409_v49  ;;  %v804_v53 = vpack.c.bf16 %v7999_v37, %v7986_v44  ;;  %v7003_v37 = vld [vmem:[#allocation6 + $0xa8] sm:$0xff]  }
 0x17c   :  { %6575 = vmatprep.subr.bf16.mxu0 %v7409_v49 }
 0x17d   :  { %6484 = vmatmul.mubr.bf16.gmra.mrb[76].mxu1 %v6983_v43  ;;  %v8004_v62 = vpop.f32.mrb[44].mxu0 }
 0x17e   :  { %6520 = vmatmul.mubr.bf16.gmra.mrb[92].mxu0 %v6984_v45  ;;  %6540 = vmatpush3.bf16.msra.mxu1 %v835_v24  ;;  %v8009_v56 = vpop.f32.mrb[45].mxu0 }
 0x17f   :  { %6576 = vmatpush3.bf16.msra.mxu0 %v836_v26  ;;  %6487 = vmatprep.mubr.msk.bf16.mxu1 %vm7410_vm2, %v7409_v49  ;;  %v8016_v63 = vpop.f32.mrb[46].mxu0  ;;  %v8025_v14 = vpop.f32.mrb[44].mxu1 }
 0x180   :  { %6523 = vmatprep.mubr.msk.bf16.mxu0 %vm7410_vm2, %v7409_v49  ;;  %6541 = vmatprep.subr.bf16.mxu1 %v7409_v49  ;;  %v810_v0 = vpack.c.bf16 %v8016_v63, %v8004_v62  ;;  %v8023_v1 = vpop.f32.mrb[47].mxu0  ;;  %v8030_v24 = vpop.f32.mrb[45].mxu1 }
 0x181   :  { %6577 = vmatprep.subr.bf16.mxu0 %v7409_v49  ;;  %v811_v17 = vpack.c.bf16 %v8023_v1, %v8009_v56  ;;  %v8035_v26 = vpop.f32.mrb[46].mxu1 }
 0x182   :  { %6542 = vmatpush3.bf16.msra.mxu1 %v844_v51  ;;  %v8043_v41 = vpop.f32.mrb[47].mxu1 }
 0x183   :  { %6578 = vmatpush3.bf16.msra.mxu0 %v845_v54  ;;  %6599 = vmatprep.subr.bf16.mxu1 %v7409_v49  ;;  %v8739_v44 = vpack.c.bf16 %v8043_v41, %v8030_v24  ;;  %v7006_v24 = vld [vmem:[#allocation6 + $0xd4] ss:$0 sps:$4 sm:$0xff]   ;;  %v7008_v41 = vld [vmem:[#allocation6 + $0xfc] sm:$0xff]  }
 0x184   :  { %6635 = vmatprep.subr.bf16.mxu0 %v7409_v49 }
 0x185   :  { %6488 = vmatmul.mubr.bf16.gmra.mrb[80].mxu1 %v6985_v23  ;;  %v8048_v38 = vpop.f32.mrb[48].mxu0 }
 0x186   :  { %6524 = vmatmul.mubr.bf16.gmra.mrb[96].mxu0 %v6986_v25  ;;  %6543 = vmatprep.mubr.msk.bf16.mxu1 %vm7410_vm2, %v7409_v49  ;;  %v8052_v47 = vpop.f32.mrb[49].mxu0 }
 0x187   :  { %6579 = vmatprep.mubr.msk.bf16.mxu0 %vm7410_vm2, %v7409_v49  ;;  %v8056_v50 = vpop.f32.mrb[50].mxu0  ;;  %v8062_v54 = vpop.f32.mrb[48].mxu1 }
 0x188   :  { %v819_v51 = vpack.c.bf16 %v8056_v50, %v8048_v38  ;;  %v8060_v52 = vpop.f32.mrb[51].mxu0  ;;  %v8066_v19 = vpop.f32.mrb[49].mxu1  ;;  %v6993_v38 = vld [vmem:[#allocation6 + $0x60] sm:$0xff]  }
 0x189   :  { %v820_v61 = vpack.c.bf16 %v8060_v52, %v8052_v47  ;;  %v8068_v43 = vpop.f32.mrb[50].mxu1  ;;  %v6994_v47 = vld [vmem:[#allocation6 + $0x84] sm:$0xff]  }
 0x18a   :  { %v8072_v23 = vpop.f32.mrb[51].mxu1  ;;  %v8740_v46 = vpack.c.bf16 %v8068_v43, %v8062_v54  ;;  %v7009_v54 = vld [vmem:[#allocation6 + $0xe0] sm:$0xff]   ;;  %v7011_v43 = vld [vmem:[#allocation6 + $0xe8] sm:$0xff]  }
 0x18d   :  { %6544 = vmatmul.mubr.bf16.vlgmr.msra.gmra.mrb[84].mxu1 %v6987_v59  ;;  %v8076_v48 = vpop.f32.mrb[52].mxu0 }
 0x18e   :  { %6600 = vmatpush3.bf16.msra.mxu1 %v783_v12  ;;  %6580 = vmatmul.mubr.bf16.vlgmr.msra.gmra.mrb[100].mxu0 %v6988_v21  ;;  %v8081_v39 = vpop.f32.mrb[53].mxu0 }
 0x18f   :  { %6636 = vmatpush3.bf16.msra.mxu0 %v784_v57  ;;  %6601 = vmatprep.subr.bf16.mxu1 %v7409_v49  ;;  %v544_v45 = vpop.f32.mrb[54].mxu0  ;;  %v8091_v2 = vpop.f32.mrb[52].mxu1 }
 0x190   :  { %6637 = vmatprep.subr.bf16.mxu0 %v7409_v49  ;;  %6547 = vmatprep.mubr.msk.bf16.mxu1 %vm7410_vm2, %v7409_v49  ;;  %v828_v59 = vpack.c.bf16 %v544_v45, %v8076_v48  ;;  %v546_v25 = vpop.f32.mrb[55].mxu0  ;;  %v8096_v12 = vpop.f32.mrb[53].mxu1 }
 0x191   :  { %6583 = vmatprep.mubr.msk.bf16.mxu0 %vm7410_vm2, %v7409_v49  ;;  %v829_v4 = vpack.c.bf16 %v546_v25, %v8081_v39  ;;  %v8101_v57 = vpop.f32.mrb[54].mxu1 }
 0x192   :  { %6602 = vmatpush3.bf16.msra.mxu1 %v792_v9  ;;  %v830_v48 = vpack.c.bf16 %v8101_v57, %v8091_v2  ;;  %v8109_v21 = vpop.f32.mrb[55].mxu1  ;;  %v7013_v2 = vld [vmem:[#allocation6 + $0xf0] sm:$0xff]   ;;  %v7015_v57 = vld [vmem:[#allocation6 + $0xf8] ss:$0 sps:$4 sm:$0xff]  }
 0x193   :  { %6638 = vmatpush3.bf16.msra.mxu0 %v793_v18  ;;  %6603 = vmatprep.subr.bf16.mxu1 %v7409_v49  ;;  %v831_v7 = vpack.c.bf16 %v8109_v21, %v8096_v12  ;;  %v7014_v12 = vld [vmem:[#allocation6 + $0x114] sm:$0xff]   ;;  %v7017_v21 = vld [vmem:[#allocation6 + $0x120] sm:$0xff]  }
 0x194   :  { %6639 = vmatprep.subr.bf16.mxu0 %v7409_v49 }
 0x195   :  { %6548 = vmatmul.mubr.bf16.gmra.mrb[88].mxu1 %v6989_v11  ;;  %v550_v8 = vpop.f32.mrb[56].mxu0 }
 0x196   :  { %6604 = vmatpush3.bf16.msra.mxu1 %v801_v33  ;;  %6584 = vmatmul.mubr.bf16.gmra.mrb[104].mxu0 %v6990_v55  ;;  %v552_v5 = vpop.f32.mrb[57].mxu0 }
 0x197   :  { %6640 = vmatpush3.bf16.msra.mxu0 %v802_v42  ;;  %6605 = vmatprep.subr.bf16.mxu1 %v7409_v49  ;;  %v554_v9 = vpop.f32.mrb[58].mxu0  ;;  %v8124_v39 = vpop.f32.mrb[56].mxu1 }
 0x198   :  { %6641 = vmatprep.subr.bf16.mxu0 %v7409_v49  ;;  %6551 = vmatprep.mubr.msk.bf16.mxu1 %vm7410_vm2, %v7409_v49  ;;  %v837_v10 = vpack.c.bf16 %v554_v9, %v550_v8  ;;  %v556_v18 = vpop.f32.mrb[59].mxu0  ;;  %v8128_v33 = vpop.f32.mrb[57].mxu1 }
 0x199   :  { %6587 = vmatprep.mubr.msk.bf16.mxu0 %vm7410_vm2, %v7409_v49  ;;  %v838_v32 = vpack.c.bf16 %v556_v18, %v552_v5  ;;  %v8133_v34 = vpop.f32.mrb[58].mxu1  ;;  %v6995_v18 = vld [vmem:[#allocation6 + $0x68] ss:$0 sps:$4 sm:$0xff]  }
 0x19a   :  { %6606 = vmatpush3.bf16.msra.mxu1 %v810_v0  ;;  %v839_v42 = vpack.c.bf16 %v8133_v34, %v8124_v39  ;;  %v8141_v45 = vpop.f32.mrb[59].mxu1  ;;  %v7019_v39 = vld [vmem:[#allocation6 + $0x130] sm:$0xff]   ;;  %v7021_v34 = vld [vmem:[#allocation6 + $0x140] ss:$0 sps:$4 sm:$0xff]  }
 0x19b   :  { %6642 = vmatpush3.bf16.msra.mxu0 %v811_v17  ;;  %6607 = vmatprep.subr.bf16.mxu1 %v7409_v49  ;;  %v840_v62 = vpack.c.bf16 %v8141_v45, %v8128_v33  ;;  %v7020_v33 = vld [vmem:[#allocation6 + $0x138] sm:$0xff]  }
 0x19c   :  { %6643 = vmatprep.subr.bf16.mxu0 %v7409_v49 }
 0x19d   :  { %6552 = vmatmul.mubr.bf16.gmra.mrb[92].mxu1 %v6991_v31  ;;  %v560_v63 = vpop.f32.mrb[60].mxu0  ;;  %v6996_v31 = vld [vmem:[#allocation6 + $0x8c] ss:$0 sps:$4 sm:$0xff]  }
 0x19e   :  { %6608 = vmatpush3.bf16.msra.mxu1 %v819_v51  ;;  %6588 = vmatmul.mubr.bf16.gmra.mrb[108].mxu0 %v6992_v30  ;;  %v562_v56 = vpop.f32.mrb[61].mxu0 }
 0x19f   :  { %6644 = vmatpush3.bf16.msra.mxu0 %v820_v61  ;;  %6609 = vmatprep.subr.bf16.mxu1 %v7409_v49  ;;  %v564_v0 = vpop.f32.mrb[62].mxu0  ;;  %v8156_v25 = vpop.f32.mrb[60].mxu1 }
 0x1a0   :  { %6645 = vmatprep.subr.bf16.mxu0 %v7409_v49  ;;  %6555 = vmatprep.mubr.msk.bf16.mxu1 %vm7410_vm2, %v7409_v49  ;;  %v846_v1 = vpack.c.bf16 %v564_v0, %v560_v63  ;;  %v566_v17 = vpop.f32.mrb[63].mxu0  ;;  %v8160_v51 = vpop.f32.mrb[61].mxu1 }
 0x1a1   :  { %6591 = vmatprep.mubr.msk.bf16.mxu0 %vm7410_vm2, %v7409_v49  ;;  %v847_v50 = vpack.c.bf16 %v566_v17, %v562_v56  ;;  %v8162_v52 = vpop.f32.mrb[62].mxu1 }
 0x1a2   :  { %6610 = vmatpush3.bf16.msra.mxu1 %v828_v59  ;;  %v848_v61 = vpack.c.bf16 %v8162_v52, %v8156_v25  ;;  %v8167_v11 = vpop.f32.mrb[63].mxu1 }
 0x1a3   :  { %6646 = vmatpush3.bf16.msra.mxu0 %v829_v4  ;;  %6611 = vmatprep.subr.bf16.mxu1 %v7409_v49  ;;  %v849_v55 = vpack.c.bf16 %v8167_v11, %v8160_v51 }
 0x1a4   :  { %6647 = vmatprep.subr.bf16.mxu0 %v7409_v49 }
 0x1a5   :  { %6556 = vmatmul.mubr.bf16.gmra.mrb[96].mxu1 %v6993_v38  ;;  %v8172_v8 = vpop.f32.mrb[64].mxu0  ;;  %v6998_v38 = vld [vmem:[#allocation6 + $0xb4] sm:$0xff]  }
 0x1a6   :  { %6592 = vmatmul.mubr.bf16.gmra.mrb[112].mxu0 %v6994_v47  ;;  %6612 = vmatpush3.bf16.msra.mxu1 %v837_v10  ;;  %v8174_v59 = vpop.f32.mrb[65].mxu0 }
 0x1a7   :  { %6648 = vmatpush3.bf16.msra.mxu0 %v838_v32  ;;  %6559 = vmatprep.mubr.msk.bf16.mxu1 %vm7410_vm2, %v7409_v49  ;;  %v8178_v4 = vpop.f32.mrb[66].mxu0 }
 0x1a8   :  { %6595 = vmatprep.mubr.msk.bf16.mxu0 %vm7410_vm2, %v7409_v49  ;;  %6613 = vmatprep.subr.bf16.mxu1 %v7409_v49  ;;  %v796_v5 = vpack.c.bf16 %v8178_v4, %v8172_v8  ;;  %v8185_v9 = vpop.f32.mrb[67].mxu0 }
 0x1a9   :  { %6649 = vmatprep.subr.bf16.mxu0 %v7409_v49  ;;  %v787_v10 = vpack.c.bf16 %v8185_v9, %v8174_v59 }
 0x1aa   :  { %6614 = vmatpush3.bf16.msra.mxu1 %v846_v1  ;;  %v6997_v1 = vld [vmem:[#allocation6 + $0x90] sm:$0xff]  }
 0x1ab   :  { %6650 = vmatpush3.bf16.msra.mxu0 %v847_v50  ;;  %6671 = vmatprep.subr.bf16.mxu1 %v7409_v49 }
 0x1ac   :  { %6707 = vmatprep.subr.bf16.mxu0 %v7409_v49 }
 0x1ad   :  { %6560 = vmatmul.mubr.bf16.gmra.mrb[100].mxu1 %v6995_v18  ;;  %v8192_v32 = vpop.f32.mrb[68].mxu0 }
 0x1ae   :  { %6596 = vmatmul.mubr.bf16.gmra.mrb[116].mxu0 %v6996_v31  ;;  %6615 = vmatprep.mubr.msk.bf16.mxu1 %vm7410_vm2, %v7409_v49  ;;  %v8196_v30 = vpop.f32.mrb[69].mxu0 }
 0x1af   :  { %6651 = vmatprep.mubr.msk.bf16.mxu0 %vm7410_vm2, %v7409_v49  ;;  %v8200_v63 = vpop.f32.mrb[70].mxu0 }
 0x1b0   :  { %v814_v56 = vpack.c.bf16 %v8200_v63, %v8192_v32  ;;  %v8204_v0 = vpop.f32.mrb[71].mxu0 }
 0x1b1   :  { %v805_v17 = vpack.c.bf16 %v8204_v0, %v8196_v30 }
 0x1b5   :  { %6616 = vmatmul.mubr.bf16.vlgmr.msra.gmra.mrb[104].mxu1 %v6997_v1  ;;  %v8208_v50 = vpop.f32.mrb[72].mxu0 }
 0x1b6   :  { %6672 = vmatpush3.bf16.msra.mxu1 %v785_v15  ;;  %6652 = vmatmul.mubr.bf16.vlgmr.msra.gmra.mrb[120].mxu0 %v6998_v38  ;;  %v8213_v47 = vpop.f32.mrb[73].mxu0  ;;  %v6999_v15 = vld [vmem:[#allocation6 + $0x98] sm:$0xff]  }
 0x1b7   :  { %6708 = vmatpush3.bf16.msra.mxu0 %v786_v3  ;;  %6673 = vmatprep.subr.bf16.mxu1 %v7409_v49  ;;  %v8219_v18 = vpop.f32.mrb[74].mxu0 }
 0x1b8   :  { %6709 = vmatprep.subr.bf16.mxu0 %v7409_v49  ;;  %6619 = vmatprep.mubr.msk.bf16.mxu1 %vm7410_vm2, %v7409_v49  ;;  %v832_v58 = vpack.c.bf16 %v8219_v18, %v8208_v50  ;;  %v8226_v13 = vpop.f32.mrb[75].mxu0 }
 0x1b9   :  { %6655 = vmatprep.mubr.msk.bf16.mxu0 %vm7410_vm2, %v7409_v49  ;;  %v823_v60 = vpack.c.bf16 %v8226_v13, %v8213_v47 }
 0x1ba   :  { %6674 = vmatpush3.bf16.msra.mxu1 %v794_v29  ;;  %v7001_v29 = vld [vmem:[#allocation6 + $0xa0] sm:$0xff]  }
 0x1bb   :  { %6710 = vmatpush3.bf16.msra.mxu0 %v795_v28  ;;  %6675 = vmatprep.subr.bf16.mxu1 %v7409_v49  ;;  %v8738_v28 = vpack.c.bf16 %v8035_v26, %v8025_v14  ;;  %v7005_v14 = vld [vmem:[#allocation6 + $0xb0] ss:$0 sps:$4 sm:$0xff]   ;;  %v7007_v26 = vld [vmem:[#allocation6 + $0xd8] sm:$0xff]  }
 0x1bc   :  { %6711 = vmatprep.subr.bf16.mxu0 %v7409_v49 }
 0x1bd   :  { %6620 = vmatmul.mubr.bf16.gmra.mrb[108].mxu1 %v6999_v15  ;;  %v8240_v3 = vpop.f32.mrb[76].mxu0 }
 0x1be   :  { %6676 = vmatpush3.bf16.msra.mxu1 %v803_v36  ;;  %6656 = vmatmul.mubr.bf16.gmra.mrb[124].mxu0 %v7000_v27  ;;  %v8245_v31 = vpop.f32.mrb[77].mxu0  ;;  %v8741_v36 = vpack.c.bf16 %v8072_v23, %v8066_v19  ;;  %v7010_v19 = vld [vmem:[#allocation6 + $0x104] sm:$0xff]   ;;  %v7012_v23 = vld [vmem:[#allocation6 + $0x10c] sm:$0xff]  }
 0x1bf   :  { %6712 = vmatpush3.bf16.msra.mxu0 %v804_v53  ;;  %6677 = vmatprep.subr.bf16.mxu1 %v7409_v49  ;;  %v8251_v16 = vpop.f32.mrb[78].mxu0  ;;  %v7004_v53 = vld [vmem:[#allocation6 + $0xcc] sm:$0xff]  }
 0x1c0   :  { %6713 = vmatprep.subr.bf16.mxu0 %v7409_v49  ;;  %6623 = vmatprep.mubr.msk.bf16.mxu1 %vm7410_vm2, %v7409_v49  ;;  %v850_v20 = vpack.c.bf16 %v8251_v16, %v8240_v3  ;;  %v8258_v22 = vpop.f32.mrb[79].mxu0 }
 0x1c1   :  { %6659 = vmatprep.mubr.msk.bf16.mxu0 %vm7410_vm2, %v7409_v49  ;;  %v841_v35 = vpack.c.bf16 %v8258_v22, %v8245_v31 }
 0x1c2   :  { %6678 = vmatpush3.bf16.msra.mxu1 %v8738_v28 }
 0x1c3   :  { %6714 = vmatpush3.bf16.msra.mxu0 %v8739_v44  ;;  %6679 = vmatprep.subr.bf16.mxu1 %v7409_v49 }
 0x1c4   :  { %6715 = vmatprep.subr.bf16.mxu0 %v7409_v49 }
 0x1c5   :  { %6624 = vmatmul.mubr.bf16.gmra.mrb[112].mxu1 %v7001_v29 }
 0x1c6   :  { %6680 = vmatpush3.bf16.msra.mxu1 %v8740_v46  ;;  %6660 = vmatmul.mubr.bf16.gmra.mrb[128].mxu0 %v7002_v40 }
 0x1c7   :  { %6716 = vmatpush3.bf16.msra.mxu0 %v8741_v36  ;;  %6681 = vmatprep.subr.bf16.mxu1 %v7409_v49 }
 0x1c8   :  { %6717 = vmatprep.subr.bf16.mxu0 %v7409_v49  ;;  %6627 = vmatprep.mubr.msk.bf16.mxu1 %vm7410_vm2, %v7409_v49 }
 0x1c9   :  { %6663 = vmatprep.mubr.msk.bf16.mxu0 %vm7410_vm2, %v7409_v49 }
 0x1ca   :  { %6682 = vmatpush3.bf16.msra.mxu1 %v830_v48  ;;  %v7016_v48 = vld [vmem:[#allocation6 + $0x11c] ss:$0 sps:$4 sm:$0xff]  }
 0x1cb   :  { %6718 = vmatpush3.bf16.msra.mxu0 %v831_v7  ;;  %6683 = vmatprep.subr.bf16.mxu1 %v7409_v49  ;;  %v7018_v7 = vld [vmem:[#allocation6 + $0x128] sm:$0xff]  }
 0x1cc   :  { %6719 = vmatprep.subr.bf16.mxu0 %v7409_v49 }
 0x1cd   :  { %6628 = vmatmul.mubr.bf16.gmra.mrb[116].mxu1 %v7003_v37 }
 0x1ce   :  { %6664 = vmatmul.mubr.bf16.gmra.mrb[132].mxu0 %v7004_v53  ;;  %6684 = vmatpush3.bf16.msra.mxu1 %v839_v42 }
 0x1cf   :  { %6720 = vmatpush3.bf16.msra.mxu0 %v840_v62  ;;  %6631 = vmatprep.mubr.msk.bf16.mxu1 %vm7410_vm2, %v7409_v49 }
 0x1d0   :  { %6667 = vmatprep.mubr.msk.bf16.mxu0 %vm7410_vm2, %v7409_v49  ;;  %6685 = vmatprep.subr.bf16.mxu1 %v7409_v49 }
 0x1d1   :  { %6721 = vmatprep.subr.bf16.mxu0 %v7409_v49 }
 0x1d2   :  { %6686 = vmatpush3.bf16.msra.mxu1 %v848_v61 }
 0x1d3   :  { %6722 = vmatpush3.bf16.msra.mxu0 %v849_v55  ;;  %6743 = vmatprep.subr.bf16.mxu1 %v7409_v49 }
 0x1d5   :  { %6632 = vmatmul.mubr.bf16.gmra.mrb[120].mxu1 %v7005_v14 }
 0x1d6   :  { %6668 = vmatmul.mubr.bf16.gmra.mrb[136].mxu0 %v7006_v24  ;;  %6687 = vmatprep.mubr.msk.bf16.mxu1 %vm7410_vm2, %v7409_v49 }
 0x1d7   :  { %6723 = vmatprep.mubr.msk.bf16.mxu0 %vm7410_vm2, %v7409_v49 }
 0x1dd   :  { %6688 = vmatmul.mubr.bf16.vlgmr.msra.gmra.mrb[124].mxu1 %v7007_v26 }
 0x1de   :  { %6724 = vmatmul.mubr.bf16.vlgmr.msra.gmra.mrb[140].mxu0 %v7008_v41  ;;  %6744 = vmatpush3.bf16.msra.mxu1 %v787_v10 }
 0x1df   :  { %6745 = vmatprep.subr.bf16.mxu1 %v7409_v49  ;;  %6691 = vmatprep.mubr.msk.bf16.mxu1 %vm7410_vm2, %v7409_v49 }
 0x1e0   :  { %6727 = vmatprep.mubr.msk.bf16.mxu0 %vm7410_vm2, %v7409_v49 }
 0x1e2   :  { %6746 = vmatpush3.bf16.msra.mxu1 %v796_v5 }
 0x1e3   :  { %6747 = vmatprep.subr.bf16.mxu1 %v7409_v49 }
 0x1e5   :  { %6692 = vmatmul.mubr.bf16.gmra.mrb[128].mxu1 %v7009_v54 }
 0x1e6   :  { %6728 = vmatmul.mubr.bf16.gmra.mrb[144].mxu0 %v7010_v19  ;;  %6748 = vmatpush3.bf16.msra.mxu1 %v805_v17 }
 0x1e7   :  { %6749 = vmatprep.subr.bf16.mxu1 %v7409_v49  ;;  %6695 = vmatprep.mubr.msk.bf16.mxu1 %vm7410_vm2, %v7409_v49 }
 0x1e8   :  { %6731 = vmatprep.mubr.msk.bf16.mxu0 %vm7410_vm2, %v7409_v49 }
 0x1ea   :  { %6750 = vmatpush3.bf16.msra.mxu1 %v814_v56 }
 0x1eb   :  { %6751 = vmatprep.subr.bf16.mxu1 %v7409_v49 }
 0x1ed   :  { %6696 = vmatmul.mubr.bf16.gmra.mrb[132].mxu1 %v7011_v43 }
 0x1ee   :  { %6732 = vmatmul.mubr.bf16.gmra.mrb[148].mxu0 %v7012_v23  ;;  %6752 = vmatpush3.bf16.msra.mxu1 %v823_v60 }
 0x1ef   :  { %6753 = vmatprep.subr.bf16.mxu1 %v7409_v49  ;;  %6699 = vmatprep.mubr.msk.bf16.mxu1 %vm7410_vm2, %v7409_v49 }
 0x1f0   :  { %6735 = vmatprep.mubr.msk.bf16.mxu0 %vm7410_vm2, %v7409_v49 }
 0x1f2   :  { %6754 = vmatpush3.bf16.msra.mxu1 %v832_v58 }
 0x1f3   :  { %6755 = vmatprep.subr.bf16.mxu1 %v7409_v49 }
 0x1f5   :  { %6700 = vmatmul.mubr.bf16.gmra.mrb[136].mxu1 %v7013_v2 }
 0x1f6   :  { %6736 = vmatmul.mubr.bf16.gmra.mrb[152].mxu0 %v7014_v12  ;;  %6756 = vmatpush3.bf16.msra.mxu1 %v841_v35 }
 0x1f7   :  { %6757 = vmatprep.subr.bf16.mxu1 %v7409_v49  ;;  %6703 = vmatprep.mubr.msk.bf16.mxu1 %vm7410_vm2, %v7409_v49 }
 0x1f8   :  { %6739 = vmatprep.mubr.msk.bf16.mxu0 %vm7410_vm2, %v7409_v49 }
 0x1fa   :  { %6758 = vmatpush3.bf16.msra.mxu1 %v850_v20 }
 0x1fd   :  { %6704 = vmatmul.mubr.bf16.gmra.mrb[140].mxu1 %v7015_v57 }
 0x1fe   :  { %6740 = vmatmul.mubr.bf16.gmra.mrb[156].mxu0 %v7016_v48  ;;  %6759 = vmatprep.mubr.msk.bf16.mxu1 %vm7410_vm2, %v7409_v49 }
 0x205   :  { %6760 = vmatmul.mubr.bf16.vlgmr.msra.gmra.mrb[144].mxu1 %v7017_v21 }
 0x206   :  { %6763 = vmatprep.mubr.msk.bf16.mxu1 %vm7410_vm2, %v7409_v49 }
 0x20d   :  { %6764 = vmatmul.mubr.bf16.gmra.mrb[148].mxu1 %v7018_v7 }
 0x20e   :  { %6767 = vmatprep.mubr.msk.bf16.mxu1 %vm7410_vm2, %v7409_v49 }
 0x215   :  { %6768 = vmatmul.mubr.bf16.gmra.mrb[152].mxu1 %v7019_v39 }
 0x216   :  { %6771 = vmatprep.mubr.msk.bf16.mxu1 %vm7410_vm2, %v7409_v49 }
 0x21d   :  { %6772 = vmatmul.mubr.bf16.gmra.mrb[156].mxu1 %v7020_v33 }
 0x21e   :  { %6775 = vmatprep.mubr.msk.bf16.mxu1 %vm7410_vm2, %v7409_v49 }
 0x225   :  { %6776 = vmatmul.mubr.bf16.gmra.mrb[160].mxu1 %v7021_v34 }
 0x238   :  { %v940_v42 = vpop.f32.mrb[64].mxu1 }
 0x239   :  { %v6473_v45 = vpop.f32.mrb[65].mxu1  ;;  %v1077_v62 = vpop.f32.mrb[80].mxu0 }
 0x23a   :  { %v1115_v25 = vadd.f32 %v1077_v62, %v940_v42  ;;  %v943_v51 = vpop.f32.mrb[66].mxu1  ;;  %v6509_v52 = vpop.f32.mrb[81].mxu0 }
 0x23b   :  { %v6474_v61 = vpop.f32.mrb[67].mxu1  ;;  %v1080_v11 = vpop.f32.mrb[82].mxu0 }
 0x23c   :  { %v1116_v55 = vadd.f32 %v1080_v11, %v943_v51  ;;  %v6510_v8 = vpop.f32.mrb[83].mxu0 }
 0x240   :  { %v948_v59 = vpop.f32.mrb[68].mxu1 }
 0x241   :  { %v6477_v4 = vpop.f32.mrb[69].mxu1  ;;  %v1085_v5 = vpop.f32.mrb[84].mxu0 }
 0x242   :  { %v1117_v9 = vadd.f32 %v1085_v5, %v948_v59  ;;  %v951_v10 = vpop.f32.mrb[70].mxu1  ;;  %v6513_v32 = vpop.f32.mrb[85].mxu0 }
 0x243   :  { %v6478_v30 = vpop.f32.mrb[71].mxu1  ;;  %v1088_v63 = vpop.f32.mrb[86].mxu0 }
 0x244   :  { %v1118_v56 = vadd.f32 %v1088_v63, %v951_v10  ;;  %v6514_v0 = vpop.f32.mrb[87].mxu0 }
 0x248   :  { %v956_v1 = vpop.f32.mrb[72].mxu1 }
 0x249   :  { %v6481_v17 = vpop.f32.mrb[73].mxu1  ;;  %v1093_v38 = vpop.f32.mrb[88].mxu0 }
 0x24a   :  { %v1119_v50 = vadd.f32 %v1093_v38, %v956_v1  ;;  %v959_v47 = vpop.f32.mrb[74].mxu1  ;;  %v6517_v18 = vpop.f32.mrb[89].mxu0 }
 0x24b   :  { %v6482_v58 = vpop.f32.mrb[75].mxu1  ;;  %v1096_v13 = vpop.f32.mrb[90].mxu0 }
 0x24c   :  { %v1120_v15 = vadd.f32 %v1096_v13, %v959_v47  ;;  %v6518_v60 = vpop.f32.mrb[91].mxu0 }
 0x250   :  { %v964_v27 = vpop.f32.mrb[76].mxu1 }
 0x251   :  { %v6485_v3 = vpop.f32.mrb[77].mxu1  ;;  %v1101_v31 = vpop.f32.mrb[92].mxu0 }
 0x252   :  { %v1121_v16 = vadd.f32 %v1101_v31, %v964_v27  ;;  %v967_v20 = vpop.f32.mrb[78].mxu1  ;;  %v6521_v22 = vpop.f32.mrb[93].mxu0 }
 0x253   :  { %v6486_v29 = vpop.f32.mrb[79].mxu1  ;;  %v1104_v35 = vpop.f32.mrb[94].mxu0 }
 0x254   :  { %v1122_v28 = vadd.f32 %v1104_v35, %v967_v20  ;;  %v6522_v40 = vpop.f32.mrb[95].mxu0 }
 0x258   :  { %v972_v44 = vpop.f32.mrb[80].mxu1 }
 0x259   :  { %v6489_v46 = vpop.f32.mrb[81].mxu1  ;;  %v1109_v36 = vpop.f32.mrb[96].mxu0 }
 0x25a   :  { %v1123_v37 = vadd.f32 %v1109_v36, %v972_v44  ;;  %v975_v53 = vpop.f32.mrb[82].mxu1  ;;  %v6525_v14 = vpop.f32.mrb[97].mxu0 }
 0x25b   :  { %v6490_v24 = vpop.f32.mrb[83].mxu1  ;;  %v1112_v26 = vpop.f32.mrb[98].mxu0 }
 0x25c   :  { %v6526_v41 = vpop.f32.mrb[99].mxu0 }
 0x260   :  { %v1214_v54 = vpop.f32.mrb[84].mxu1 }
 0x261   :  { %v1252_v19 = vadd.f32 %v1214_v54, %v1115_v25  ;;  %v6545_v43 = vpop.f32.mrb[85].mxu1  ;;  %v1351_v23 = vpop.f32.mrb[100].mxu0 }
 0x262   :  { %v1217_v2 = vpop.f32.mrb[86].mxu1  ;;  %v6581_v12 = vpop.f32.mrb[101].mxu0 }
 0x263   :  { %v1253_v57 = vadd.f32 %v1217_v2, %v1116_v55  ;;  %v1389_v48 = vadd.f32 %v1351_v23, %v1252_v19  ;;  %v6546_v21 = vpop.f32.mrb[87].mxu1  ;;  %v1354_v7 = vpop.f32.mrb[102].mxu0 }
 0x264   :  { %v6582_v39 = vpop.f32.mrb[103].mxu0 }
 0x265   :  { %v1390_v33 = vadd.f32 %v1354_v7, %v1253_v57 }
 0x268   :  { %v1222_v34 = vpop.f32.mrb[88].mxu1 }
 0x269   :  { %v1254_v42 = vadd.f32 %v1222_v34, %v1117_v9  ;;  %v6549_v45 = vpop.f32.mrb[89].mxu1  ;;  %v1359_v62 = vpop.f32.mrb[104].mxu0 }
 0x26a   :  { %v1225_v51 = vpop.f32.mrb[90].mxu1  ;;  %v6585_v52 = vpop.f32.mrb[105].mxu0 }
 0x26b   :  { %v1255_v61 = vadd.f32 %v1225_v51, %v1118_v56  ;;  %v1391_v11 = vadd.f32 %v1359_v62, %v1254_v42  ;;  %v6550_v8 = vpop.f32.mrb[91].mxu1  ;;  %v1362_v25 = vpop.f32.mrb[106].mxu0 }
 0x26c   :  { %v6586_v59 = vpop.f32.mrb[107].mxu0 }
 0x26d   :  { %v1392_v4 = vadd.f32 %v1362_v25, %v1255_v61 }
 0x270   :  { %v1230_v5 = vpop.f32.mrb[92].mxu1 }
 0x271   :  { %v1256_v10 = vadd.f32 %v1230_v5, %v1119_v50  ;;  %v6553_v55 = vpop.f32.mrb[93].mxu1  ;;  %v1367_v32 = vpop.f32.mrb[108].mxu0 }
 0x272   :  { %v1233_v30 = vpop.f32.mrb[94].mxu1  ;;  %v6589_v63 = vpop.f32.mrb[109].mxu0 }
 0x273   :  { %v1257_v0 = vadd.f32 %v1233_v30, %v1120_v15  ;;  %v1393_v1 = vadd.f32 %v1367_v32, %v1256_v10  ;;  %v6554_v17 = vpop.f32.mrb[95].mxu1  ;;  %v1370_v9 = vpop.f32.mrb[110].mxu0 }
 0x274   :  { %v6590_v38 = vpop.f32.mrb[111].mxu0 }
 0x275   :  { %v1394_v47 = vadd.f32 %v1370_v9, %v1257_v0 }
 0x278   :  { %v1238_v18 = vpop.f32.mrb[96].mxu1 }
 0x279   :  { %v1258_v58 = vadd.f32 %v1238_v18, %v1121_v16  ;;  %v6557_v56 = vpop.f32.mrb[97].mxu1  ;;  %v1375_v13 = vpop.f32.mrb[112].mxu0 }
 0x27a   :  { %v1241_v60 = vpop.f32.mrb[98].mxu1  ;;  %v6593_v27 = vpop.f32.mrb[113].mxu0 }
 0x27b   :  { %v1259_v3 = vadd.f32 %v1241_v60, %v1122_v28  ;;  %v1395_v31 = vadd.f32 %v1375_v13, %v1258_v58  ;;  %v6558_v20 = vpop.f32.mrb[99].mxu1  ;;  %v1378_v50 = vpop.f32.mrb[114].mxu0 }
 0x27c   :  { %v6594_v22 = vpop.f32.mrb[115].mxu0 }
 0x27d   :  { %v1396_v29 = vadd.f32 %v1378_v50, %v1259_v3 }
 0x280   :  { %v1246_v35 = vpop.f32.mrb[100].mxu1 }
 0x281   :  { %v1260_v40 = vadd.f32 %v1246_v35, %v1123_v37  ;;  %v6561_v15 = vpop.f32.mrb[101].mxu1  ;;  %v1383_v44 = vpop.f32.mrb[116].mxu0 }
 0x282   :  { %v1249_v46 = vpop.f32.mrb[102].mxu1  ;;  %v6597_v36 = vpop.f32.mrb[117].mxu0 }
 0x283   :  { %v1397_v53 = vadd.f32 %v1383_v44, %v1260_v40  ;;  %v6562_v14 = vpop.f32.mrb[103].mxu1  ;;  %v1386_v24 = vpop.f32.mrb[118].mxu0 }
 0x284   :  { %v6598_v16 = vpop.f32.mrb[119].mxu0 }
 0x288   :  { %v1488_v26 = vpop.f32.mrb[104].mxu1 }
 0x289   :  { %v1526_v41 = vadd.f32 %v1488_v26, %v1389_v48  ;;  %v6617_v54 = vpop.f32.mrb[105].mxu1  ;;  %v1625_v19 = vpop.f32.mrb[120].mxu0 }
 0x28a   :  { %v1491_v28 = vpop.f32.mrb[106].mxu1  ;;  %v6653_v43 = vpop.f32.mrb[121].mxu0 }
 0x28b   :  { %v1527_v23 = vadd.f32 %v1491_v28, %v1390_v33  ;;  %v1663_v2 = vadd.f32 %v1625_v19, %v1526_v41  ;;  %v6618_v12 = vpop.f32.mrb[107].mxu1  ;;  %v1628_v57 = vpop.f32.mrb[122].mxu0 }
 0x28c   :  { %v6654_v21 = vpop.f32.mrb[123].mxu0 }
 0x28d   :  { %v1664_v37 = vadd.f32 %v1628_v57, %v1527_v23 }
 0x290   :  { %v1496_v7 = vpop.f32.mrb[108].mxu1 }
 0x291   :  { %v1528_v39 = vadd.f32 %v1496_v7, %v1391_v11  ;;  %v6621_v34 = vpop.f32.mrb[109].mxu1  ;;  %v1633_v42 = vpop.f32.mrb[124].mxu0 }
 0x292   :  { %v1499_v45 = vpop.f32.mrb[110].mxu1  ;;  %v6657_v62 = vpop.f32.mrb[125].mxu0 }
 0x293   :  { %v1529_v51 = vadd.f32 %v1499_v45, %v1392_v4  ;;  %v1665_v52 = vadd.f32 %v1633_v42, %v1528_v39  ;;  %v6622_v61 = vpop.f32.mrb[111].mxu1  ;;  %v1636_v48 = vpop.f32.mrb[126].mxu0 }
 0x294   :  { %v6658_v8 = vpop.f32.mrb[127].mxu0 }
 0x295   :  { %v1666_v25 = vadd.f32 %v1636_v48, %v1529_v51 }
 0x298   :  { %v1504_v59 = vpop.f32.mrb[112].mxu1 }
 0x299   :  { %v1530_v5 = vadd.f32 %v1504_v59, %v1393_v1  ;;  %v6625_v33 = vpop.f32.mrb[113].mxu1  ;;  %v1641_v10 = vpop.f32.mrb[128].mxu0 }
 0x29a   :  { %v1507_v55 = vpop.f32.mrb[114].mxu1  ;;  %v6661_v32 = vpop.f32.mrb[129].mxu0 }
 0x29b   :  { %v1531_v30 = vadd.f32 %v1507_v55, %v1394_v47  ;;  %v1667_v63 = vadd.f32 %v1641_v10, %v1530_v5  ;;  %v6626_v0 = vpop.f32.mrb[115].mxu1  ;;  %v1644_v11 = vpop.f32.mrb[130].mxu0 }
 0x29c   :  { %v6662_v17 = vpop.f32.mrb[131].mxu0 }
 0x29d   :  { %v1668_v9 = vadd.f32 %v1644_v11, %v1531_v30 }
 0x2a0   :  { %v1512_v38 = vpop.f32.mrb[116].mxu1 }
 0x2a1   :  { %v1532_v18 = vadd.f32 %v1512_v38, %v1395_v31  ;;  %v6629_v4 = vpop.f32.mrb[117].mxu1  ;;  %v1649_v58 = vpop.f32.mrb[132].mxu0 }
 0x2a2   :  { %v1515_v56 = vpop.f32.mrb[118].mxu1  ;;  %v6665_v13 = vpop.f32.mrb[133].mxu0 }
 0x2a3   :  { %v1533_v60 = vadd.f32 %v1515_v56, %v1396_v29  ;;  %v1669_v27 = vadd.f32 %v1649_v58, %v1532_v18  ;;  %v6630_v3 = vpop.f32.mrb[119].mxu1  ;;  %v1652_v1 = vpop.f32.mrb[134].mxu0 }
 0x2a4   :  { %v6666_v20 = vpop.f32.mrb[135].mxu0 }
 0x2a5   :  { %v1670_v50 = vadd.f32 %v1652_v1, %v1533_v60 }
 0x2a8   :  { %v1520_v22 = vpop.f32.mrb[120].mxu1 }
 0x2a9   :  { %v1534_v35 = vadd.f32 %v1520_v22, %v1397_v53  ;;  %v6633_v47 = vpop.f32.mrb[121].mxu1  ;;  %v1657_v40 = vpop.f32.mrb[136].mxu0 }
 0x2aa   :  { %v1523_v15 = vpop.f32.mrb[122].mxu1  ;;  %v6669_v44 = vpop.f32.mrb[137].mxu0 }
 0x2ab   :  { %v1671_v46 = vadd.f32 %v1657_v40, %v1534_v35  ;;  %v6634_v36 = vpop.f32.mrb[123].mxu1  ;;  %v1660_v14 = vpop.f32.mrb[138].mxu0 }
 0x2ac   :  { %v6670_v31 = vpop.f32.mrb[139].mxu0 }
 0x2b0   :  { %v1762_v24 = vpop.f32.mrb[124].mxu1 }
 0x2b1   :  { %v1800_v16 = vadd.f32 %v1762_v24, %v1663_v2  ;;  %v6689_v26 = vpop.f32.mrb[125].mxu1  ;;  %v1899_v41 = vpop.f32.mrb[140].mxu0 }
 0x2b2   :  { %v1765_v29 = vpop.f32.mrb[126].mxu1  ;;  %v6725_v54 = vpop.f32.mrb[141].mxu0 }
 0x2b3   :  { %v1801_v19 = vadd.f32 %v1765_v29, %v1664_v37  ;;  %v1937_v28 = vadd.f32 %v1899_v41, %v1800_v16  ;;  %v6690_v43 = vpop.f32.mrb[127].mxu1  ;;  %v1902_v23 = vpop.f32.mrb[142].mxu0  ;;  %v5661_v16 = vld [vmem:[%s8711_s5] ss:$0 sm:$0xff] }
 0x2b4   :  { %v6726_v12 = vpop.f32.mrb[143].mxu0 }
 0x2b5   :  { %v1938_v53 = vadd.f32 %v1902_v23, %v1801_v19 }
 0x2b8   :  { %v1770_v57 = vpop.f32.mrb[128].mxu1 }
 0x2b9   :  { %v1802_v21 = vadd.f32 %v1770_v57, %v1665_v52  ;;  %v6693_v7 = vpop.f32.mrb[129].mxu1  ;;  %v1907_v39 = vpop.f32.mrb[144].mxu0 }
 0x2ba   :  { %v1773_v34 = vpop.f32.mrb[130].mxu1  ;;  %v6729_v42 = vpop.f32.mrb[145].mxu0 }
 0x2bb   :  { %v1803_v45 = vadd.f32 %v1773_v34, %v1666_v25  ;;  %v1939_v62 = vadd.f32 %v1907_v39, %v1802_v21  ;;  %v6694_v51 = vpop.f32.mrb[131].mxu1  ;;  %v1910_v2 = vpop.f32.mrb[146].mxu0 }
 0x2bc   :  { %v6730_v61 = vpop.f32.mrb[147].mxu0 }
 0x2bd   :  { %v1940_v48 = vadd.f32 %v1910_v2, %v1803_v45 }
 0x2c0   :  { %v1778_v8 = vpop.f32.mrb[132].mxu1 }
 0x2c1   :  { %v1804_v59 = vadd.f32 %v1778_v8, %v1667_v63  ;;  %v6697_v37 = vpop.f32.mrb[133].mxu1  ;;  %v1915_v5 = vpop.f32.mrb[148].mxu0 }
 0x2c2   :  { %v1781_v33 = vpop.f32.mrb[134].mxu1  ;;  %v6733_v10 = vpop.f32.mrb[149].mxu0 }
 0x2c3   :  { %v1805_v55 = vadd.f32 %v1781_v33, %v1668_v9  ;;  %v1941_v32 = vadd.f32 %v1915_v5, %v1804_v59  ;;  %v6698_v30 = vpop.f32.mrb[135].mxu1  ;;  %v1918_v52 = vpop.f32.mrb[150].mxu0 }
 0x2c4   :  { %v6734_v0 = vpop.f32.mrb[151].mxu0 }
 0x2c5   :  { %v1942_v11 = vadd.f32 %v1918_v52, %v1805_v55 }
 0x2c8   :  { %v1786_v17 = vpop.f32.mrb[136].mxu1 }
 0x2c9   :  { %v1806_v38 = vadd.f32 %v1786_v17, %v1669_v27  ;;  %v6701_v25 = vpop.f32.mrb[137].mxu1  ;;  %v1923_v18 = vpop.f32.mrb[152].mxu0 }
 0x2ca   :  { %v1789_v4 = vpop.f32.mrb[138].mxu1  ;;  %v6737_v58 = vpop.f32.mrb[153].mxu0 }
 0x2cb   :  { %v1807_v56 = vadd.f32 %v1789_v4, %v1670_v50  ;;  %v1943_v13 = vadd.f32 %v1923_v18, %v1806_v38  ;;  %v6702_v60 = vpop.f32.mrb[139].mxu1  ;;  %v1926_v63 = vpop.f32.mrb[154].mxu0  ;;  %v7022_v50 = vld [vmem:[%s8714_s8] sm:$0xff]  }
 0x2cc   :  { %v6738_v3 = vpop.f32.mrb[155].mxu0  ;;  %6789 = vmatprep.mubr.msk.bf16.mxu0 %vm2236_vm3, %v7022_v50 }
 0x2cd   :  { %v1944_v1 = vadd.f32 %v1926_v63, %v1807_v56 }
 0x2d0   :  { %v1794_v20 = vpop.f32.mrb[140].mxu1 }
 0x2d1   :  { %v1808_v22 = vadd.f32 %v1794_v20, %v1671_v46  ;;  %v6705_v9 = vpop.f32.mrb[141].mxu1  ;;  %v1931_v35 = vpop.f32.mrb[156].mxu0  ;;  %v7023_v46 = vld [vmem:[%s8714_s8 + $0x10] sm:$0xff]  }
 0x2d2   :  { %v1797_v47 = vpop.f32.mrb[142].mxu1  ;;  %v6741_v40 = vpop.f32.mrb[157].mxu0  ;;  %6803 = vmatprep.mubr.msk.bf16.mxu1 %vm2236_vm3, %v7023_v46 }
 0x2d3   :  { %v1945_v15 = vadd.f32 %v1931_v35, %v1808_v22  ;;  %v6706_v44 = vpop.f32.mrb[143].mxu1  ;;  %v1934_v36 = vpop.f32.mrb[158].mxu0 }
 0x2d4   :  { %v6742_v27 = vpop.f32.mrb[159].mxu0 }
 0x2d8   :  { %v2036_v14 = vpop.f32.mrb[144].mxu1 }
 0x2d9   :  { %v2074_v31 = vadd.f32 %v2036_v14, %v1937_v28  ;;  %v6761_v24 = vpop.f32.mrb[145].mxu1 }
 0x2da   :  { %v2039_v26 = vpop.f32.mrb[146].mxu1 }
 0x2db   :  { %v2075_v41 = vadd.f32 %v2039_v26, %v1938_v53  ;;  %v6762_v29 = vpop.f32.mrb[147].mxu1  ;;  %v2108_v54 = vadd.f32 %v5661_v16, %v2074_v31 }
 0x2dd   :  { %v2109_v19 = vadd.f32 %v5661_v16, %v2075_v41 }
 0x2df   :  { %v2119_v28 = vadd.f32 %v2109_v19, %v2108_v54 }
 0x2e0   :  { %v2044_v43 = vpop.f32.mrb[148].mxu1 }
 0x2e1   :  { %v2076_v23 = vadd.f32 %v2044_v43, %v1939_v62  ;;  %v6765_v12 = vpop.f32.mrb[149].mxu1 }
 0x2e2   :  { %v2047_v57 = vpop.f32.mrb[150].mxu1 }
 0x2e3   :  { %v2110_v21 = vadd.f32 %v5661_v16, %v2076_v23  ;;  %v2077_v7 = vadd.f32 %v2047_v57, %v1940_v48  ;;  %v6766_v39 = vpop.f32.mrb[151].mxu1 }
 0x2e5   :  { %v2120_v34 = vadd.f32 %v2119_v28, %v2110_v21  ;;  %v2111_v42 = vadd.f32 %v5661_v16, %v2077_v7 }
 0x2e7   :  { %v2121_v45 = vadd.f32 %v2120_v34, %v2111_v42 }
 0x2e8   :  { %v2052_v51 = vpop.f32.mrb[152].mxu1 }
 0x2e9   :  { %v2078_v53 = vadd.f32 %v2052_v51, %v1941_v32  ;;  %v6769_v2 = vpop.f32.mrb[153].mxu1 }
 0x2ea   :  { %v2055_v61 = vpop.f32.mrb[154].mxu1 }
 0x2eb   :  { %v2112_v8 = vadd.f32 %v5661_v16, %v2078_v53  ;;  %v2079_v59 = vadd.f32 %v2055_v61, %v1942_v11  ;;  %v6770_v37 = vpop.f32.mrb[155].mxu1 }
 0x2ed   :  { %v2122_v5 = vadd.f32 %v2121_v45, %v2112_v8  ;;  %v2113_v33 = vadd.f32 %v5661_v16, %v2079_v59 }
 0x2ef   :  { %v2123_v10 = vadd.f32 %v2122_v5, %v2113_v33  ;;  %v5662_v5 = vld [vmem:[%s8712_s6] ss:$0 sm:$0xff] }
 0x2f0   :  { %v2060_v55 = vpop.f32.mrb[156].mxu1 }
 0x2f1   :  { %v2080_v62 = vadd.f32 %v2060_v55, %v1943_v13  ;;  %v6773_v30 = vpop.f32.mrb[157].mxu1 }
 0x2f2   :  { %v2063_v52 = vpop.f32.mrb[158].mxu1  ;;  %v5663_v30 = vld [vmem:[%s8713_s7] ss:$0 sm:$0xff] }
 0x2f3   :  { %v2114_v0 = vadd.f32 %v5661_v16, %v2080_v62  ;;  %v2081_v48 = vadd.f32 %v2063_v52, %v1944_v1  ;;  %v6774_v17 = vpop.f32.mrb[159].mxu1 }
 0x2f5   :  { %v2124_v38 = vadd.f32 %v2123_v10, %v2114_v0  ;;  %v2115_v25 = vadd.f32 %v5661_v16, %v2081_v48 }
 0x2f7   :  { %v2125_v18 = vadd.f32 %v2124_v38, %v2115_v25 }
 0x2f8   :  { %v2068_v4 = vpop.f32.mrb[160].mxu1 }
 0x2f9   :  { %v2082_v32 = vadd.f32 %v2068_v4, %v1945_v15  ;;  %v6777_v58 = vpop.f32.mrb[161].mxu1 }
 0x2fa   :  { %v2071_v56 = vpop.f32.mrb[162].mxu1 }
 0x2fb   :  { %v2116_v60 = vadd.f32 %v5661_v16, %v2082_v32  ;;  %v6778_v11 = vpop.f32.mrb[163].mxu1 }
 0x2fd   :  { %v2126_v63 = vadd.f32 %v2125_v18, %v2116_v60 }
 0x2ff   :  { %v2127_v3 = vrot.slane %v2126_v63, 4 }
 0x301   :  { %v2128_v20 = vadd.f32 %v2127_v3, %v2126_v63 }
 0x303   :  { %v2129_v22 = vrot.slane %v2128_v20, 2 }
 0x305   :  { %v2130_v9 = vadd.f32 %v2129_v22, %v2128_v20 }
 0x307   :  { %v2131_v13 = vrot.slane %v2130_v9, 1 }
 0x309   :  { %v2132_v35 = vadd.f32 %v2131_v13, %v2130_v9 }
 0x30b   :  { %v2133_v47 = vmul.f32 0.013888889, %v2132_v35 }
 0x30d   :  { %v2134_v40 = vsub.f32 %v2108_v54, %v2133_v47  ;;  %v2135_v1 = vsub.f32 %v2109_v19, %v2133_v47  ;;  %v2136_v44 = vsub.f32 %v2110_v21, %v2133_v47  ;;  %v2137_v36 = vsub.f32 %v2111_v42, %v2133_v47 }
 0x30e   :  { %v2138_v27 = vsub.f32 %v2112_v8, %v2133_v47  ;;  %v2139_v14 = vsub.f32 %v2113_v33, %v2133_v47  ;;  %v2140_v31 = vsub.f32 %v2114_v0, %v2133_v47  ;;  %v2141_v15 = vsub.f32 %v2115_v25, %v2133_v47 }
 0x30f   :  { %v2142_v24 = vsub.f32 %v2116_v60, %v2133_v47  ;;  %v2143_v50 = vmul.f32 %v2134_v40, %v2134_v40  ;;  %v2144_v46 = vmul.f32 %v2135_v1, %v2135_v1  ;;  %v2145_v16 = vmul.f32 %v2136_v44, %v2136_v44 }
 0x310   :  { %v2146_v41 = vmul.f32 %v2137_v36, %v2137_v36  ;;  %v2147_v28 = vmul.f32 %v2138_v27, %v2138_v27  ;;  %v2148_v23 = vmul.f32 %v2139_v14, %v2139_v14  ;;  %v2149_v57 = vmul.f32 %v2140_v31, %v2140_v31 }
 0x311   :  { %v2152_v26 = vadd.f32 %v2144_v46, %v2143_v50  ;;  %v2150_v19 = vmul.f32 %v2141_v15, %v2141_v15  ;;  %v2151_v7 = vmul.f32 %v2142_v24, %v2142_v24 }
 0x313   :  { %v2153_v29 = vadd.f32 %v2152_v26, %v2145_v16 }
 0x315   :  { %v2154_v43 = vadd.f32 %v2153_v29, %v2146_v41 }
 0x317   :  { %v2155_v12 = vadd.f32 %v2154_v43, %v2147_v28 }
 0x319   :  { %v2156_v54 = vadd.f32 %v2155_v12, %v2148_v23  ;;  %v7024_v23 = vld [vmem:[%s8714_s8 + $0x8] sm:$0xff]   ;;  %v7025_v12 = vld [vmem:[%s8714_s8 + $0x18] sm:$0xff]  }
 0x31b   :  { %v2157_v21 = vadd.f32 %v2156_v54, %v2149_v57  ;;  %v7026_v57 = vld [vmem:[%s8714_s8 + $0x30] sm:$0xff]   ;;  %v7027_v54 = vld [vmem:[%s8714_s8 + $0x20] sm:$0xff]  }
 0x31d   :  { %v2158_v39 = vadd.f32 %v2157_v21, %v2150_v19  ;;  %v7028_v19 = vld [vmem:[%s8714_s8 + $0x38] sm:$0xff]   ;;  %v7029_v21 = vld [vmem:[%s8714_s8 + $0x28] sm:$0xff]  }
 0x31f   :  { %v2159_v34 = vadd.f32 %v2158_v39, %v2151_v7  ;;  %v7030_v7 = vld [vmem:[%s8714_s8 + $0x50] sm:$0xff]   ;;  %v7031_v39 = vld [vmem:[%s8714_s8 + $0x40] sm:$0xff]  }
 0x321   :  { %v2160_v42 = vrot.slane %v2159_v34, 4 }
 0x323   :  { %v2161_v45 = vadd.f32 %v2160_v42, %v2159_v34  ;;  %v7032_v34 = vld [vmem:[%s8714_s8 + $0x58] sm:$0xff]   ;;  %v7033_v42 = vld [vmem:[%s8714_s8 + $0x48] sm:$0xff]  }
 0x325   :  { %v2162_v51 = vrot.slane %v2161_v45, 2 }
 0x327   :  { %v2163_v53 = vadd.f32 %v2162_v51, %v2161_v45  ;;  %v7034_v45 = vld [vmem:[%s8714_s8 + $0x70] sm:$0xff]   ;;  %v7035_v51 = vld [vmem:[%s8714_s8 + $0x60] sm:$0xff]  }
 0x329   :  { %v2164_v2 = vrot.slane %v2163_v53, 1 }
 0x32b   :  { %v2165_v61 = vadd.f32 %v2164_v2, %v2163_v53  ;;  %v7040_v53 = vld [vmem:[#allocation9 + $0x40] sm:$0xff]   ;;  %v7036_v2 = vld [vmem:[%s8714_s8 + $0x78] sm:$0xff]  }
 0x32d   :  { %v2166_v8 = vmul.f32 0.013888889, %v2165_v61  ;;  %v7037_v61 = vld [vmem:[%s8714_s8 + $0x68] sm:$0xff]  }
 0x32f   :  { %v2167_v59 = vadd.f32 1e-05, %v2166_v8  ;;  %v7038_v8 = vld [vmem:[%s8714_s8 + $0x80] sm:$0xff]  }
 0x331   :  { %7246 = vrsqrt.f32 %v2167_v59  ;;  %v7041_v59 = vld [vmem:[#allocation9] sm:$0xff]  }
 0x33b   :  { %v7247_v37 = vpop.eup %7246 }
 0x33c   :  { %v2169_v33 = vmul.f32 %v7247_v37, %v2134_v40  ;;  %v2170_v10 = vmul.f32 %v7247_v37, %v2135_v1  ;;  %v2171_v55 = vmul.f32 %v7247_v37, %v2136_v44  ;;  %v2172_v62 = vmul.f32 %v7247_v37, %v2137_v36 }
 0x33d   :  { %v2173_v52 = vmul.f32 %v7247_v37, %v2138_v27  ;;  %v2174_v0 = vmul.f32 %v7247_v37, %v2139_v14  ;;  %v2175_v48 = vmul.f32 %v7247_v37, %v2140_v31  ;;  %v2176_v17 = vmul.f32 %v7247_v37, %v2141_v15 }
 0x33e   :  { %v2177_v38 = vmul.f32 %v7247_v37, %v2142_v24  ;;  %v2184_v25 = vmul.f32 %v5662_v5, %v2169_v33  ;;  %v2185_v18 = vmul.f32 %v5662_v5, %v2170_v10  ;;  %v2186_v4 = vmul.f32 %v5662_v5, %v2171_v55  ;;  %v7042_v37 = vld [vmem:[#allocation9 + $0x48] sm:$0xff]   ;;  %v7044_v33 = vld [vmem:[#allocation9 + $0x50] sm:$0xff]   ;;  %v7046_v55 = vld [vmem:[#allocation9 + $0x58] sm:$0xff]  }
 0x33f   :  { %v2187_v32 = vmul.f32 %v5662_v5, %v2172_v62  ;;  %v2188_v58 = vmul.f32 %v5662_v5, %v2173_v52  ;;  %v2189_v56 = vmul.f32 %v5662_v5, %v2174_v0  ;;  %v2190_v60 = vmul.f32 %v5662_v5, %v2175_v48  ;;  %v7045_v10 = vld [vmem:[#allocation9 + $0x10] sm:$0xff]   ;;  %v7047_v62 = vld [vmem:[#allocation9 + $0x18] sm:$0xff]   ;;  %v7048_v52 = vld [vmem:[#allocation9 + $0xc0] sm:$0xff]  }
 0x340   :  { %v2191_v11 = vmul.f32 %v5662_v5, %v2176_v17  ;;  %v2199_v63 = vadd.f32 %v5663_v30, %v2184_v25  ;;  %v2200_v3 = vadd.f32 %v5663_v30, %v2185_v18  ;;  %v2201_v20 = vadd.f32 %v5663_v30, %v2186_v4  ;;  %v7051_v0 = vld [vmem:[#allocation9 + $0x20] sm:$0xff]   ;;  %v7054_v48 = vld [vmem:[#allocation9 + $0x68] sm:$0xff]   ;;  %v7058_v4 = vld [vmem:[#allocation9 + $0x70] sm:$0xff]  }
 0x341   :  { %v2202_v22 = vadd.f32 %v5663_v30, %v2187_v32  ;;  %v2203_v9 = vadd.f32 %v5663_v30, %v2188_v58  ;;  %v2204_v13 = vadd.f32 %v5663_v30, %v2189_v56  ;;  %v2205_v35 = vadd.f32 %v5663_v30, %v2190_v60  ;;  %v7039_v17 = vld [vmem:[%s8714_s8 + $0x88] sm:$0xff]   ;;  %v7056_v58 = vld [vmem:[#allocation9 + $0xd0] sm:$0xff]  }
 0x342   :  { %v2206_v47 = vadd.f32 %v5663_v30, %v2191_v11  ;;  %v2208_v40 = vmax.f32 %v2199_v63, 0.0  ;;  %v2209_v1 = vmax.f32 %v2200_v3, 0.0  ;;  %v2210_v44 = vmax.f32 %v2201_v20, 0.0  ;;  %v7052_v25 = vld [vmem:[#allocation9 + $0xc8] sm:$0xff]   ;;  %v7059_v56 = vld [vmem:[#allocation9 + $0x30] sm:$0xff]   ;;  %v7062_v11 = vld [vmem:[#allocation9 + $0x78] sm:$0xff]  }
 0x343   :  { %v2211_v36 = vmax.f32 %v2202_v22, 0.0  ;;  %v2212_v27 = vmax.f32 %v2203_v9, 0.0  ;;  %v2213_v14 = vmax.f32 %v2204_v13, 0.0  ;;  %v2214_v31 = vmax.f32 %v2205_v35, 0.0  ;;  %v7055_v18 = vld [vmem:[#allocation9 + $0x28] sm:$0xff]   ;;  %v7057_v60 = vld [vmem:[#allocation9 + $0x90] sm:$0xff]  }
 0x344   :  { %v2215_v15 = vmax.f32 %v2206_v47, 0.0  ;;  %v8389_v24 = vpack.c.bf16 %v2209_v1, %v2208_v40  ;;  %v2192_v26 = vmul.f32 %v5662_v5, %v2177_v38  ;;  %v7043_v5 = vld [vmem:[#allocation9 + $0x8] sm:$0xff]   ;;  %v7049_v38 = vld [vmem:[#allocation9 + $0x80] sm:$0xff]   ;;  %v7060_v63 = vld [vmem:[#allocation9 + $0xd8] sm:$0xff]  }
 0x345   :  { %v8391_v50 = vpack.c.bf16 %v2211_v36, %v2210_v44  ;;  %v8393_v46 = vpack.c.bf16 %v2213_v14, %v2212_v27  ;;  %v7053_v32 = vld [vmem:[#allocation9 + $0x88] sm:$0xff]   ;;  %v7063_v3 = vld [vmem:[#allocation9 + $0x38] sm:$0xff]   ;;  %v7064_v22 = vld [vmem:[#allocation9 + $0xe0] sm:$0xff]  }
 0x346   :  { %v8395_v16 = vpack.c.bf16 %v2215_v15, %v2214_v31  ;;  %6779 = vmatprep.subr.bf16.mxu0 %v8389_v24  ;;  %6793 = vmatprep.subr.bf16.mxu1 %v8389_v24  ;;  %v2207_v41 = vadd.f32 %v5663_v30, %v2192_v26  ;;  %v7050_v30 = vld [vmem:[#allocation9 + $0x60] sm:$0xff]   ;;  %v7061_v20 = vld [vmem:[#allocation9 + $0x98] sm:$0xff]   ;;  %v7066_v35 = vld [vmem:[#allocation9 + $0xe8] sm:$0xff]  }
 0x347   :  { %6780 = vmatpush3.bf16.msra.mxu0 %v8389_v24  ;;  %6794 = vmatpush3.bf16.msra.mxu1 %v8389_v24  ;;  %v7067_v9 = vld [vmem:[#allocation9 + $0x140] sm:$0xff]   ;;  %v7068_v47 = vld [vmem:[#allocation9 + $0xa8] sm:$0xff]   ;;  %v7070_v40 = vld [vmem:[#allocation9 + $0xf0] sm:$0xff]  }
 0x348   :  { %6781 = vmatprep.subr.bf16.mxu0 %v8391_v50  ;;  %6795 = vmatprep.subr.bf16.mxu1 %v8391_v50  ;;  %v2216_v29 = vmax.f32 %v2207_v41, 0.0  ;;  %v7065_v13 = vld [vmem:[#allocation9 + $0xa0] sm:$0xff]   ;;  %v7072_v1 = vld [vmem:[#allocation9 + $0xb0] sm:$0xff]   ;;  %v7074_v44 = vld [vmem:[#allocation9 + $0xf8] sm:$0xff]  }
 0x349   :  { %v7076_v36 = vld [vmem:[#allocation9 + $0xb8] sm:$0xff]   ;;  %v7083_v27 = vld [vmem:[#allocation9 + $0x1c0] sm:$0xff]  }
 0x34a   :  { %v8411_v28 = vpack.c.bf16 %v2216_v29, %v2216_v29 }
 0x34b   :  { %6782 = vmatpush3.bf16.msra.mxu0 %v8391_v50  ;;  %6796 = vmatpush3.bf16.msra.mxu1 %v8391_v50 }
 0x34c   :  { %6783 = vmatprep.subr.bf16.mxu0 %v8393_v46  ;;  %6797 = vmatprep.subr.bf16.mxu1 %v8393_v46  ;;  %v8421_v43 = vsel %vm2243_vm4, %v8411_v28, 0 }
 0x34f   :  { %6784 = vmatpush3.bf16.msra.mxu0 %v8393_v46  ;;  %6798 = vmatpush3.bf16.msra.mxu1 %v8393_v46 }
 0x350   :  { %6785 = vmatprep.subr.bf16.mxu0 %v8395_v16  ;;  %6799 = vmatprep.subr.bf16.mxu1 %v8395_v16 }
 0x353   :  { %6786 = vmatpush3.bf16.msra.mxu0 %v8395_v16  ;;  %6800 = vmatpush3.bf16.msra.mxu1 %v8395_v16 }
 0x354   :  { %6951 = vmatprep.subr.msk.bf16.mxu0 %vm2243_vm4, %v8411_v28  ;;  %6952 = vmatprep.subr.msk.bf16.mxu1 %vm2243_vm4, %v8411_v28 }
 0x357   :  { %6788 = vmatpush3.bf16.msra.mxu0 %v8421_v43  ;;  %6802 = vmatpush3.bf16.msra.mxu1 %v8421_v43 }
 0x358   :  { %6807 = vmatprep.subr.bf16.mxu0 %v8389_v24  ;;  %6821 = vmatprep.subr.bf16.mxu1 %v8389_v24 }
 0x35a   :  { %6790 = vmatmul.mubr.msk.bf16.vlgmr.msra.gmra.mrb[160].mxu0 %vm2236_vm3, %v7024_v23  ;;  %6804 = vmatmul.mubr.msk.bf16.vlgmr.msra.gmra.mrb[164].mxu1 %vm2236_vm3, %v7025_v12  ;;  %v7069_v23 = vld [vmem:[#allocation9 + $0x100] sm:$0xff]   ;;  %v7071_v12 = vld [vmem:[#allocation9 + $0x148] sm:$0xff]  }
 0x35b   :  { %6808 = vmatpush3.bf16.msra.mxu0 %v8389_v24  ;;  %6822 = vmatpush3.bf16.msra.mxu1 %v8389_v24 }
 0x35c   :  { %6809 = vmatprep.subr.bf16.mxu0 %v8391_v50  ;;  %6823 = vmatprep.subr.bf16.mxu1 %v8391_v50 }
 0x35d   :  { %6831 = vmatprep.mubr.msk.bf16.mxu1 %vm2236_vm3, %v7026_v57  ;;  %6817 = vmatprep.mubr.msk.bf16.mxu0 %vm2236_vm3, %v7027_v54  ;;  %v7073_v57 = vld [vmem:[#allocation9 + $0x108] sm:$0xff]   ;;  %v7075_v54 = vld [vmem:[#allocation9 + $0x150] sm:$0xff]  }
 0x35f   :  { %6810 = vmatpush3.bf16.msra.mxu0 %v8391_v50  ;;  %6824 = vmatpush3.bf16.msra.mxu1 %v8391_v50 }
 0x360   :  { %6811 = vmatprep.subr.bf16.mxu0 %v8393_v46  ;;  %6825 = vmatprep.subr.bf16.mxu1 %v8393_v46 }
 0x363   :  { %6812 = vmatpush3.bf16.msra.mxu0 %v8393_v46  ;;  %6826 = vmatpush3.bf16.msra.mxu1 %v8393_v46 }
 0x364   :  { %6813 = vmatprep.subr.bf16.mxu0 %v8395_v16  ;;  %6827 = vmatprep.subr.bf16.mxu1 %v8395_v16 }
 0x367   :  { %6814 = vmatpush3.bf16.msra.mxu0 %v8395_v16  ;;  %6828 = vmatpush3.bf16.msra.mxu1 %v8395_v16 }
 0x368   :  { %6953 = vmatprep.subr.msk.bf16.mxu0 %vm2243_vm4, %v8411_v28  ;;  %6954 = vmatprep.subr.msk.bf16.mxu1 %vm2243_vm4, %v8411_v28 }
 0x36b   :  { %6816 = vmatpush3.bf16.msra.mxu0 %v8421_v43  ;;  %6830 = vmatpush3.bf16.msra.mxu1 %v8421_v43 }
 0x36c   :  { %6835 = vmatprep.subr.bf16.mxu0 %v8389_v24  ;;  %6849 = vmatprep.subr.bf16.mxu1 %v8389_v24 }
 0x36e   :  { %6832 = vmatmul.mubr.msk.bf16.vlgmr.msra.gmra.mrb[168].mxu1 %vm2236_vm3, %v7028_v19  ;;  %6818 = vmatmul.mubr.msk.bf16.vlgmr.msra.gmra.mrb[164].mxu0 %vm2236_vm3, %v7029_v21  ;;  %v7077_v19 = vld [vmem:[#allocation9 + $0x110] sm:$0xff]   ;;  %v7078_v21 = vld [vmem:[#allocation9 + $0x158] sm:$0xff]  }
 0x36f   :  { %6836 = vmatpush3.bf16.msra.mxu0 %v8389_v24  ;;  %6850 = vmatpush3.bf16.msra.mxu1 %v8389_v24 }
 0x370   :  { %6837 = vmatprep.subr.bf16.mxu0 %v8391_v50  ;;  %6851 = vmatprep.subr.bf16.mxu1 %v8391_v50 }
 0x371   :  { %6859 = vmatprep.mubr.msk.bf16.mxu1 %vm2236_vm3, %v7030_v7  ;;  %6845 = vmatprep.mubr.msk.bf16.mxu0 %vm2236_vm3, %v7031_v39  ;;  %v7079_v7 = vld [vmem:[#allocation9 + $0x118] sm:$0xff]   ;;  %v7080_v39 = vld [vmem:[#allocation9 + $0x160] sm:$0xff]  }
 0x373   :  { %6838 = vmatpush3.bf16.msra.mxu0 %v8391_v50  ;;  %6852 = vmatpush3.bf16.msra.mxu1 %v8391_v50 }
 0x374   :  { %6839 = vmatprep.subr.bf16.mxu0 %v8393_v46  ;;  %6853 = vmatprep.subr.bf16.mxu1 %v8393_v46 }
 0x377   :  { %6840 = vmatpush3.bf16.msra.mxu0 %v8393_v46  ;;  %6854 = vmatpush3.bf16.msra.mxu1 %v8393_v46 }
 0x378   :  { %6841 = vmatprep.subr.bf16.mxu0 %v8395_v16  ;;  %6855 = vmatprep.subr.bf16.mxu1 %v8395_v16 }
 0x37b   :  { %6842 = vmatpush3.bf16.msra.mxu0 %v8395_v16  ;;  %6856 = vmatpush3.bf16.msra.mxu1 %v8395_v16 }
 0x37c   :  { %6955 = vmatprep.subr.msk.bf16.mxu0 %vm2243_vm4, %v8411_v28  ;;  %6956 = vmatprep.subr.msk.bf16.mxu1 %vm2243_vm4, %v8411_v28 }
 0x37f   :  { %6844 = vmatpush3.bf16.msra.mxu0 %v8421_v43  ;;  %6858 = vmatpush3.bf16.msra.mxu1 %v8421_v43 }
 0x380   :  { %6863 = vmatprep.subr.bf16.mxu0 %v8389_v24  ;;  %6877 = vmatprep.subr.bf16.mxu1 %v8389_v24 }
 0x382   :  { %6860 = vmatmul.mubr.msk.bf16.vlgmr.msra.gmra.mrb[172].mxu1 %vm2236_vm3, %v7032_v34  ;;  %6846 = vmatmul.mubr.msk.bf16.vlgmr.msra.gmra.mrb[168].mxu0 %vm2236_vm3, %v7033_v42 }
 0x383   :  { %6864 = vmatpush3.bf16.msra.mxu0 %v8389_v24  ;;  %6878 = vmatpush3.bf16.msra.mxu1 %v8389_v24 }
 0x384   :  { %6865 = vmatprep.subr.bf16.mxu0 %v8391_v50  ;;  %6879 = vmatprep.subr.bf16.mxu1 %v8391_v50 }
 0x385   :  { %6887 = vmatprep.mubr.msk.bf16.mxu1 %vm2236_vm3, %v7034_v45  ;;  %6873 = vmatprep.mubr.msk.bf16.mxu0 %vm2236_vm3, %v7035_v51  ;;  %v7081_v45 = vld [vmem:[#allocation9 + $0x120] sm:$0xff]  }
 0x387   :  { %6866 = vmatpush3.bf16.msra.mxu0 %v8391_v50  ;;  %6880 = vmatpush3.bf16.msra.mxu1 %v8391_v50 }
 0x388   :  { %6867 = vmatprep.subr.bf16.mxu0 %v8393_v46  ;;  %6881 = vmatprep.subr.bf16.mxu1 %v8393_v46 }
 0x38b   :  { %6868 = vmatpush3.bf16.msra.mxu0 %v8393_v46  ;;  %6882 = vmatpush3.bf16.msra.mxu1 %v8393_v46 }
 0x38c   :  { %6869 = vmatprep.subr.bf16.mxu0 %v8395_v16  ;;  %6883 = vmatprep.subr.bf16.mxu1 %v8395_v16 }
 0x38f   :  { %6870 = vmatpush3.bf16.msra.mxu0 %v8395_v16  ;;  %6884 = vmatpush3.bf16.msra.mxu1 %v8395_v16 }
 0x390   :  { %6957 = vmatprep.subr.msk.bf16.mxu0 %vm2243_vm4, %v8411_v28  ;;  %6958 = vmatprep.subr.msk.bf16.mxu1 %vm2243_vm4, %v8411_v28 }
 0x393   :  { %6872 = vmatpush3.bf16.msra.mxu0 %v8421_v43  ;;  %6886 = vmatpush3.bf16.msra.mxu1 %v8421_v43 }
 0x394   :  { %6891 = vmatprep.subr.bf16.mxu0 %v8389_v24  ;;  %6131 = vmatprep.subr.bf16.mxu1 %v7040_v53 }
 0x396   :  { %6888 = vmatmul.mubr.msk.bf16.vlgmr.msra.gmra.mrb[176].mxu1 %vm2236_vm3, %v7036_v2  ;;  %6874 = vmatmul.mubr.msk.bf16.vlgmr.msra.gmra.mrb[172].mxu0 %vm2236_vm3, %v7037_v61  ;;  %v7082_v2 = vld [vmem:[#allocation9 + $0x168] sm:$0xff]  }
 0x397   :  { %6892 = vmatpush3.bf16.msra.mxu0 %v8389_v24  ;;  %6901 = vmatprep.mubr.msk.bf16.mxu0 %vm2236_vm3, %v7038_v8 }
 0x398   :  { %6893 = vmatprep.subr.bf16.mxu0 %v8391_v50  ;;  %6132 = vmatpush3.bf16.msra.mxu1 %v7041_v59 }
 0x399   :  { %6133 = vmatprep.subr.bf16.mxu1 %v7042_v37 }
 0x39b   :  { %6894 = vmatpush3.bf16.msra.mxu0 %v8391_v50 }
 0x39c   :  { %6895 = vmatprep.subr.bf16.mxu0 %v8393_v46  ;;  %6134 = vmatpush3.bf16.msra.mxu1 %v7043_v5 }
 0x39d   :  { %6135 = vmatprep.subr.bf16.mxu1 %v7044_v33 }
 0x39f   :  { %6896 = vmatpush3.bf16.msra.mxu0 %v8393_v46 }
 0x3a0   :  { %6897 = vmatprep.subr.bf16.mxu0 %v8395_v16  ;;  %6136 = vmatpush3.bf16.msra.mxu1 %v7045_v10 }
 0x3a1   :  { %6137 = vmatprep.subr.bf16.mxu1 %v7046_v55 }
 0x3a3   :  { %6898 = vmatpush3.bf16.msra.mxu0 %v8395_v16 }
 0x3a4   :  { %6959 = vmatprep.subr.msk.bf16.mxu0 %vm2243_vm4, %v8411_v28  ;;  %6138 = vmatpush3.bf16.msra.mxu1 %v7047_v62  ;;  %v7084_v62 = vld [vmem:[#allocation9 + $0x128] sm:$0xff]  }
 0x3a5   :  { %6139 = vmatprep.subr.bf16.mxu1 %v7050_v30  ;;  %v7085_v30 = vld [vmem:[#allocation9 + $0x180] sm:$0xff]  }
 0x3a7   :  { %6900 = vmatpush3.bf16.msra.mxu0 %v8421_v43 }
 0x3a8   :  { %6159 = vmatprep.subr.bf16.mxu0 %v7048_v52  ;;  %6140 = vmatpush3.bf16.msra.mxu1 %v7051_v0  ;;  %v7086_v52 = vld [vmem:[#allocation9 + $0x170] sm:$0xff]   ;;  %v7087_v0 = vld [vmem:[#allocation9 + $0x1c8] sm:$0xff]  }
 0x3a9   :  { %6141 = vmatprep.subr.bf16.mxu1 %v7054_v48  ;;  %v7088_v48 = vld [vmem:[#allocation9 + $0x130] sm:$0xff]  }
 0x3aa   :  { %6902 = vmatmul.mubr.msk.bf16.vlgmr.msra.gmra.mrb[176].mxu0 %vm2236_vm3, %v7039_v17  ;;  %v7089_v17 = vld [vmem:[#allocation9 + $0x188] sm:$0xff]  }
 0x3ab   :  { %6160 = vmatpush3.bf16.msra.mxu0 %v7049_v38  ;;  %v7090_v38 = vld [vmem:[#allocation9 + $0x178] sm:$0xff]  }
 0x3ac   :  { %6161 = vmatprep.subr.bf16.mxu0 %v7052_v25  ;;  %6142 = vmatpush3.bf16.msra.mxu1 %v7055_v18  ;;  %v7091_v25 = vld [vmem:[#allocation9 + $0x1d0] sm:$0xff]   ;;  %v7092_v18 = vld [vmem:[#allocation9 + $0x138] sm:$0xff]  }
 0x3ad   :  { %6143 = vmatprep.subr.bf16.mxu1 %v7058_v4  ;;  %v7093_v4 = vld [vmem:[#allocation9 + $0x190] sm:$0xff]  }
 0x3af   :  { %6162 = vmatpush3.bf16.msra.mxu0 %v7053_v32  ;;  %v7099_v32 = vld [vmem:[#allocation9 + $0x200] sm:$0xff]  }
 0x3b0   :  { %6163 = vmatprep.subr.bf16.mxu0 %v7056_v58  ;;  %6144 = vmatpush3.bf16.msra.mxu1 %v7059_v56  ;;  %v7094_v58 = vld [vmem:[#allocation9 + $0x1d8] sm:$0xff]  }
 0x3b1   :  { %6145 = vmatprep.subr.bf16.mxu1 %v7062_v11  ;;  %v7095_v56 = vld [vmem:[#allocation9 + $0x198] sm:$0xff]  }
 0x3b3   :  { %6164 = vmatpush3.bf16.msra.mxu0 %v7057_v60  ;;  %v7096_v60 = vld [vmem:[#allocation9 + $0x1e0] sm:$0xff]  }
 0x3b4   :  { %6165 = vmatprep.subr.bf16.mxu0 %v7060_v63  ;;  %6146 = vmatpush3.bf16.msra.mxu1 %v7063_v3 }
 0x3b5   :  { %6187 = vmatprep.subr.bf16.mxu1 %v7067_v9 }
 0x3b7   :  { %6166 = vmatpush3.bf16.msra.mxu0 %v7061_v20 }
 0x3b8   :  { %6167 = vmatprep.subr.bf16.mxu0 %v7064_v22  ;;  %v7097_v22 = vld [vmem:[#allocation9 + $0x1a0] sm:$0xff]  }
 0x3bb   :  { %6168 = vmatpush3.bf16.msra.mxu0 %v7065_v13 }
 0x3bc   :  { %6169 = vmatprep.subr.bf16.mxu0 %v7066_v35  ;;  %v7098_v35 = vld [vmem:[#allocation9 + $0x1e8] sm:$0xff]  }
 0x3bf   :  { %6170 = vmatpush3.bf16.msra.mxu0 %v7068_v47 }
 0x3c0   :  { %6171 = vmatprep.subr.bf16.mxu0 %v7070_v40 }
 0x3c3   :  { %6172 = vmatpush3.bf16.msra.mxu0 %v7072_v1 }
 0x3c4   :  { %6173 = vmatprep.subr.bf16.mxu0 %v7074_v44 }
 0x3c7   :  { %6174 = vmatpush3.bf16.msra.mxu0 %v7076_v36 }
 0x3c8   :  { %6215 = vmatprep.subr.bf16.mxu0 %v7083_v27 }
 0x42d   :  { %v6805_v14 = vpop.f32.mrb[164].mxu1  ;;  %v6791_v31 = vpop.f32.mrb[160].mxu0 }
 0x42e   :  { %v2355_v15 = vpop.f32.mrb[165].mxu1  ;;  %v2281_v24 = vpop.f32.mrb[161].mxu0 }
 0x42f   :  { %v6806_v50 = vpop.f32.mrb[166].mxu1  ;;  %v6792_v46 = vpop.f32.mrb[162].mxu0 }
 0x430   :  { %v2938_v16 = vpack.c.bf16 %v6806_v50, %v6805_v14  ;;  %v2937_v26 = vpack.c.bf16 %v6792_v46, %v6791_v31  ;;  %v2358_v41 = vpop.f32.mrb[167].mxu1  ;;  %v2284_v29 = vpop.f32.mrb[163].mxu0  ;;  %v7100_v14 = vld [vmem:[#allocation9 + $0x1a8] sm:$0xff]   ;;  %v7105_v50 = vld [vmem:[#allocation9 + $0x210] sm:$0xff]   ;;  %v7104_v46 = vld [vmem:[#allocation9 + $0x1f8] sm:$0xff]  }
 0x431   :  { %v2929_v28 = vpack.c.bf16 %v2358_v41, %v2355_v15  ;;  %v2928_v43 = vpack.c.bf16 %v2284_v29, %v2281_v24  ;;  %v7102_v31 = vld [vmem:[#allocation9 + $0x208] sm:$0xff]   ;;  %v7101_v15 = vld [vmem:[#allocation9 + $0x1f0] sm:$0xff]   ;;  %v7108_v41 = vld [vmem:[#allocation9 + $0x220] sm:$0xff]  }
 0x432   :  { %v7103_v24 = vld [vmem:[#allocation9 + $0x1b0] sm:$0xff]  }
 0x433   :  { %3561 = vmatprep.mubr.bf16.mxu1 %v2929_v28 }
 0x434   :  { %3562 = vmatmul.mubr.bf16.vlgmr.msra.gmra.mrb[180].mxu1 %v2928_v43 }
 0x435   :  { %6188 = vmatpush3.bf16.msra.mxu1 %v7069_v23  ;;  %3569 = vmatprep.mubr.bf16.mxu1 %v2938_v16  ;;  %v7106_v16 = vld [vmem:[#allocation9 + $0x1b8] sm:$0xff]  }
 0x436   :  { %6189 = vmatprep.subr.bf16.mxu1 %v7071_v12  ;;  %v7109_v12 = vld [vmem:[#allocation9 + $0x228] sm:$0xff]  }
 0x439   :  { %6190 = vmatpush3.bf16.msra.mxu1 %v7073_v57 }
 0x43a   :  { %6191 = vmatprep.subr.bf16.mxu1 %v7075_v54 }
 0x43c   :  { %3570 = vmatmul.mubr.bf16.gmra.mrb[184].mxu1 %v2937_v26  ;;  %v7107_v26 = vld [vmem:[#allocation9 + $0x218] sm:$0xff]  }
 0x43d   :  { %6192 = vmatpush3.bf16.msra.mxu1 %v7077_v19 }
 0x43e   :  { %6193 = vmatprep.subr.bf16.mxu1 %v7078_v21 }
 0x441   :  { %v6833_v34 = vpop.f32.mrb[168].mxu1  ;;  %v6819_v42 = vpop.f32.mrb[164].mxu0  ;;  %6194 = vmatpush3.bf16.msra.mxu1 %v7079_v7 }
 0x442   :  { %v2503_v51 = vpop.f32.mrb[169].mxu1  ;;  %v2429_v53 = vpop.f32.mrb[165].mxu0  ;;  %6195 = vmatprep.subr.bf16.mxu1 %v7080_v39 }
 0x443   :  { %v6834_v61 = vpop.f32.mrb[170].mxu1  ;;  %v6820_v8 = vpop.f32.mrb[166].mxu0 }
 0x444   :  { %v2940_v59 = vpack.c.bf16 %v6834_v61, %v6833_v34  ;;  %v2939_v37 = vpack.c.bf16 %v6820_v8, %v6819_v42  ;;  %v2506_v5 = vpop.f32.mrb[171].mxu1  ;;  %v2432_v33 = vpop.f32.mrb[167].mxu0 }
 0x445   :  { %v2931_v10 = vpack.c.bf16 %v2506_v5, %v2503_v51  ;;  %v2930_v55 = vpack.c.bf16 %v2432_v33, %v2429_v53  ;;  %6196 = vmatpush3.bf16.msra.mxu1 %v7081_v45  ;;  %v7110_v45 = vld [vmem:[#allocation9 + $0x230] sm:$0xff]   ;;  %v7111_v51 = vld [vmem:[#allocation9 + $0x238] sm:$0xff]  }
 0x446   :  { %6197 = vmatprep.subr.bf16.mxu1 %v7082_v2 }
 0x447   :  { %3610 = vmatprep.mubr.bf16.mxu0 %v2931_v10 }
 0x448   :  { %3611 = vmatmul.mubr.bf16.vlgmr.msra.gmra.mrb[180].mxu0 %v2930_v55 }
 0x449   :  { %3618 = vmatprep.mubr.bf16.mxu0 %v2940_v59  ;;  %6198 = vmatpush3.bf16.msra.mxu1 %v7084_v62 }
 0x44a   :  { %6216 = vmatpush3.bf16.msra.mxu0 %v7085_v30  ;;  %6199 = vmatprep.subr.bf16.mxu1 %v7086_v52  ;;  %v7112_v30 = vld [vmem:[%s8720_s14] sm:$0xff]  }
 0x44b   :  { %6217 = vmatprep.subr.bf16.mxu0 %v7087_v0  ;;  %v7113_v0 = vld [vmem:[%s8720_s14 + $0x8] sm:$0xff]  }
 0x44d   :  { %6200 = vmatpush3.bf16.msra.mxu1 %v7088_v48 }
 0x44e   :  { %6218 = vmatpush3.bf16.msra.mxu0 %v7089_v17  ;;  %6201 = vmatprep.subr.bf16.mxu1 %v7090_v38  ;;  %v3870_v38 = vld [vmem:[%s8742_s22] sm:$0x3] }
 0x44f   :  { %6219 = vmatprep.subr.bf16.mxu0 %v7091_v25 }
 0x450   :  { %3619 = vmatmul.mubr.bf16.gmra.mrb[184].mxu0 %v2939_v37 }
 0x451   :  { %6202 = vmatpush3.bf16.msra.mxu1 %v7092_v18 }
 0x452   :  { %6220 = vmatpush3.bf16.msra.mxu0 %v7093_v4  ;;  %6905 = vmatprep.subr.bf16.mxu1 %v7099_v32  ;;  %v4236_v4 = vpack.c.bf16 %v3870_v38, %v3870_v38 }
 0x453   :  { %6221 = vmatprep.subr.bf16.mxu0 %v7094_v58 }
 0x455   :  { %v6861_v11 = vpop.f32.mrb[172].mxu1  ;;  %v6847_v63 = vpop.f32.mrb[168].mxu0 }
 0x456   :  { %v2651_v3 = vpop.f32.mrb[173].mxu1  ;;  %v2577_v20 = vpop.f32.mrb[169].mxu0  ;;  %6222 = vmatpush3.bf16.msra.mxu0 %v7095_v56  ;;  %v7114_v56 = vld [vmem:[#allocation11 + $0x40] sm:$0xff]  }
 0x457   :  { %v6862_v9 = vpop.f32.mrb[174].mxu1  ;;  %v6848_v13 = vpop.f32.mrb[170].mxu0  ;;  %6223 = vmatprep.subr.bf16.mxu0 %v7096_v60  ;;  %v7115_v60 = vld [vmem:[#allocation11] sm:$0xff]  }
 0x458   :  { %v2942_v47 = vpack.c.bf16 %v6862_v9, %v6861_v11  ;;  %v2941_v40 = vpack.c.bf16 %v6848_v13, %v6847_v63  ;;  %v2654_v1 = vpop.f32.mrb[175].mxu1  ;;  %v2580_v44 = vpop.f32.mrb[171].mxu0  ;;  %v7116_v11 = vld [vmem:[#allocation11 + $0xc0] sm:$0xff]   ;;  %v5732_v9 = vld [vmem:[%s8716_s10] ss:$0 sm:$0xff]  ;;  %v7121_v13 = vld [vmem:[#allocation11 + $0x88] sm:$0xff]  }
 0x459   :  { %v2933_v36 = vpack.c.bf16 %v2654_v1, %v2651_v3  ;;  %v2932_v27 = vpack.c.bf16 %v2580_v44, %v2577_v20  ;;  %v7117_v63 = vld [vmem:[#allocation11 + $0x80] sm:$0xff]   ;;  %v7118_v3 = vld [vmem:[#allocation11 + $0x48] sm:$0xff]   ;;  %v7123_v1 = vld [vmem:[#allocation11 + $0x10] sm:$0xff]  }
 0x45a   :  { %6224 = vmatpush3.bf16.msra.mxu0 %v7097_v22  ;;  %v7119_v20 = vld [vmem:[#allocation11 + $0x8] sm:$0xff]  }
 0x45b   :  { %3659 = vmatprep.mubr.bf16.mxu1 %v2933_v36  ;;  %6225 = vmatprep.subr.bf16.mxu0 %v7098_v35  ;;  %v7120_v22 = vld [vmem:[#allocation11 + $0xc8] sm:$0xff]  }
 0x45c   :  { %3660 = vmatmul.mubr.bf16.vlgmr.msra.gmra.mrb[188].mxu1 %v2932_v27 }
 0x45d   :  { %3667 = vmatprep.mubr.bf16.mxu1 %v2942_v47  ;;  %6906 = vmatpush3.bf16.msra.mxu1 %v7099_v32  ;;  %v7122_v47 = vld [vmem:[#allocation11 + $0x50] sm:$0xff]  }
 0x45e   :  { %6226 = vmatpush3.bf16.msra.mxu0 %v7100_v14  ;;  %6907 = vmatprep.subr.bf16.mxu1 %v7102_v31  ;;  %v7124_v14 = vld [vmem:[#allocation11 + $0xd0] sm:$0xff]  }
 0x45f   :  { %6227 = vmatprep.subr.bf16.mxu0 %v7101_v15  ;;  %v7125_v15 = vld [vmem:[#allocation11 + $0x90] sm:$0xff]  }
 0x461   :  { %6908 = vmatpush3.bf16.msra.mxu1 %v7102_v31 }
 0x462   :  { %6228 = vmatpush3.bf16.msra.mxu0 %v7103_v24  ;;  %6909 = vmatprep.subr.bf16.mxu1 %v7105_v50  ;;  %v7126_v24 = vld [vmem:[#allocation11 + $0x58] sm:$0xff]  }
 0x463   :  { %6229 = vmatprep.subr.bf16.mxu0 %v7104_v46 }
 0x464   :  { %3668 = vmatmul.mubr.bf16.gmra.mrb[192].mxu1 %v2941_v40 }
 0x465   :  { %6910 = vmatpush3.bf16.msra.mxu1 %v7105_v50  ;;  %v7127_v50 = vld [vmem:[#allocation11 + $0x18] sm:$0xff]  }
 0x466   :  { %6230 = vmatpush3.bf16.msra.mxu0 %v7106_v16  ;;  %6911 = vmatprep.subr.bf16.mxu1 %v7107_v26 }
 0x467   :  { %6925 = vmatprep.subr.bf16.mxu0 %v7409_v49 }
 0x469   :  { %v6889_v29 = vpop.f32.mrb[176].mxu1  ;;  %v6875_v28 = vpop.f32.mrb[172].mxu0  ;;  %6912 = vmatpush3.bf16.msra.mxu1 %v7107_v26 }
 0x46a   :  { %v2799_v43 = vpop.f32.mrb[177].mxu1  ;;  %v2725_v23 = vpop.f32.mrb[173].mxu0  ;;  %6913 = vmatprep.subr.bf16.mxu1 %v7108_v41 }
 0x46b   :  { %v6890_v57 = vpop.f32.mrb[178].mxu1  ;;  %v6876_v54 = vpop.f32.mrb[174].mxu0 }
 0x46c   :  { %v2944_v19 = vpack.c.bf16 %v6890_v57, %v6889_v29  ;;  %v2943_v21 = vpack.c.bf16 %v6876_v54, %v6875_v28  ;;  %v2802_v7 = vpop.f32.mrb[179].mxu1  ;;  %v2728_v39 = vpop.f32.mrb[175].mxu0  ;;  %v7130_v29 = vld [vmem:[#allocation11 + $0x60] sm:$0xff]   ;;  %v7129_v28 = vld [vmem:[#allocation11 + $0x98] sm:$0xff]   ;;  %v7134_v54 = vld [vmem:[#allocation11 + $0x68] sm:$0xff]  }
 0x46d   :  { %v2935_v34 = vpack.c.bf16 %v2802_v7, %v2799_v43  ;;  %v2934_v42 = vpack.c.bf16 %v2728_v39, %v2725_v23  ;;  %6914 = vmatpush3.bf16.msra.mxu1 %v7108_v41  ;;  %v7128_v41 = vld [vmem:[#allocation11 + $0xd8] sm:$0xff]   ;;  %v7132_v23 = vld [vmem:[#allocation11 + $0xe0] sm:$0xff]  }
 0x46e   :  { %6915 = vmatprep.subr.bf16.mxu1 %v7109_v12 }
 0x46f   :  { %3708 = vmatprep.mubr.bf16.mxu0 %v2935_v34 }
 0x470   :  { %3709 = vmatmul.mubr.bf16.vlgmr.msra.gmra.mrb[188].mxu0 %v2934_v42  ;;  %v7136_v42 = vld [vmem:[#allocation11 + $0xe8] sm:$0xff]  }
 0x471   :  { %3716 = vmatprep.mubr.bf16.mxu0 %v2944_v19  ;;  %6916 = vmatpush3.bf16.msra.mxu1 %v7109_v12  ;;  %v7131_v12 = vld [vmem:[#allocation11 + $0x20] sm:$0xff]  }
 0x472   :  { %6917 = vmatprep.subr.bf16.mxu1 %v7110_v45  ;;  %6926 = vmatpush3.bf16.msra.mxu0 %v7112_v30  ;;  %v7143_v30 = vld [vmem:[#allocation11 + $0x38] sm:$0xff]  }
 0x473   :  { %6927 = vmatprep.subr.bf16.mxu0 %v7409_v49 }
 0x475   :  { %6918 = vmatpush3.bf16.msra.mxu1 %v7110_v45 }
 0x476   :  { %6919 = vmatprep.subr.bf16.mxu1 %v7111_v51  ;;  %6928 = vmatpush3.bf16.msra.mxu0 %v7113_v0 }
 0x477   :  { %6256 = vmatprep.subr.bf16.mxu0 %v7114_v56  ;;  %v7149_v56 = vld [vmem:[#allocation11 + $0x1c0] sm:$0xff]  }
 0x478   :  { %3717 = vmatmul.mubr.bf16.gmra.mrb[192].mxu0 %v2943_v21  ;;  %v7133_v21 = vld [vmem:[#allocation11 + $0xa0] sm:$0xff]  }
 0x479   :  { %6920 = vmatpush3.bf16.msra.mxu1 %v7111_v51  ;;  %6929 = vmatprep.mubr.msk.bf16.mxu0 %vm7410_vm2, %v7409_v49  ;;  %v7135_v51 = vld [vmem:[#allocation11 + $0x28] sm:$0xff]  }
 0x47a   :  { %6278 = vmatprep.subr.bf16.mxu1 %v7116_v11 }
 0x47d   :  { %v6903_v53 = vpop.f32.mrb[176].mxu0 }
 0x47e   :  { %v2873_v2 = vpop.f32.mrb[177].mxu0 }
 0x47f   :  { %v6904_v61 = vpop.f32.mrb[178].mxu0 }
 0x480   :  { %v2945_v8 = vpack.c.bf16 %v6904_v61, %v6903_v53  ;;  %v2876_v59 = vpop.f32.mrb[179].mxu0  ;;  %6930 = vmatmul.mubr.msk.bf16.vlgmr.msra.gmra.mrb[196].mxu0 %vm4253_vm5, %v4236_v4 }
 0x481   :  { %v2936_v37 = vpack.c.bf16 %v2876_v59, %v2873_v2  ;;  %6257 = vmatpush3.bf16.msra.mxu0 %v7115_v60  ;;  %v7137_v59 = vld [vmem:[#allocation11 + $0xa8] sm:$0xff]  }
 0x482   :  { %6258 = vmatprep.subr.bf16.mxu0 %v7118_v3 }
 0x483   :  { %6921 = vmatprep.mubr.bf16.mxu1 %v2936_v37 }
 0x484   :  { %6922 = vmatmul.mubr.bf16.vlgmr.msra.gmra.mrb[196].mxu1 %v2945_v8  ;;  %v7138_v8 = vld [vmem:[#allocation11 + $0x70] sm:$0xff]  }
 0x485   :  { %6279 = vmatpush3.bf16.msra.mxu1 %v7117_v63  ;;  %6259 = vmatpush3.bf16.msra.mxu0 %v7119_v20 }
 0x486   :  { %6280 = vmatprep.subr.bf16.mxu1 %v7120_v22  ;;  %6260 = vmatprep.subr.bf16.mxu0 %v7122_v47 }
 0x489   :  { %6281 = vmatpush3.bf16.msra.mxu1 %v7121_v13  ;;  %6261 = vmatpush3.bf16.msra.mxu0 %v7123_v1 }
 0x48a   :  { %6282 = vmatprep.subr.bf16.mxu1 %v7124_v14  ;;  %6262 = vmatprep.subr.bf16.mxu0 %v7126_v24 }
 0x48d   :  { %6283 = vmatpush3.bf16.msra.mxu1 %v7125_v15  ;;  %6263 = vmatpush3.bf16.msra.mxu0 %v7127_v50 }
 0x48e   :  { %6284 = vmatprep.subr.bf16.mxu1 %v7128_v41  ;;  %6264 = vmatprep.subr.bf16.mxu0 %v7130_v29 }
 0x491   :  { %6285 = vmatpush3.bf16.msra.mxu1 %v7129_v28  ;;  %6265 = vmatpush3.bf16.msra.mxu0 %v7131_v12 }
 0x492   :  { %6286 = vmatprep.subr.bf16.mxu1 %v7132_v23  ;;  %6266 = vmatprep.subr.bf16.mxu0 %v7134_v54 }
 0x495   :  { %6287 = vmatpush3.bf16.msra.mxu1 %v7133_v21  ;;  %6267 = vmatpush3.bf16.msra.mxu0 %v7135_v51 }
 0x496   :  { %6288 = vmatprep.subr.bf16.mxu1 %v7136_v42  ;;  %6268 = vmatprep.subr.bf16.mxu0 %v7138_v8 }
 0x499   :  { %6289 = vmatpush3.bf16.msra.mxu1 %v7137_v59 }
 0x507   :  { %v6147_v5 = vpop.f32.mrb[180].mxu1 }
 0x508   :  { %v6148_v33 = vpop.f32.mrb[181].mxu1 }
 0x509   :  { %v6149_v10 = vadd.f32 %v6148_v33, %v6147_v5  ;;  %v6150_v55 = vpop.f32.mrb[182].mxu1  ;;  %v7140_v5 = vld [vmem:[#allocation11 + $0xf0] sm:$0xff]  }
 0x50a   :  { %v6151_v62 = vpop.f32.mrb[183].mxu1  ;;  %v7139_v33 = vld [vmem:[#allocation11 + $0x30] sm:$0xff]   ;;  %6290 = vmatprep.subr.bf16.mxu1 %v7140_v5 }
 0x50b   :  { %v6152_v52 = vadd.f32 %v6151_v62, %v6150_v55  ;;  %v3564_v44 = vadd.f32 %v6149_v10, %v5732_v9  ;;  %v7142_v10 = vld [vmem:[#allocation11 + $0x78] sm:$0xff]   ;;  %v7141_v55 = vld [vmem:[#allocation11 + $0xb0] sm:$0xff]   ;;  %6269 = vmatpush3.bf16.msra.mxu0 %v7139_v33 }
 0x50c   :  { %v7144_v62 = vld [vmem:[#allocation11 + $0xf8] sm:$0xff]   ;;  %6270 = vmatprep.subr.bf16.mxu0 %v7142_v10  ;;  %6291 = vmatpush3.bf16.msra.mxu1 %v7141_v55 }
 0x50d   :  { %v3567_v46 = vadd.f32 %v6152_v52, %v5732_v9  ;;  %6292 = vmatprep.subr.bf16.mxu1 %v7144_v62 }
 0x50f   :  { %v6153_v48 = vpop.f32.mrb[184].mxu1  ;;  %6271 = vmatpush3.bf16.msra.mxu0 %v7143_v30 }
 0x510   :  { %v6154_v17 = vpop.f32.mrb[185].mxu1 }
 0x511   :  { %v6155_v25 = vadd.f32 %v6154_v17, %v6153_v48  ;;  %v6156_v18 = vpop.f32.mrb[186].mxu1  ;;  %v7145_v48 = vld [vmem:[#allocation11 + $0xb8] sm:$0xff]  }
 0x512   :  { %v6157_v32 = vpop.f32.mrb[187].mxu1  ;;  %6293 = vmatpush3.bf16.msra.mxu1 %v7145_v48 }
 0x513   :  { %v6158_v58 = vadd.f32 %v6157_v32, %v6156_v18  ;;  %v3572_v7 = vadd.f32 %v6155_v25, %v5732_v9  ;;  %v7146_v32 = vld [vmem:[#allocation11 + $0x140] sm:$0xff]   ;;  %6322 = vmatprep.subr.bf16.mxu1 %v7149_v56 }
 0x514   :  { %6300 = vmatprep.subr.bf16.mxu0 %v7146_v32 }
 0x515   :  { %v3575_v53 = vadd.f32 %v6158_v58, %v5732_v9 }
 0x51b   :  { %v6175_v35 = vpop.f32.mrb[180].mxu0 }
 0x51c   :  { %v6176_v40 = vpop.f32.mrb[181].mxu0 }
 0x51d   :  { %v6177_v36 = vadd.f32 %v6176_v40, %v6175_v35  ;;  %v6178_v27 = vpop.f32.mrb[182].mxu0 }
 0x51e   :  { %v6179_v31 = vpop.f32.mrb[183].mxu0 }
 0x51f   :  { %v3613_v16 = vadd.f32 %v6177_v36, %v3564_v44  ;;  %v6180_v26 = vadd.f32 %v6179_v31, %v6178_v27 }
 0x521   :  { %v3616_v43 = vadd.f32 %v6180_v26, %v3567_v46 }
 0x523   :  { %v6181_v57 = vpop.f32.mrb[184].mxu0 }
 0x524   :  { %v6182_v19 = vpop.f32.mrb[185].mxu0 }
 0x525   :  { %v6183_v39 = vadd.f32 %v6182_v19, %v6181_v57  ;;  %v6184_v34 = vpop.f32.mrb[186].mxu0 }
 0x526   :  { %v6185_v45 = vpop.f32.mrb[187].mxu0 }
 0x527   :  { %v3621_v2 = vadd.f32 %v6183_v39, %v3572_v7  ;;  %v6186_v61 = vadd.f32 %v6185_v45, %v6184_v34 }
 0x529   :  { %v3624_v37 = vadd.f32 %v6186_v61, %v3575_v53 }
 0x52f   :  { %v6203_v52 = vpop.f32.mrb[188].mxu1 }
 0x530   :  { %v6204_v0 = vpop.f32.mrb[189].mxu1 }
 0x531   :  { %v6205_v17 = vadd.f32 %v6204_v0, %v6203_v52  ;;  %v6206_v38 = vpop.f32.mrb[190].mxu1 }
 0x532   :  { %v6207_v25 = vpop.f32.mrb[191].mxu1 }
 0x533   :  { %v3662_v18 = vadd.f32 %v6205_v17, %v3613_v16  ;;  %v6208_v4 = vadd.f32 %v6207_v25, %v6206_v38 }
 0x535   :  { %v3665_v58 = vadd.f32 %v6208_v4, %v3616_v43 }
 0x537   :  { %v6209_v60 = vpop.f32.mrb[192].mxu1 }
 0x538   :  { %v6210_v11 = vpop.f32.mrb[193].mxu1 }
 0x539   :  { %v6211_v63 = vadd.f32 %v6210_v11, %v6209_v60  ;;  %v6212_v3 = vpop.f32.mrb[194].mxu1  ;;  %v5805_v60 = vld [vmem:[%s8717_s11] ss:$0 sm:$0xff] }
 0x53a   :  { %v6213_v20 = vpop.f32.mrb[195].mxu1 }
 0x53b   :  { %v3670_v22 = vadd.f32 %v6211_v63, %v3621_v2  ;;  %v6214_v9 = vadd.f32 %v6213_v20, %v6212_v3 }
 0x53d   :  { %v3673_v13 = vadd.f32 %v6214_v9, %v3624_v37 }
 0x543   :  { %v6231_v35 = vpop.f32.mrb[188].mxu0 }
 0x544   :  { %v6232_v47 = vpop.f32.mrb[189].mxu0 }
 0x545   :  { %v6233_v40 = vadd.f32 %v6232_v47, %v6231_v35  ;;  %v6234_v1 = vpop.f32.mrb[190].mxu0 }
 0x546   :  { %v6235_v44 = vpop.f32.mrb[191].mxu0 }
 0x547   :  { %v6236_v36 = vadd.f32 %v6235_v44, %v6234_v1  ;;  %v3711_v27 = vadd.f32 %v6233_v40, %v3662_v18 }
 0x549   :  { %v3714_v14 = vadd.f32 %v6236_v36, %v3665_v58 }
 0x54b   :  { %v6237_v31 = vpop.f32.mrb[192].mxu0 }
 0x54c   :  { %v6238_v15 = vpop.f32.mrb[193].mxu0 }
 0x54d   :  { %v6239_v24 = vadd.f32 %v6238_v15, %v6237_v31  ;;  %v6240_v50 = vpop.f32.mrb[194].mxu0 }
 0x54e   :  { %v6241_v46 = vpop.f32.mrb[195].mxu0 }
 0x54f   :  { %v6242_v16 = vadd.f32 %v6241_v46, %v6240_v50  ;;  %v3719_v26 = vadd.f32 %v6239_v24, %v3670_v22  ;;  %v5806_v22 = vld [vmem:[%s8718_s12] ss:$0 sm:$0xff] }
 0x551   :  { %v3722_v41 = vadd.f32 %v6242_v16, %v3673_v13 }
 0x557   :  { %v6923_v29 = vpop.f32.mrb[196].mxu1 }
 0x558   :  { %v3768_v28 = vadd.f32 %v6923_v29, %v3719_v26  ;;  %v3759_v43 = vpop.f32.mrb[197].mxu1 }
 0x559   :  { %v3760_v23 = vadd.f32 %v3759_v43, %v3711_v27  ;;  %v6924_v12 = vpop.f32.mrb[198].mxu1 }
 0x55a   :  { %v3771_v57 = vadd.f32 %v6924_v12, %v3722_v41  ;;  %v3762_v54 = vpop.f32.mrb[199].mxu1 }
 0x55b   :  { %v3763_v19 = vadd.f32 %v3762_v54, %v3714_v14 }
 0x55d   :  { %v3776_v21 = vadd.f32 %v3763_v19, %v3760_v23 }
 0x55f   :  { %v3777_v7 = vadd.f32 %v3776_v21, %v3768_v28 }
 0x561   :  { %v3778_v39 = vadd.f32 %v3777_v7, %v3771_v57  ;;  %v7147_v7 = vld [vmem:[#allocation11 + $0x100] sm:$0xff]  }
 0x563   :  { %v3779_v34 = vrot.slane %v3778_v39, 4 }
 0x565   :  { %v3780_v42 = vadd.f32 %v3779_v34, %v3778_v39 }
 0x567   :  { %v3781_v45 = vrot.slane %v3780_v42, 2 }
 0x569   :  { %v3782_v51 = vadd.f32 %v3781_v45, %v3780_v42 }
 0x56b   :  { %v3783_v53 = vrot.slane %v3782_v51, 1 }
 0x56d   :  { %v3784_v2 = vadd.f32 %v3783_v53, %v3782_v51  ;;  %v7150_v51 = vld [vmem:[#allocation11 + $0x180] sm:$0xff]   ;;  %v7151_v53 = vld [vmem:[#allocation11 + $0x148] sm:$0xff]  }
 0x56f   :  { %v3785_v61 = vmul.f32 0.03125, %v3784_v2 }
 0x571   :  { %v3786_v8 = vsub.f32 %v3760_v23, %v3785_v61  ;;  %v3787_v59 = vsub.f32 %v3763_v19, %v3785_v61  ;;  %v3788_v37 = vsub.f32 %v3768_v28, %v3785_v61  ;;  %v3789_v5 = vsub.f32 %v3771_v57, %v3785_v61 }
 0x573   :  { %v3790_v33 = vmul.f32 %v3786_v8, %v3786_v8  ;;  %v3791_v10 = vmul.f32 %v3787_v59, %v3787_v59  ;;  %v3792_v55 = vmul.f32 %v3788_v37, %v3788_v37  ;;  %v3793_v30 = vmul.f32 %v3789_v5, %v3789_v5 }
 0x575   :  { %v3794_v62 = vadd.f32 %v3791_v10, %v3790_v33  ;;  %v7155_v33 = vld [vmem:[#allocation11 + $0x188] sm:$0xff]   ;;  %v7158_v10 = vld [vmem:[#allocation11 + $0x1d0] sm:$0xff]  }
 0x577   :  { %v3795_v52 = vadd.f32 %v3794_v62, %v3792_v55  ;;  %v7157_v55 = vld [vmem:[#allocation11 + $0x110] sm:$0xff]   ;;  %v7160_v62 = vld [vmem:[#allocation11 + $0x158] sm:$0xff]  }
 0x579   :  { %v3796_v0 = vadd.f32 %v3795_v52, %v3793_v30  ;;  %v7159_v30 = vld [vmem:[#allocation11 + $0x190] sm:$0xff]   ;;  %v7162_v52 = vld [vmem:[#allocation11 + $0x1d8] sm:$0xff]  }
 0x57b   :  { %v3797_v48 = vrot.slane %v3796_v0, 4 }
 0x57d   :  { %v3798_v17 = vadd.f32 %v3797_v48, %v3796_v0  ;;  %v7161_v0 = vld [vmem:[#allocation11 + $0x118] sm:$0xff]   ;;  %v7164_v48 = vld [vmem:[#allocation11 + $0x160] sm:$0xff]  }
 0x57f   :  { %v3799_v38 = vrot.slane %v3798_v17, 2 }
 0x581   :  { %v3800_v25 = vadd.f32 %v3799_v38, %v3798_v17  ;;  %v7163_v17 = vld [vmem:[#allocation11 + $0x198] sm:$0xff]   ;;  %v7166_v38 = vld [vmem:[#allocation11 + $0x1e0] sm:$0xff]  }
 0x583   :  { %v3801_v18 = vrot.slane %v3800_v25, 1 }
 0x585   :  { %v3802_v4 = vadd.f32 %v3801_v18, %v3800_v25  ;;  %v7165_v25 = vld [vmem:[#allocation11 + $0x120] sm:$0xff]   ;;  %v7168_v18 = vld [vmem:[#allocation11 + $0x168] sm:$0xff]  }
 0x587   :  { %v3803_v32 = vmul.f32 0.03125, %v3802_v4  ;;  %v7167_v4 = vld [vmem:[#allocation11 + $0x1a0] sm:$0xff]  }
 0x589   :  { %v3804_v58 = vadd.f32 1e-05, %v3803_v32  ;;  %v7170_v32 = vld [vmem:[#allocation11 + $0x1e8] sm:$0xff]  }
 0x58b   :  { %7248 = vrsqrt.f32 %v3804_v58  ;;  %v7169_v58 = vld [vmem:[#allocation11 + $0x128] sm:$0xff]  }
 0x595   :  { %v7249_v56 = vpop.eup %7248 }
 0x596   :  { %v3806_v11 = vmul.f32 %v7249_v56, %v3786_v8  ;;  %v3807_v63 = vmul.f32 %v7249_v56, %v3787_v59  ;;  %v3808_v3 = vmul.f32 %v7249_v56, %v3788_v37  ;;  %v3809_v20 = vmul.f32 %v7249_v56, %v3789_v5  ;;  %v7154_v8 = vld [vmem:[#allocation11 + $0x1c8] sm:$0xff]   ;;  %v7156_v5 = vld [vmem:[#allocation11 + $0x150] sm:$0xff]  }
 0x597   :  { %v7153_v59 = vld [vmem:[#allocation11 + $0x108] sm:$0xff]   ;;  %v7172_v56 = vld [vmem:[#allocation11 + $0x170] sm:$0xff]  }
 0x598   :  { %v3816_v9 = vmul.f32 %v5805_v60, %v3806_v11  ;;  %v3817_v13 = vmul.f32 %v5805_v60, %v3807_v63  ;;  %v3818_v35 = vmul.f32 %v5805_v60, %v3808_v3  ;;  %v3819_v47 = vmul.f32 %v5805_v60, %v3809_v20  ;;  %v7171_v11 = vld [vmem:[#allocation11 + $0x1a8] sm:$0xff]   ;;  %v7174_v63 = vld [vmem:[#allocation11 + $0x1f0] sm:$0xff]  }
 0x599   :  { %v7173_v3 = vld [vmem:[#allocation11 + $0x130] sm:$0xff]  }
 0x59a   :  { %v3826_v40 = vadd.f32 %v5806_v22, %v3816_v9  ;;  %v3827_v1 = vadd.f32 %v5806_v22, %v3817_v13  ;;  %v3828_v44 = vadd.f32 %v5806_v22, %v3818_v35  ;;  %v3829_v36 = vadd.f32 %v5806_v22, %v3819_v47  ;;  %v7176_v22 = vld [vmem:[#allocation11 + $0x178] sm:$0xff]   ;;  %v7175_v9 = vld [vmem:[#allocation11 + $0x1b0] sm:$0xff]  }
 0x59b   :  { %v7178_v35 = vld [vmem:[#allocation11 + $0x1f8] sm:$0xff]  }
 0x59c   :  { %v3830_v27 = vmax.f32 %v3826_v40, 0.0  ;;  %v3831_v14 = vmax.f32 %v3827_v1, 0.0  ;;  %v3832_v31 = vmax.f32 %v3828_v44, 0.0  ;;  %v3833_v15 = vmax.f32 %v3829_v36, 0.0  ;;  %v7177_v47 = vld [vmem:[#allocation11 + $0x138] sm:$0xff]   ;;  %v7180_v1 = vld [vmem:[#allocation11 + $0x240] sm:$0xff]  }
 0x59d   :  { %v7179_v44 = vld [vmem:[#allocation11 + $0x1b8] sm:$0xff]  }
 0x59e   :  { %3834 = vst [vmem:[#allocation4] sm:$0xff] %v3830_v27  ;;  %3835 = vst [vmem:[#allocation4 + $0x8] sm:$0xff] %v3831_v14  ;;  %v7182_v27 = vld [vmem:[#allocation11 + $0x2c0] sm:$0xff]  }
 0x59f   :  { %3836 = vst [vmem:[#allocation4 + $0x10] sm:$0xff] %v3832_v31  ;;  %3837 = vst [vmem:[#allocation4 + $0x18] sm:$0xff] %v3833_v15  ;;  %v7181_v14 = vld [vmem:[#allocation11 + $0x200] sm:$0xff]  }
 0x5a5   :  { %v3838_v24 = vld [vmem:[#allocation4] sm:$0xff]   ;;  %v3846_v50 = vld [vmem:[#allocation4 + $0x8] sm:$0xff]  }
 0x5a6   :  { %v3854_v46 = vld [vmem:[#allocation4 + $0x10] sm:$0xff]   ;;  %3839 = vst [vmem:[#allocation5] sm:$0xff] %v3838_v24   ;;  %3847 = vst [vmem:[#allocation5 + $0x8] sm:$0xff] %v3846_v50   ;;  %v3862_v16 = vld [vmem:[#allocation4 + $0x18] sm:$0xff]  }
 0x5a7   :  { %3855 = vst [vmem:[#allocation5 + $0x10] sm:$0xff] %v3854_v46   ;;  %3863 = vst [vmem:[#allocation5 + $0x18] sm:$0xff] %v3862_v16   ;;  %v7185_v24 = vld [vmem:[#allocation11 + $0x248] sm:$0xff]   ;;  %v7183_v46 = vld [vmem:[#allocation11 + $0x280] sm:$0xff]  }
 0x5ad   :  { %v3872_v26 = vld [vmem:[#allocation5] sm:$0xff]  ;;  %v3873_v41 = vld [vmem:[#allocation5 + $0x8] sm:$0xff] }
 0x5ae   :  { %v3887_v29 = vrot.slane %v3872_v26, %v7576_v6  ;;  %v3880_v28 = vcombine.high %v3872_v26, %v3872_v26  ;;  %v8591_v43 = vrot.slane %v3873_v41, %v7576_v6  ;;  %v3897_v23 = vcombine.high %v3873_v41, %v3873_v41  ;;  %v3874_v60 = vld [vmem:[#allocation5 + $0x10] sm:$0xff] }
 0x5af   :  { %v3914_v20 = vcombine.high %v3874_v60, %v3874_v60  ;;  %v8602_v13 = vrot.slane %v3874_v60, %v7576_v6  ;;  %v7187_v26 = vld [vmem:[#allocation11 + $0x2c8] sm:$0xff]  }
 0x5b0   :  { %v3895_v12 = vcombine.high %v3887_v29, %v3887_v29  ;;  %v3894_v57 = vrot.slane %v3880_v28, %v7576_v6  ;;  %v3912_v54 = vcombine.high %v8591_v43, %v8591_v43  ;;  %v8597_v19 = vrot.slane %v3897_v23, %v7576_v6  ;;  %v7189_v28 = vld [vmem:[#allocation11 + $0x250] sm:$0xff]  }
 0x5b1   :  { %v3964_v34 = vpack.c.bf16 %v3887_v29, %v3887_v29  ;;  %v8605_v40 = vrot.slane %v3914_v20, %v7576_v6  ;;  %v3929_v36 = vcombine.high %v8602_v13, %v8602_v13  ;;  %v3968_v15 = vpack.c.bf16 %v8591_v43, %v8591_v43  ;;  %v7186_v29 = vld [vmem:[#allocation11 + $0x208] sm:$0xff]   ;;  %v7191_v23 = vld [vmem:[#allocation11 + $0x2d0] sm:$0xff]  }
 0x5b2   :  { %v3965_v21 = vpack.c.bf16 %v3895_v12, %v3895_v12  ;;  %v3896_v39 = vcombine.high %v3894_v57, %v3894_v57  ;;  %v3913_v42 = vcombine.high %v8597_v19, %v8597_v19  ;;  %v3969_v2 = vpack.c.bf16 %v3912_v54, %v3912_v54  ;;  %v7188_v43 = vld [vmem:[#allocation11 + $0x288] sm:$0xff]   ;;  %v7190_v12 = vld [vmem:[#allocation11 + $0x210] sm:$0xff]  }
 0x5b3   :  { %v3966_v61 = vpack.c.bf16 %v3894_v57, %v3894_v57  ;;  %v3930_v31 = vcombine.high %v8605_v40, %v8605_v40  ;;  %v3973_v50 = vpack.c.bf16 %v3929_v36, %v3929_v36  ;;  %v3970_v16 = vpack.c.bf16 %v8597_v19, %v8597_v19  ;;  %v7193_v57 = vld [vmem:[#allocation11 + $0x258] sm:$0xff]   ;;  %v7192_v54 = vld [vmem:[#allocation11 + $0x290] sm:$0xff]  }
 0x5b4   :  { %5097 = vmatprep.mubr.bf16.mxu0 %v3965_v21  ;;  %v3967_v45 = vpack.c.bf16 %v3896_v39, %v3896_v39  ;;  %v3971_v37 = vpack.c.bf16 %v3913_v42, %v3913_v42  ;;  %v7195_v19 = vld [vmem:[#allocation11 + $0x2d8] sm:$0xff]   ;;  %v7198_v42 = vld [vmem:[#allocation11 + $0x220] sm:$0xff]   ;;  %v3974_v20 = vpack.c.bf16 %v8605_v40, %v8605_v40  ;;  %v7225_v40 = vld [vmem:[#allocation11 + $0x390] sm:$0xff]  }
 0x5b5   :  { %5098 = vmatmul.mubr.bf16.vlgmr.msra.gmra.mrb[200].mxu0 %v3964_v34  ;;  %v3975_v41 = vpack.c.bf16 %v3930_v31, %v3930_v31  ;;  %v7194_v21 = vld [vmem:[#allocation11 + $0x218] sm:$0xff]   ;;  %v7199_v34 = vld [vmem:[#allocation11 + $0x2e0] sm:$0xff]  }
 0x5b6   :  { %6301 = vmatpush3.bf16.msra.mxu0 %v7147_v7  ;;  %5137 = vmatprep.mubr.bf16.mxu1 %v3967_v45  ;;  %v7197_v7 = vld [vmem:[#allocation11 + $0x260] sm:$0xff]   ;;  %v7196_v39 = vld [vmem:[#allocation11 + $0x298] sm:$0xff]   ;;  %v7201_v45 = vld [vmem:[#allocation11 + $0x268] sm:$0xff]  }
 0x5b7   :  { %5177 = vmatprep.mubr.bf16.mxu0 %v3969_v2  ;;  %5138 = vmatmul.mubr.bf16.vlgmr.msra.gmra.mrb[200].mxu1 %v3966_v61  ;;  %v7202_v2 = vld [vmem:[#allocation11 + $0x228] sm:$0xff]   ;;  %v8615_v61 = vpop.f32.mrb[196].mxu0  ;;  %v7226_v36 = vld [vmem:[#allocation11 + $0x358] sm:$0xff]   ;;  %v7230_v31 = vld [vmem:[#allocation11 + $0x360] sm:$0xff]  }
 0x5b8   :  { %6323 = vmatpush3.bf16.msra.mxu1 %v7150_v51  ;;  %6302 = vmatprep.subr.bf16.mxu0 %v7151_v53  ;;  %v7200_v51 = vld [vmem:[#allocation11 + $0x2a0] sm:$0xff]   ;;  %v7203_v53 = vld [vmem:[#allocation11 + $0x2e8] sm:$0xff]  }
 0x5b9   :  { %5217 = vmatprep.mubr.bf16.mxu1 %v3971_v37  ;;  %6324 = vmatprep.subr.bf16.mxu1 %v7154_v8  ;;  %v7205_v8 = vld [vmem:[#allocation11 + $0x270] sm:$0xff]   ;;  %v6931_v37 = vpop.f32.mrb[197].mxu0 }
 0x5ba   :  { %6303 = vmatpush3.bf16.msra.mxu0 %v7153_v59  ;;  %v3875_v59 = vld [vmem:[#allocation5 + $0x18] sm:$0xff] }
 0x5bb   :  { %6304 = vmatprep.subr.bf16.mxu0 %v7156_v5  ;;  %v7204_v5 = vld [vmem:[#allocation11 + $0x2a8] sm:$0xff]  }
 0x5bc   :  { %6325 = vmatpush3.bf16.msra.mxu1 %v7155_v33  ;;  %v4294_v33 = vpop.f32.mrb[198].mxu0 }
 0x5bd   :  { %6326 = vmatprep.subr.bf16.mxu1 %v7158_v10  ;;  %v7207_v10 = vld [vmem:[#allocation11 + $0x2f0] sm:$0xff]  }
 0x5be   :  { %6305 = vmatpush3.bf16.msra.mxu0 %v7157_v55  ;;  %v6932_v55 = vpop.f32.mrb[199].mxu0 }
 0x5bf   :  { %6306 = vmatprep.subr.bf16.mxu0 %v7160_v62  ;;  %v7206_v62 = vld [vmem:[#allocation11 + $0x230] sm:$0xff]  }
 0x5c0   :  { %6327 = vmatpush3.bf16.msra.mxu1 %v7159_v30  ;;  %v3931_v30 = vcombine.high %v3875_v59, %v3875_v59 }
 0x5c1   :  { %6328 = vmatprep.subr.bf16.mxu1 %v7162_v52  ;;  %v7209_v52 = vld [vmem:[#allocation11 + $0x278] sm:$0xff]  }
 0x5c2   :  { %6307 = vmatpush3.bf16.msra.mxu0 %v7161_v0  ;;  %v7208_v0 = vld [vmem:[#allocation11 + $0x2b0] sm:$0xff]  }
 0x5c3   :  { %6308 = vmatprep.subr.bf16.mxu0 %v7164_v48  ;;  %v8618_v48 = vrot.slane %v3875_v59, %v7576_v6 }
 0x5c4   :  { %6329 = vmatpush3.bf16.msra.mxu1 %v7163_v17  ;;  %v7211_v17 = vld [vmem:[#allocation11 + $0x2f8] sm:$0xff]  }
 0x5c5   :  { %6330 = vmatprep.subr.bf16.mxu1 %v7166_v38  ;;  %v7210_v38 = vld [vmem:[#allocation11 + $0x238] sm:$0xff]  }
 0x5c6   :  { %6309 = vmatpush3.bf16.msra.mxu0 %v7165_v25  ;;  %v8621_v25 = vrot.slane %v3931_v30, %v7576_v6  ;;  %v7218_v6 = vld [vmem:[#allocation11 + $0x348] sm:$0xff]  }
 0x5c7   :  { %6310 = vmatprep.subr.bf16.mxu0 %v7168_v18  ;;  %v7213_v18 = vld [vmem:[#allocation11 + $0x340] sm:$0xff]  }
 0x5c8   :  { %6331 = vmatpush3.bf16.msra.mxu1 %v7167_v4  ;;  %v7212_v4 = vld [vmem:[#allocation11 + $0x2b8] sm:$0xff]   ;;  %v3947_v60 = vcombine.high %v8621_v25, %v8621_v25 }
 0x5c9   :  { %6332 = vmatprep.subr.bf16.mxu1 %v7170_v32  ;;  %v3946_v32 = vcombine.high %v8618_v48, %v8618_v48 }
 0x5ca   :  { %6311 = vmatpush3.bf16.msra.mxu0 %v7169_v58  ;;  %v7215_v58 = vld [vmem:[#allocation11 + $0x3c0] sm:$0xff]  }
 0x5cb   :  { %6312 = vmatprep.subr.bf16.mxu0 %v7172_v56  ;;  %v7214_v56 = vld [vmem:[#allocation11 + $0x300] sm:$0xff]  }
 0x5cc   :  { %6333 = vmatpush3.bf16.msra.mxu1 %v7171_v11  ;;  %v3972_v11 = vpack.c.bf16 %v8602_v13, %v8602_v13  ;;  %v7221_v13 = vld [vmem:[#allocation11 + $0x388] sm:$0xff]  }
 0x5cd   :  { %6334 = vmatprep.subr.bf16.mxu1 %v7174_v63  ;;  %v3977_v63 = vpack.c.bf16 %v3946_v32, %v3946_v32 }
 0x5ce   :  { %6313 = vmatpush3.bf16.msra.mxu0 %v7173_v3  ;;  %v7216_v3 = vld [vmem:[#allocation11 + $0x380] sm:$0xff]  }
 0x5cf   :  { %6314 = vmatprep.subr.bf16.mxu0 %v7176_v22  ;;  %v7220_v22 = vld [vmem:[#allocation11 + $0x3c8] sm:$0xff]  }
 0x5d0   :  { %6335 = vmatpush3.bf16.msra.mxu1 %v7175_v9  ;;  %v3979_v9 = vpack.c.bf16 %v3947_v60, %v3947_v60 }
 0x5d1   :  { %6336 = vmatprep.subr.bf16.mxu1 %v7178_v35  ;;  %v7219_v35 = vld [vmem:[#allocation11 + $0x308] sm:$0xff]  }
 0x5d2   :  { %6315 = vmatpush3.bf16.msra.mxu0 %v7177_v47  ;;  %v7222_v47 = vld [vmem:[#allocation11 + $0x350] sm:$0xff]  }
 0x5d3   :  { %6344 = vmatprep.subr.bf16.mxu0 %v7180_v1  ;;  %v7224_v1 = vld [vmem:[#allocation11 + $0x3d0] sm:$0xff]  }
 0x5d4   :  { %6337 = vmatpush3.bf16.msra.mxu1 %v7179_v44  ;;  %v7223_v44 = vld [vmem:[#allocation11 + $0x310] sm:$0xff]  }
 0x5d5   :  { %5178 = vmatmul.mubr.bf16.vlgmr.msra.gmra.mrb[204].mxu0 %v3968_v15  ;;  %6366 = vmatprep.subr.bf16.mxu1 %v7182_v27  ;;  %v7228_v27 = vld [vmem:[#allocation11 + $0x3d8] sm:$0xff]  }
 0x5d6   :  { %6345 = vmatpush3.bf16.msra.mxu0 %v7181_v14  ;;  %5257 = vmatprep.mubr.bf16.mxu0 %v3973_v50  ;;  %v7227_v14 = vld [vmem:[#allocation11 + $0x318] sm:$0xff]   ;;  %v7231_v50 = vld [vmem:[#allocation11 + $0x320] sm:$0xff]  }
 0x5d7   :  { %5218 = vmatmul.mubr.bf16.vlgmr.msra.gmra.mrb[204].mxu1 %v3970_v16  ;;  %6346 = vmatprep.subr.bf16.mxu0 %v7185_v24  ;;  %v7229_v15 = vld [vmem:[#allocation11 + $0x398] sm:$0xff]   ;;  %v7232_v24 = vld [vmem:[#allocation11 + $0x3e0] sm:$0xff]  }
 0x5d8   :  { %6367 = vmatpush3.bf16.msra.mxu1 %v7183_v46  ;;  %5297 = vmatprep.mubr.bf16.mxu1 %v3975_v41  ;;  %v7234_v46 = vld [vmem:[#allocation11 + $0x368] sm:$0xff]   ;;  %v7233_v16 = vld [vmem:[#allocation11 + $0x3a0] sm:$0xff]  }
 0x5d9   :  { %6368 = vmatprep.subr.bf16.mxu1 %v7187_v26  ;;  %v7236_v26 = vld [vmem:[#allocation11 + $0x3e8] sm:$0xff]  }
 0x5da   :  { %6347 = vmatpush3.bf16.msra.mxu0 %v7186_v29  ;;  %v7235_v41 = vld [vmem:[#allocation11 + $0x328] sm:$0xff]   ;;  %v7238_v29 = vld [vmem:[#allocation11 + $0x370] sm:$0xff]  }
 0x5db   :  { %6348 = vmatprep.subr.bf16.mxu0 %v7189_v28  ;;  %v7237_v28 = vld [vmem:[#allocation11 + $0x3a8] sm:$0xff]  }
 0x5dc   :  { %6369 = vmatpush3.bf16.msra.mxu1 %v7188_v43  ;;  %v7240_v43 = vld [vmem:[#allocation11 + $0x3f0] sm:$0xff]  }
 0x5dd   :  { %6370 = vmatprep.subr.bf16.mxu1 %v7191_v23  ;;  %v7239_v23 = vld [vmem:[#allocation11 + $0x330] sm:$0xff]  }
 0x5de   :  { %6349 = vmatpush3.bf16.msra.mxu0 %v7190_v12  ;;  %v7242_v12 = vld [vmem:[#allocation11 + $0x378] sm:$0xff]  }
 0x5df   :  { %6350 = vmatprep.subr.bf16.mxu0 %v7193_v57  ;;  %v7241_v57 = vld [vmem:[#allocation11 + $0x3b0] sm:$0xff]  }
 0x5e0   :  { %6371 = vmatpush3.bf16.msra.mxu1 %v7192_v54  ;;  %v7244_v54 = vld [vmem:[#allocation11 + $0x3f8] sm:$0xff]  }
 0x5e1   :  { %6372 = vmatprep.subr.bf16.mxu1 %v7195_v19  ;;  %v7243_v19 = vld [vmem:[#allocation11 + $0x338] sm:$0xff]  }
 0x5e2   :  { %6351 = vmatpush3.bf16.msra.mxu0 %v7194_v21  ;;  %v7245_v21 = vld [vmem:[#allocation11 + $0x3b8] sm:$0xff]  }
 0x5e3   :  { %6352 = vmatprep.subr.bf16.mxu0 %v7197_v7  ;;  %v3976_v7 = vpack.c.bf16 %v8618_v48, %v8618_v48 }
 0x5e4   :  { %6373 = vmatpush3.bf16.msra.mxu1 %v7196_v39  ;;  %v3978_v39 = vpack.c.bf16 %v8621_v25, %v8621_v25 }
 0x5e5   :  { %6374 = vmatprep.subr.bf16.mxu1 %v7199_v34 }
 0x5e6   :  { %6353 = vmatpush3.bf16.msra.mxu0 %v7198_v42 }
 0x5e7   :  { %6354 = vmatprep.subr.bf16.mxu0 %v7201_v45 }
 0x5e8   :  { %6375 = vmatpush3.bf16.msra.mxu1 %v7200_v51 }
 0x5e9   :  { %6376 = vmatprep.subr.bf16.mxu1 %v7203_v53 }
 0x5ea   :  { %6355 = vmatpush3.bf16.msra.mxu0 %v7202_v2 }
 0x5eb   :  { %6356 = vmatprep.subr.bf16.mxu0 %v7205_v8 }
 0x5ec   :  { %6377 = vmatpush3.bf16.msra.mxu1 %v7204_v5 }
 0x5ed   :  { %6378 = vmatprep.subr.bf16.mxu1 %v7207_v10 }
 0x5ee   :  { %6357 = vmatpush3.bf16.msra.mxu0 %v7206_v62 }
 0x5ef   :  { %6358 = vmatprep.subr.bf16.mxu0 %v7209_v52 }
 0x5f0   :  { %6379 = vmatpush3.bf16.msra.mxu1 %v7208_v0 }
 0x5f1   :  { %6380 = vmatprep.subr.bf16.mxu1 %v7211_v17 }
 0x5f2   :  { %6359 = vmatpush3.bf16.msra.mxu0 %v7210_v38 }
 0x5f3   :  { %6388 = vmatprep.subr.bf16.mxu0 %v7213_v18 }
 0x5f4   :  { %6381 = vmatpush3.bf16.msra.mxu1 %v7212_v4 }
 0x5f5   :  { %5258 = vmatmul.mubr.bf16.vlgmr.msra.gmra.mrb[208].mxu0 %v3972_v11  ;;  %6410 = vmatprep.subr.bf16.mxu1 %v7215_v58 }
 0x5f6   :  { %6389 = vmatpush3.bf16.msra.mxu0 %v7214_v56  ;;  %5337 = vmatprep.mubr.bf16.mxu0 %v3977_v63 }
 0x5f7   :  { %5298 = vmatmul.mubr.bf16.vlgmr.msra.gmra.mrb[208].mxu1 %v3974_v20  ;;  %6390 = vmatprep.subr.bf16.mxu0 %v7218_v6 }
 0x5f8   :  { %6411 = vmatpush3.bf16.msra.mxu1 %v7216_v3  ;;  %5377 = vmatprep.mubr.bf16.mxu1 %v3979_v9 }
 0x5f9   :  { %6412 = vmatprep.subr.bf16.mxu1 %v7220_v22 }
 0x5fa   :  { %6391 = vmatpush3.bf16.msra.mxu0 %v7219_v35 }
 0x5fb   :  { %6392 = vmatprep.subr.bf16.mxu0 %v7222_v47 }
 0x5fc   :  { %6413 = vmatpush3.bf16.msra.mxu1 %v7221_v13 }
 0x5fd   :  { %6414 = vmatprep.subr.bf16.mxu1 %v7224_v1 }
 0x5fe   :  { %6393 = vmatpush3.bf16.msra.mxu0 %v7223_v44 }
 0x5ff   :  { %6394 = vmatprep.subr.bf16.mxu0 %v7226_v36 }
 0x600   :  { %6415 = vmatpush3.bf16.msra.mxu1 %v7225_v40 }
 0x601   :  { %6416 = vmatprep.subr.bf16.mxu1 %v7228_v27 }
 0x602   :  { %6395 = vmatpush3.bf16.msra.mxu0 %v7227_v14 }
 0x603   :  { %6396 = vmatprep.subr.bf16.mxu0 %v7230_v31 }
 0x604   :  { %6417 = vmatpush3.bf16.msra.mxu1 %v7229_v15 }
 0x605   :  { %6418 = vmatprep.subr.bf16.mxu1 %v7232_v24  ;;  %v5938_v24 = vld [vmem:[%s8721_s15] ss:$0 sm:$0xff] }
 0x606   :  { %6397 = vmatpush3.bf16.msra.mxu0 %v7231_v50 }
 0x607   :  { %6398 = vmatprep.subr.bf16.mxu0 %v7234_v46 }
 0x608   :  { %6419 = vmatpush3.bf16.msra.mxu1 %v7233_v16 }
 0x609   :  { %6420 = vmatprep.subr.bf16.mxu1 %v7236_v26  ;;  %v3871_v26 = vld [vmem:[%s8743_s2] sm:$0x3] }
 0x60a   :  { %6399 = vmatpush3.bf16.msra.mxu0 %v7235_v41 }
 0x60b   :  { %6400 = vmatprep.subr.bf16.mxu0 %v7238_v29 }
 0x60c   :  { %6421 = vmatpush3.bf16.msra.mxu1 %v7237_v28 }
 0x60d   :  { %6422 = vmatprep.subr.bf16.mxu1 %v7240_v43 }
 0x60e   :  { %6401 = vmatpush3.bf16.msra.mxu0 %v7239_v23 }
 0x60f   :  { %6402 = vmatprep.subr.bf16.mxu0 %v7242_v12 }
 0x610   :  { %6423 = vmatpush3.bf16.msra.mxu1 %v7241_v57 }
 0x611   :  { %6424 = vmatprep.subr.bf16.mxu1 %v7244_v54 }
 0x612   :  { %6403 = vmatpush3.bf16.msra.mxu0 %v7243_v19 }
 0x614   :  { %6425 = vmatpush3.bf16.msra.mxu1 %v7245_v21 }
 0x615   :  { %5338 = vmatmul.mubr.bf16.vlgmr.msra.gmra.mrb[212].mxu0 %v3976_v7  ;;  %v5421_v7 = vld [vmem:[%s8722_s16] sm:$0xff] }
 0x616   :  { %6941 = vmatprep.mubr.msk.f32.mxu0 %vm7410_vm2, %v7409_v49 }
 0x617   :  { %5378 = vmatmul.mubr.bf16.vlgmr.msra.gmra.mrb[212].mxu1 %v3978_v39  ;;  %v5422_v39 = vld [vmem:[%s8722_s16 + $0x8] sm:$0xff] }
 0x688   :  { %v6272_v34 = vpop.f32.mrb[200].mxu0 }
 0x689   :  { %v6273_v42 = vpop.f32.mrb[201].mxu0 }
 0x68a   :  { %v6274_v45 = vadd.f32 %v6273_v42, %v6272_v34  ;;  %v6275_v51 = vpop.f32.mrb[202].mxu0  ;;  %v6294_v53 = vpop.f32.mrb[200].mxu1  ;;  %v5423_v34 = vld [vmem:[%s8722_s16 + $0x10] sm:$0xff]  ;;  %v7412_v42 = vmov 0.0|0.0  }
 0x68b   :  { %v6276_v2 = vpop.f32.mrb[203].mxu0  ;;  %v6295_v8 = vpop.f32.mrb[201].mxu1  ;;  %6944 = vmatprep.subr.bf16.mxu0 %v7412_v42  ;;  %v5424_v51 = vld [vmem:[%s8722_s16 + $0x18] sm:$0xff]  ;;  %s7413_s16 = smov [#allocation13]  }
 0x68c   :  { %v5100_v59 = vadd.f32 %v6274_v45, %v8615_v61  ;;  %v6296_v37 = vadd.f32 %v6295_v8, %v6294_v53  ;;  %v6297_v5 = vpop.f32.mrb[202].mxu1  ;;  %v6945_v45 = vpack.c.bf16 %v5422_v39, %v5421_v7  ;;  %v6948_v53 = vpack.c.bf16 %v5424_v51, %v5423_v34 }
 0x68d   :  { %v6298_v33 = vpop.f32.mrb[203].mxu1  ;;  %v5940_v5 = vld [vmem:[%s8723_s17] ss:$0 sm:$0xff] }
 0x68e   :  { %v5140_v10 = vadd.f32 %v6296_v37, %v5100_v59  ;;  %6946 = vmatpush3.bf16.msra.mxu0 %v6945_v45 }
 0x68f   :  { %6947 = vmatprep.subr.bf16.mxu0 %v7412_v42 }
 0x692   :  { %6949 = vmatpush3.bf16.msra.mxu0 %v6948_v53 }
 0x6a8   :  { %v6316_v55 = vpop.f32.mrb[204].mxu0 }
 0x6a9   :  { %v6317_v62 = vpop.f32.mrb[205].mxu0 }
 0x6aa   :  { %v6318_v30 = vadd.f32 %v6317_v62, %v6316_v55  ;;  %v6319_v52 = vpop.f32.mrb[206].mxu0  ;;  %v6338_v0 = vpop.f32.mrb[204].mxu1 }
 0x6ab   :  { %v6320_v49 = vpop.f32.mrb[207].mxu0  ;;  %v6339_v48 = vpop.f32.mrb[205].mxu1 }
 0x6ac   :  { %v5180_v17 = vadd.f32 %v6318_v30, %v5140_v10  ;;  %v6340_v38 = vadd.f32 %v6339_v48, %v6338_v0  ;;  %v6341_v25 = vpop.f32.mrb[206].mxu1 }
 0x6ad   :  { %v6342_v18 = vpop.f32.mrb[207].mxu1 }
 0x6ae   :  { %v5220_v4 = vadd.f32 %v6340_v38, %v5180_v17 }
 0x6c8   :  { %v6360_v32 = vpop.f32.mrb[208].mxu0 }
 0x6c9   :  { %v6361_v58 = vpop.f32.mrb[209].mxu0 }
 0x6ca   :  { %v6362_v56 = vadd.f32 %v6361_v58, %v6360_v32  ;;  %v6363_v61 = vpop.f32.mrb[210].mxu0  ;;  %v6382_v60 = vpop.f32.mrb[208].mxu1 }
 0x6cb   :  { %v6364_v11 = vpop.f32.mrb[211].mxu0  ;;  %v6383_v6 = vpop.f32.mrb[209].mxu1 }
 0x6cc   :  { %v5260_v63 = vadd.f32 %v6362_v56, %v5220_v4  ;;  %v6384_v3 = vadd.f32 %v6383_v6, %v6382_v60  ;;  %v6385_v20 = vpop.f32.mrb[210].mxu1 }
 0x6cd   :  { %v6386_v22 = vpop.f32.mrb[211].mxu1 }
 0x6ce   :  { %v5300_v9 = vadd.f32 %v6384_v3, %v5260_v63 }
 0x6e8   :  { %v6404_v35 = vpop.f32.mrb[212].mxu0 }
 0x6e9   :  { %v6405_v47 = vpop.f32.mrb[213].mxu0 }
 0x6ea   :  { %v6406_v13 = vadd.f32 %v6405_v47, %v6404_v35  ;;  %v6407_v1 = vpop.f32.mrb[214].mxu0  ;;  %v6426_v44 = vpop.f32.mrb[212].mxu1 }
 0x6eb   :  { %v6408_v36 = vpop.f32.mrb[215].mxu0  ;;  %v6427_v40 = vpop.f32.mrb[213].mxu1 }
 0x6ec   :  { %v5340_v27 = vadd.f32 %v6406_v13, %v5300_v9  ;;  %v6428_v14 = vadd.f32 %v6427_v40, %v6426_v44  ;;  %v6429_v31 = vpop.f32.mrb[214].mxu1 }
 0x6ed   :  { %v6430_v15 = vpop.f32.mrb[215].mxu1 }
 0x6ee   :  { %v5380_v50 = vadd.f32 %v6428_v14, %v5340_v27 }
 0x6f0   :  { %v5392_v46 = vadd.f32 %v5938_v24, %v5380_v50 }
 0x6f2   :  { %7250 = vtanh.f32 %v5392_v46  ;;  %v5939_v41 = vmul.f32 -1.442695, %v5392_v46 }
 0x6f4   :  { %7252 = vpow2.f32 %v5939_v41 }
 0x6fc   :  { %v7251_v16 = vpop.eup %7250 }
 0x6fd   :  { %5406 = vrot.lane.b32.xlu0 %v7251_v16, %s7404_s30 }
 0x6fe   :  { %v7253_v29 = vpop.eup %7252 }
 0x6ff   :  { %v5396_v28 = vadd.f32 1.0, %v7253_v29 }
 0x701   :  { %5401 = vrot.lane.b32.xlu0 %v3871_v26, %s7411_s3  ;;  %7254 = vrcp.f32 %v5396_v28 }
 0x70b   :  { %v7255_v43 = vpop.eup %7254 }
 0x76f   :  { %v5407_v23 = vpop.permute.xlu0 %5406 }
 0x770   :  { %v5409_v12 = vmul.f32 %v7255_v43, %v5407_v23 }
 0x772   :  { %5411 = vrot.lane.b32.xlu1 %v5409_v12, %s7411_s3 }
 0x773   :  { %v5402_v57 = vpop.permute.xlu0 %5401 }
 0x774   :  { %v5404_v54 = vmul.f32 %v7255_v43, %v5402_v57 }
 0x7e4   :  { %v5412_v19 = vpop.permute.xlu1 %5411 }
 0x7e5   :  { %v5414_v21 = vadd.f32 %v5412_v19, %v5404_v54 }
 0x7e7   :  { %7256 = vtanh.f32 %v5414_v21 }
 0x7f1   :  { %v7257_v2 = vpop.eup %7256 }
 0x7f2   :  { %5417 = vrot.lane.b32.xlu1 %v7257_v2, %s7404_s30  ;;  %s5544_s30 = sshll.u32 %s7413_s16, 4  ;;  %s5545_s30 = int_to_ptr.vmem [resolvable:$true] %s5544_s30 }
 0x7f3   :  { %s7328_s25 = scalar_lea.vmem %s5545_s30, 32  ;;  %p7333_p11 = scmp.lt.s32.totalorder %s5545_s30, %s5545_s30 }
 0x7f4   :  { %p7329_p10 = scmp.ne.s32.totalorder %s5545_s30, %s7328_s25  ;;  %p7334_p12 = scmp.lt.s32.totalorder %s7328_s25, %s7328_s25 }
 0x7f6   :  { %p7335_p13 = por %p7334_p12, %p7333_p11 }
 0x7f8   :  { %p7336_p0 = pnand %p7335_p13, %p7329_p10 }
 0x864   :  { %v5418_v8 = vpop.permute.xlu1 %5417 }
 0x865   :  { %v5420_v59 = vmul.f32 %v7255_v43, %v5418_v8 }
 0x867   :  { %5433 = vrot.lane.b32.xlu0 %v5420_v59, %s7411_s3 }
 0x8d9   :  { %v5434_v37 = vpop.permute.xlu0 %5433 }
 0x8da   :  { %6942 = vmatmul.mubr.msk.f32.vlgmr.msra.gmra.mrb[216].mxu0 %vm4253_vm5, %v5434_v37  ;;  %5522 = vst.msk [vmem:[#allocation13] sm:$0x3] %vm5521_vm6, %v5434_v37 }
 0x9ad   :  { %v5503_v33 = vpop.f32.mrb[216].mxu0 }
 0x9ae   :  { %v5504_v10 = vadd.f32 %v5940_v5, %v5503_v33  ;;  %v6943_v55 = vpop.f32.mrb[217].mxu0 }
 0x9b0   :  { %v5508_v62 = vsel %vm5507_vm7, %v5504_v10, -inf }
 0x9b1   :  { %5509 = vmax.xlane.f32.xlu1 %v5508_v62 }
 0xa3e   :  { %v5510_v30 = vpop.xlane.xlu1 %5509 }
 0xa3f   :  { %v5511_v52 = vsub.f32 %v5504_v10, %v5510_v30 }
 0xa41   :  { %v5512_v0 = vmul.f32 1.442695, %v5511_v52 }
 0xa43   :  { %7258 = vpow2.f32 %v5512_v0 }
 0xa4d   :  { %v7259_v49 = vpop.eup %7258 }
 0xa4e   :  { %v5514_v48 = vsel %vm5507_vm7, %v7259_v49, 0.0 }
 0xa4f   :  { %5515 = vadd.xlane.f32.xlu0 %v5514_v48 }
 0xa50   :  { %7339 = shalt.err (!%p7336_p0)
}
 0xa51   :  { %s7340_s22 = scalar_lea.hbm %s8725_s19, 32 }
 0xa52   :  { %p7341_p1 = scmp.ne.s32.totalorder %s8725_s19, %s7340_s22  ;;  %p7344_p2 = scmp.lt.u32.totalorder %s7340_s22, %s8725_s19 }
 0xa54   :  { %p7346_p3 = pnand %p7344_p2, %p7341_p1 }
 0xa56   :  { %7349 = shalt.err (!%p7346_p3)
}
 0xa57   :  { %5547 = dma.vmem_to_hbm [thread:$0]  %s5545_s30, 32, %s8725_s19, [#allocation14]  }
 0xa58   :  { %s7414_s11 = smov 96   ;;  %s7415_s12 = smov [#allocation15]  }
 0xa59   :  { %s5554_s0 = sshll.u32 %s7415_s12, 4  ;;  %s5555_s0 = int_to_ptr.vmem [resolvable:$true] %s5554_s0 }
 0xa5a   :  { %s7350_s23 = scalar_lea.vmem %s5555_s0, 32  ;;  %p7355_p5 = scmp.lt.s32.totalorder %s5555_s0, %s5555_s0 }
 0xa5b   :  { %p7351_p4 = scmp.ne.s32.totalorder %s5555_s0, %s7350_s23  ;;  %p7356_p6 = scmp.lt.s32.totalorder %s7350_s23, %s7350_s23 }
 0xa5d   :  { %p7357_p7 = por %p7356_p6, %p7355_p5 }
 0xa5f   :  { %p7358_p8 = pnand %p7357_p7, %p7351_p4 }
 0xa65   :  { %5524 = vrot.lane.b32.xlu0 %v5414_v21, %s7414_s11 }
 0xadc   :  { %v5516_v17 = vpop.xlane.xlu0 %5515 }
 0xadd   :  { %7260 = vrcp.f32 %v5516_v17 }
 0xae0   :  { %v5525_v38 = vpop.permute.xlu0 %5524 }
 0xae1   :  { %5527 = vst.msk [vmem:[#allocation15] sm:$0x3] %vm5521_vm6, %v5525_v38 }
 0xae2   :  { %7361 = shalt.err (!%p7358_p8)
}
 0xae3   :  { %s7362_s19 = scalar_lea.hbm %s8726_s20, 32 }
 0xae4   :  { %p7363_p9 = scmp.ne.s32.totalorder %s8726_s20, %s7362_s19  ;;  %p7366_p10 = scmp.lt.u32.totalorder %s7362_s19, %s8726_s20 }
 0xae6   :  { %p7368_p11 = pnand %p7366_p10, %p7363_p9 }
 0xae8   :  { %7371 = shalt.err (!%p7368_p11)
}
 0xae9   :  { %5557 = dma.vmem_to_hbm [thread:$0]  %s5555_s0, 32, %s8726_s20, [#allocation14]   ;;  %v7261_v25 = vpop.eup %7260 }
 0xaea   :  { %s7416_s8 = smov [#allocation12]   ;;  %v5518_v18 = vmul.f32 %v7261_v25, %v7259_v49 }
 0xaeb   :  { %s5534_s29 = sshll.u32 %s7416_s8, 4  ;;  %s5535_s29 = int_to_ptr.vmem [resolvable:$true] %s5534_s29 }
 0xaec   :  { %5519 = vst.msk [vmem:[#allocation12] sm:$0x3] %vm5507_vm7, %v5518_v18  ;;  %s7372_s24 = scalar_lea.vmem %s5535_s29, 32  ;;  %p7377_p13 = scmp.lt.s32.totalorder %s5535_s29, %s5535_s29 }
 0xaed   :  { %p7373_p12 = scmp.ne.s32.totalorder %s5535_s29, %s7372_s24  ;;  %p7378_p0 = scmp.lt.s32.totalorder %s7372_s24, %s7372_s24 }
 0xaef   :  { %p7379_p1 = por %p7378_p0, %p7377_p13 }
 0xaf1   :  { %p7380_p2 = pnand %p7379_p1, %p7373_p12 }
 0xaf3   :  { %7383 = shalt.err (!%p7380_p2)
}
 0xaf4   :  { %s7384_s30 = scalar_lea.hbm %s8724_s18, 32 }
 0xaf5   :  { %p7385_p3 = scmp.ne.s32.totalorder %s8724_s18, %s7384_s30  ;;  %p7388_p4 = scmp.lt.u32.totalorder %s7384_s30, %s8724_s18 }
 0xaf7   :  { %p7390_p5 = pnand %p7388_p4, %p7385_p3 }
 0xaf9   :  { %7393 = shalt.err (!%p7390_p5)
}
 0xafa   :  { %5537 = dma.vmem_to_hbm [thread:$0]  %s5535_s29, 32, %s8724_s18, [#allocation8]  }
 0xafb   :  { %7398 = dma.done.wait [#allocation8], 32  }
 0xafc   :  { %7399 = vsyncadd [#allocation8], 4294967264 }
 0xafd   :  { %7400 = dma.done.wait [#allocation14], 64  }
 0xafe   :  { %7401 = vsyncadd [#allocation14], 4294967232 }
 0xaff   :  { %5567 = vsyncpa [#allocation7], 1 }
 0xb00   :  { %5568 = vsyncpa [#allocation10], 1 }
 0xb01   :  { %5569 = vsyncpa [#allocation8], 1 }
 0xb02   :  { %5570 = vsyncpa [#allocation14], 1 }

</bundles_post_ra>
